<compile_context>
chip_gen: v7x
topology: tpu7x:2x2x1
jax: 0.10.0
libtpu: 0.0.40
codegen_flags: <defaults>
</compile_context>

<pallas_src>
import jax
import jax.numpy as jnp
from jax.experimental import pallas as pl
from jax.experimental.pallas import tpu as pltpu


# --------------------------------------------------------------------------- kernel

def _eeg3accel_kernel(x_ref, w2_ref, b2_ref, w3_ref, b3_ref, wih_ref, whh_ref,
                      bl_ref, wfc_ref, bfc_ref, out_ref):
    """Fused conv->pool->conv->pool->flatten->LSTM->fc for one batch tile.

    x_ref   : (L, TB, C)       input tile, length-major, channel-last
    w2_ref  : (3, C, C1)       conv1 weight, one (C, C1) matrix per tap; output
                               columns permuted [even | odd] for the pool
    b2_ref  : (1, C1)
    w3_ref  : (3, C1//2, C2)   conv2 weight (same packing)
    b3_ref  : (1, C2)
    wih_ref : (L2, C2//2, 4H)  LSTM input projection, rows grouped per length slot
    whh_ref : (H, 4H)
    bl_ref  : (1, 4H)          b_ih + b_hh
    wfc_ref : (H, O)
    bfc_ref : (1, O)
    out_ref : (TB//T, O)
    """
    f32 = jnp.float32
    L, TB, _ = x_ref.shape
    H = bl_ref.shape[-1] // 4
    TI = out_ref.shape[0]            # LSTM batch rows handled by this tile
    T = TB // TI                     # LSTM sequence length of the view

    def conv_relu(slabs, w_ref, b_ref):
        # 'same' k=3 Conv1d as three row-stacked matmuls (one per tap).
        zero = jnp.zeros_like(slabs[0])
        left = jnp.concatenate([zero] + slabs[:-1], axis=0)
        mid = jnp.concatenate(slabs, axis=0)
        right = jnp.concatenate(slabs[1:] + [zero], axis=0)
        y = (jnp.dot(left, w_ref[0], preferred_element_type=f32)
             + jnp.dot(mid, w_ref[1], preferred_element_type=f32)
             + jnp.dot(right, w_ref[2], preferred_element_type=f32)
             + b_ref[...])
        return jnp.maximum(y, 0.0)                      # (len(slabs)*TB, Cout)

    def maxpool2d(y):
        # PyTorch MaxPool2d(2) applied to the 3-D (B, channels, length) activation.
        # Channel pairs: conv columns were pre-permuted [even | odd], so the
        # channel reduction is a max of two contiguous lane halves.
        cout = y.shape[-1]
        ch = jnp.maximum(y[:, :cout // 2], y[:, cout // 2:])
        # Length pairs: adjacent row blocks of TB rows.
        n_len = y.shape[0] // TB
        return [jnp.maximum(ch[(2 * l) * TB:(2 * l + 1) * TB, :],
                            ch[(2 * l + 1) * TB:(2 * l + 2) * TB, :])
                for l in range(n_len // 2)]

    # ---- conv stack: per-length-position (TB, channels) slabs ----
    xs = [x_ref[l] for l in range(L)]
    h1 = maxpool2d(conv_relu(xs, w2_ref, b2_ref))       # L/2 slabs of (TB, C1//2)
    z = maxpool2d(conv_relu(h1, w3_ref, b3_ref))        # L/4 slabs of (TB, C2//2)

    # ---- Flatten + LSTM input projection for every sample row at once ----
    # wih_ref[l] already holds the weight rows of the features in length slot l,
    # so no in-kernel transpose / flatten permutation is needed.
    gx = bl_ref[...]
    for l in range(len(z)):
        gx = gx + jnp.dot(z[l], wih_ref[l], preferred_element_type=f32)
    # gx: (TB, 4H) == x @ W_ih.T + b_ih + b_hh for every sample in the tile.

    # ---- x.view(F, -1, F): LSTM batch row i takes time step t from sample i*T+t.
    row = jax.lax.broadcasted_iota(jnp.int32, (TI, TB), 0)
    col = jax.lax.broadcasted_iota(jnp.int32, (TI, TB), 1)

    h = jnp.zeros((TI, H), f32)
    c = jnp.zeros((TI, H), f32)
    h_t0 = h
    for t in range(T):                                  # tiny static trip count
        sel = (col == row * T + t).astype(f32)          # exact 0/1 row-gather
        gates = (jnp.dot(sel, gx, preferred_element_type=f32)
                 + jnp.dot(h, whh_ref[...], preferred_element_type=f32))
        i_g = jax.nn.sigmoid(gates[:, 0 * H:1 * H])
        f_g = jax.nn.sigmoid(gates[:, 1 * H:2 * H])
        g_g = jnp.tanh(gates[:, 2 * H:3 * H])
        o_g = jax.nn.sigmoid(gates[:, 3 * H:4 * H])
        c = f_g * c + i_g * g_g
        h = o_g * jnp.tanh(c)
        if t == 0:
            h_t0 = h                                    # lstm_out[:, 0, :]

    # ---- fc on lstm_out[:, 0, :] -- the only HBM-visible store ----
    out_ref[...] = (jnp.dot(h_t0, wfc_ref[...], preferred_element_type=f32)
                    + bfc_ref[...])


# --------------------------------------------------------------------------- wrapper

def _even_odd_perm(n):
    return jnp.concatenate([jnp.arange(0, n, 2), jnp.arange(1, n, 2)])


def eeg3accel_forward(x, params, *, block_b=None):
    """EEG3AccelModel forward.  x: (B, num_channels, L) float32."""
    B, C, L = x.shape
    w2, b2 = params['conv2_w'], params['conv2_b']       # (C1, C, 3), (C1,)
    w3, b3 = params['conv3_w'], params['conv3_b']       # (C2, C1//2, 3), (C2,)
    w_ih, w_hh = params['lstm_w_ih'], params['lstm_w_hh']
    b_ih, b_hh = params['lstm_b_ih'], params['lstm_b_hh']
    w_fc, b_fc = params['fc_w'], params['fc_b']

    C1, C2, H, O = b2.shape[0], b3.shape[0], w_hh.shape[1], b_fc.shape[0]
    assert L % 4 == 0 and C1 % 2 == 0 and C2 % 2 == 0
    L2 = L // 4
    F = (C2 // 2) * L2                                  # flatten size == LSTM input
    assert w_ih.shape == (4 * H, F)
    assert B % F == 0, "x.view(F, -1, F) requires batch % flatten_size == 0"
    T = B // F                                          # LSTM sequence length

    # Batch tile: prefer 2 grid steps (one per v7x core, low per-step overhead on
    # single-core chips); fall back to the whole batch.  TI must stay 8-aligned.
    if block_b is None:
        block_b = B
        if B % 2 == 0:
            half = B // 2
            if half % T == 0 and (half // T) % 8 == 0:
                block_b = half
    assert B % block_b == 0 and block_b % T == 0 and (block_b // T) % 8 == 0
    TI = block_b // T                                   # LSTM rows per tile

    # ---- host-side weight packing (one-time layout plumbing, no kernel cost) ----
    p1, p2 = _even_odd_perm(C1), _even_odd_perm(C2)
    w2s = jnp.transpose(w2, (2, 1, 0))[:, :, p1]        # (3, C, C1)
    b2p = b2[p1][None, :]
    w3s = jnp.transpose(w3, (2, 1, 0))[:, :, p2]        # (3, C1//2, C2)
    b3p = b3[p2][None, :]
    wih_t = w_ih.T                                      # (F, 4H); PyTorch flatten is
    # channel-major / length-minor, so length slot l uses rows l, l+L2, l+2*L2, ...
    wih_s = jnp.stack([wih_t[l::L2, :] for l in range(L2)], axis=0)  # (L2, C2//2, 4H)
    whh_t = w_hh.T                                      # (H, 4H)
    bl = (b_ih + b_hh)[None, :]
    wfc_t = w_fc.T                                      # (H, O)
    bfc = b_fc[None, :]
    x_k = jnp.transpose(x, (2, 0, 1))                   # (L, B, C) length-major

    def full(a):
        zeros = (0,) * a.ndim
        return pl.BlockSpec(a.shape, lambda g: zeros)

    return pl.pallas_call(
        _eeg3accel_kernel,
        out_shape=jax.ShapeDtypeStruct((B // T, O), jnp.float32),
        grid=(B // block_b,),
        in_specs=[
            pl.BlockSpec((L, block_b, C), lambda g: (0, g, 0)),
            full(w2s), full(b2p), full(w3s), full(b3p),
            full(wih_s), full(whh_t), full(bl), full(wfc_t), full(bfc),
        ],
        out_specs=pl.BlockSpec((TI, O), lambda g: (g, 0)),
        compiler_params=pltpu.CompilerParams(
            dimension_semantics=("parallel",)),
    )(x_k, w2s, b2p, w3s, b3p, wih_s, whh_t, bl, wfc_t, bfc)


# --------------------------------------------------------------------------- reference (pure JAX, PyTorch-native layout)

def _ref_forward(x, params):
    prec = jax.lax.Precision.HIGHEST

    def conv1d(inp, w, b):                              # nn.Conv1d(k=3, p=1)
        y = jax.lax.conv_general_dilated(
            inp, w, window_strides=(1,), padding=((1, 1),),
            dimension_numbers=('NCH', 'OIH', 'NCH'), precision=prec)
        return y + b[None, :, None]

    def maxpool2d(z):                                   # nn.MaxPool2d(2) on 3-D input
        Bz, Cz, Lz = z.shape
        return jnp.max(z.reshape(Bz, Cz // 2, 2, Lz // 2, 2), axis=(2, 4))

    h = maxpool2d(jax.nn.relu(conv1d(x, params['conv2_w'], params['conv2_b'])))
    h = maxpool2d(jax.nn.relu(conv1d(h, params['conv3_w'], params['conv3_b'])))
    flat = h.reshape(h.shape[0], -1)                    # nn.Flatten
    F = flat.shape[1]
    seq = flat.reshape(F, -1, F)                        # x.view(x.size(1), -1, x.size(1))

    w_ih, w_hh = params['lstm_w_ih'], params['lstm_w_hh']
    b_ih, b_hh = params['lstm_b_ih'], params['lstm_b_hh']
    H = w_hh.shape[1]
    N, T, _ = seq.shape
    hs = jnp.zeros((N, H), jnp.float32)
    cs = jnp.zeros((N, H), jnp.float32)
    outs = []
    for t in range(T):
        g = (jnp.dot(seq[:, t, :], w_ih.T, precision=prec) + b_ih
             + jnp.dot(hs, w_hh.T, precision=prec) + b_hh)
        i_g = jax.nn.sigmoid(g[:, :H])
        f_g = jax.nn.sigmoid(g[:, H:2 * H])
        g_g = jnp.tanh(g[:, 2 * H:3 * H])
        o_g = jax.nn.sigmoid(g[:, 3 * H:])
        cs = f_g * cs + i_g * g_g
        hs = o_g * jnp.tanh(cs)
        outs.append(hs)
    return jnp.dot(outs[0], params['fc_w'].T, precision=prec) + params['fc_b']


# --------------------------------------------------------------------------- main

if __name__ == "__main__":
    # Shapes implied by the forward: flatten size F = 64 * (L/4) = 128, and the
    # .view(F, -1, F) requires batch % F == 0  ->  batch = 256, LSTM seq len = 2.
    B, C, L = 256, 4, 8
    HID, OUT = 32, 3

    key = jax.random.PRNGKey(0)
    ks = jax.random.split(key, 11)

    def nrm(k, shape, s=0.1):
        return jax.random.normal(k, shape, dtype=jnp.float32) * s

    params = {
        'conv2_w': nrm(ks[0], (64, C, 3)), 'conv2_b': nrm(ks[1], (64,)),
        # TODO(synk): module declares Conv1d(64,128,...) but MaxPool2d(2) on the 3-D
        # activation halves the channel dim to 32; sized to the actual data flow.
        'conv3_w': nrm(ks[2], (128, 32, 3)), 'conv3_b': nrm(ks[3], (128,)),
        # TODO(synk): module declares nn.LSTM(129, hidden) but the flatten size the
        # forward produces is 128; sized to the actual data flow.
        'lstm_w_ih': nrm(ks[4], (4 * HID, 128)), 'lstm_w_hh': nrm(ks[5], (4 * HID, HID)),
        'lstm_b_ih': nrm(ks[6], (4 * HID,)), 'lstm_b_hh': nrm(ks[7], (4 * HID,)),
        'fc_w': nrm(ks[8], (OUT, HID)), 'fc_b': nrm(ks[9], (OUT,)),
    }
    x = jax.random.normal(ks[10], (B, C, L), dtype=jnp.float32)

    out = jax.block_until_ready(jax.jit(eeg3accel_forward)(x, params))
    assert out.shape == (128, OUT), out.shape

    ref = jax.block_until_ready(_ref_forward(x, params))
    err = float(jnp.max(jnp.abs(out - ref)))
    assert jnp.allclose(out, ref, atol=5e-3, rtol=5e-3), err

    print("KERNEL_OK")
</pallas_src>

<mosaic_0001>
module attributes {stable_mosaic.version = 11 : i64} {
  func.func @_eeg3accel_kernel(%arg0: i32, %arg1: memref<8x128x4xf32, #tpu.memory_space<vmem>>, %arg2: memref<3x4x64xf32, #tpu.memory_space<vmem>>, %arg3: memref<1x64xf32, #tpu.memory_space<vmem>>, %arg4: memref<3x32x128xf32, #tpu.memory_space<vmem>>, %arg5: memref<1x128xf32, #tpu.memory_space<vmem>>, %arg6: memref<2x64x128xf32, #tpu.memory_space<vmem>>, %arg7: memref<32x128xf32, #tpu.memory_space<vmem>>, %arg8: memref<1x128xf32, #tpu.memory_space<vmem>>, %arg9: memref<32x3xf32, #tpu.memory_space<vmem>>, %arg10: memref<1x3xf32, #tpu.memory_space<vmem>>, %arg11: memref<64x3xf32, #tpu.memory_space<vmem>>) attributes {dimension_semantics = [#tpu.dimension_semantics<parallel>], iteration_bounds = array<i64: 2>, scalar_prefetch = 0 : i64, scratch_operands = 0 : i64, tpu.core_type = #tpu.core_type<tc>, window_params = [{transform_indices = @transform_0, window_bounds = array<i64: 8, 128, 4>}, {pipeline_mode = #tpu.pipeline_mode<synchronous>, transform_indices = @transform_1, window_bounds = array<i64: 3, 4, 64>}, {pipeline_mode = #tpu.pipeline_mode<synchronous>, transform_indices = @transform_2, window_bounds = array<i64: 1, 64>}, {pipeline_mode = #tpu.pipeline_mode<synchronous>, transform_indices = @transform_3, window_bounds = array<i64: 3, 32, 128>}, {pipeline_mode = #tpu.pipeline_mode<synchronous>, transform_indices = @transform_4, window_bounds = array<i64: 1, 128>}, {pipeline_mode = #tpu.pipeline_mode<synchronous>, transform_indices = @transform_5, window_bounds = array<i64: 2, 64, 128>}, {pipeline_mode = #tpu.pipeline_mode<synchronous>, transform_indices = @transform_6, window_bounds = array<i64: 32, 128>}, {pipeline_mode = #tpu.pipeline_mode<synchronous>, transform_indices = @transform_7, window_bounds = array<i64: 1, 128>}, {pipeline_mode = #tpu.pipeline_mode<synchronous>, transform_indices = @transform_8, window_bounds = array<i64: 32, 3>}, {pipeline_mode = #tpu.pipeline_mode<synchronous>, transform_indices = @transform_9, window_bounds = array<i64: 1, 3>}, {transform_indices = @transform_10, window_bounds = array<i64: 64, 3>}]} {
    %c0 = arith.constant 0 : index
    %c0_0 = arith.constant 0 : index
    %c0_1 = arith.constant 0 : index
    %0 = vector.load %arg1[%c0, %c0_0, %c0_1] : memref<8x128x4xf32, #tpu.memory_space<vmem>>, vector<1x128x4xf32>
    %1 = vector.shape_cast %0 : vector<1x128x4xf32> to vector<128x4xf32>
    %c1 = arith.constant 1 : index
    %c0_2 = arith.constant 0 : index
    %c0_3 = arith.constant 0 : index
    %2 = vector.load %arg1[%c1, %c0_2, %c0_3] : memref<8x128x4xf32, #tpu.memory_space<vmem>>, vector<1x128x4xf32>
    %3 = vector.shape_cast %2 : vector<1x128x4xf32> to vector<128x4xf32>
    %c2 = arith.constant 2 : index
    %c0_4 = arith.constant 0 : index
    %c0_5 = arith.constant 0 : index
    %4 = vector.load %arg1[%c2, %c0_4, %c0_5] : memref<8x128x4xf32, #tpu.memory_space<vmem>>, vector<1x128x4xf32>
    %5 = vector.shape_cast %4 : vector<1x128x4xf32> to vector<128x4xf32>
    %c3 = arith.constant 3 : index
    %c0_6 = arith.constant 0 : index
    %c0_7 = arith.constant 0 : index
    %6 = vector.load %arg1[%c3, %c0_6, %c0_7] : memref<8x128x4xf32, #tpu.memory_space<vmem>>, vector<1x128x4xf32>
    %7 = vector.shape_cast %6 : vector<1x128x4xf32> to vector<128x4xf32>
    %c4 = arith.constant 4 : index
    %c0_8 = arith.constant 0 : index
    %c0_9 = arith.constant 0 : index
    %8 = vector.load %arg1[%c4, %c0_8, %c0_9] : memref<8x128x4xf32, #tpu.memory_space<vmem>>, vector<1x128x4xf32>
    %9 = vector.shape_cast %8 : vector<1x128x4xf32> to vector<128x4xf32>
    %c5 = arith.constant 5 : index
    %c0_10 = arith.constant 0 : index
    %c0_11 = arith.constant 0 : index
    %10 = vector.load %arg1[%c5, %c0_10, %c0_11] : memref<8x128x4xf32, #tpu.memory_space<vmem>>, vector<1x128x4xf32>
    %11 = vector.shape_cast %10 : vector<1x128x4xf32> to vector<128x4xf32>
    %c6 = arith.constant 6 : index
    %c0_12 = arith.constant 0 : index
    %c0_13 = arith.constant 0 : index
    %12 = vector.load %arg1[%c6, %c0_12, %c0_13] : memref<8x128x4xf32, #tpu.memory_space<vmem>>, vector<1x128x4xf32>
    %13 = vector.shape_cast %12 : vector<1x128x4xf32> to vector<128x4xf32>
    %c7 = arith.constant 7 : index
    %c0_14 = arith.constant 0 : index
    %c0_15 = arith.constant 0 : index
    %14 = vector.load %arg1[%c7, %c0_14, %c0_15] : memref<8x128x4xf32, #tpu.memory_space<vmem>>, vector<1x128x4xf32>
    %15 = vector.shape_cast %14 : vector<1x128x4xf32> to vector<128x4xf32>
    %cst = arith.constant 0.000000e+00 : f32
    %16 = vector.broadcast %cst : f32 to vector<128x4xf32>
    %17 = tpu.concatenate %16, %1, %3, %5, %7, %9, %11, %13 in 0 : vector<128x4xf32>, vector<128x4xf32>, vector<128x4xf32>, vector<128x4xf32>, vector<128x4xf32>, vector<128x4xf32>, vector<128x4xf32>, vector<128x4xf32> -> vector<1024x4xf32>
    %18 = tpu.concatenate %1, %3, %5, %7, %9, %11, %13, %15 in 0 : vector<128x4xf32>, vector<128x4xf32>, vector<128x4xf32>, vector<128x4xf32>, vector<128x4xf32>, vector<128x4xf32>, vector<128x4xf32>, vector<128x4xf32> -> vector<1024x4xf32>
    %19 = tpu.concatenate %3, %5, %7, %9, %11, %13, %15, %16 in 0 : vector<128x4xf32>, vector<128x4xf32>, vector<128x4xf32>, vector<128x4xf32>, vector<128x4xf32>, vector<128x4xf32>, vector<128x4xf32>, vector<128x4xf32> -> vector<1024x4xf32>
    %c0_16 = arith.constant 0 : index
    %c0_17 = arith.constant 0 : index
    %c0_18 = arith.constant 0 : index
    %20 = vector.load %arg2[%c0_16, %c0_17, %c0_18] : memref<3x4x64xf32, #tpu.memory_space<vmem>>, vector<1x4x64xf32>
    %21 = vector.shape_cast %20 : vector<1x4x64xf32> to vector<4x64xf32>
    %cst_19 = arith.constant dense<0.000000e+00> : vector<1024x64xf32>
    %22 = tpu.matmul %17, %21, %cst_19 {dimension_numbers = #tpu.dot_dimension_numbers<[1], [0], [0], [1], [0, 0, 1, 1], [], []>} : vector<1024x4xf32>, vector<4x64xf32>, vector<1024x64xf32> -> vector<1024x64xf32>
    %c1_20 = arith.constant 1 : index
    %c0_21 = arith.constant 0 : index
    %c0_22 = arith.constant 0 : index
    %23 = vector.load %arg2[%c1_20, %c0_21, %c0_22] : memref<3x4x64xf32, #tpu.memory_space<vmem>>, vector<1x4x64xf32>
    %24 = vector.shape_cast %23 : vector<1x4x64xf32> to vector<4x64xf32>
    %cst_23 = arith.constant dense<0.000000e+00> : vector<1024x64xf32>
    %25 = tpu.matmul %18, %24, %cst_23 {dimension_numbers = #tpu.dot_dimension_numbers<[1], [0], [0], [1], [0, 0, 1, 1], [], []>} : vector<1024x4xf32>, vector<4x64xf32>, vector<1024x64xf32> -> vector<1024x64xf32>
    %26 = arith.addf %22, %25 : vector<1024x64xf32>
    %c2_24 = arith.constant 2 : index
    %c0_25 = arith.constant 0 : index
    %c0_26 = arith.constant 0 : index
    %27 = vector.load %arg2[%c2_24, %c0_25, %c0_26] : memref<3x4x64xf32, #tpu.memory_space<vmem>>, vector<1x4x64xf32>
    %28 = vector.shape_cast %27 : vector<1x4x64xf32> to vector<4x64xf32>
    %cst_27 = arith.constant dense<0.000000e+00> : vector<1024x64xf32>
    %29 = tpu.matmul %19, %28, %cst_27 {dimension_numbers = #tpu.dot_dimension_numbers<[1], [0], [0], [1], [0, 0, 1, 1], [], []>} : vector<1024x4xf32>, vector<4x64xf32>, vector<1024x64xf32> -> vector<1024x64xf32>
    %30 = arith.addf %26, %29 : vector<1024x64xf32>
    %c0_28 = arith.constant 0 : index
    %c0_29 = arith.constant 0 : index
    %31 = vector.load %arg3[%c0_28, %c0_29] : memref<1x64xf32, #tpu.memory_space<vmem>>, vector<1x64xf32>
    %32 = vector.broadcast %31 : vector<1x64xf32> to vector<1024x64xf32>
    %33 = arith.addf %30, %32 : vector<1024x64xf32>
    %cst_30 = arith.constant 0.000000e+00 : f32
    %34 = vector.broadcast %cst_30 : f32 to vector<1024x64xf32>
    %35 = arith.maximumf %33, %34 : vector<1024x64xf32>
    %36 = vector.extract_strided_slice %35 {offsets = [0, 0], sizes = [1024, 32], strides = [1, 1]} : vector<1024x64xf32> to vector<1024x32xf32>
    %37 = vector.extract_strided_slice %35 {offsets = [0, 32], sizes = [1024, 32], strides = [1, 1]} : vector<1024x64xf32> to vector<1024x32xf32>
    %38 = arith.maximumf %36, %37 : vector<1024x32xf32>
    %39 = vector.extract_strided_slice %38 {offsets = [0, 0], sizes = [128, 32], strides = [1, 1]} : vector<1024x32xf32> to vector<128x32xf32>
    %40 = vector.extract_strided_slice %38 {offsets = [128, 0], sizes = [128, 32], strides = [1, 1]} : vector<1024x32xf32> to vector<128x32xf32>
    %41 = arith.maximumf %39, %40 : vector<128x32xf32>
    %42 = vector.extract_strided_slice %38 {offsets = [256, 0], sizes = [128, 32], strides = [1, 1]} : vector<1024x32xf32> to vector<128x32xf32>
    %43 = vector.extract_strided_slice %38 {offsets = [384, 0], sizes = [128, 32], strides = [1, 1]} : vector<1024x32xf32> to vector<128x32xf32>
    %44 = arith.maximumf %42, %43 : vector<128x32xf32>
    %45 = vector.extract_strided_slice %38 {offsets = [512, 0], sizes = [128, 32], strides = [1, 1]} : vector<1024x32xf32> to vector<128x32xf32>
    %46 = vector.extract_strided_slice %38 {offsets = [640, 0], sizes = [128, 32], strides = [1, 1]} : vector<1024x32xf32> to vector<128x32xf32>
    %47 = arith.maximumf %45, %46 : vector<128x32xf32>
    %48 = vector.extract_strided_slice %38 {offsets = [768, 0], sizes = [128, 32], strides = [1, 1]} : vector<1024x32xf32> to vector<128x32xf32>
    %49 = vector.extract_strided_slice %38 {offsets = [896, 0], sizes = [128, 32], strides = [1, 1]} : vector<1024x32xf32> to vector<128x32xf32>
    %50 = arith.maximumf %48, %49 : vector<128x32xf32>
    %cst_31 = arith.constant 0.000000e+00 : f32
    %51 = vector.broadcast %cst_31 : f32 to vector<128x32xf32>
    %52 = tpu.concatenate %51, %41, %44, %47 in 0 : vector<128x32xf32>, vector<128x32xf32>, vector<128x32xf32>, vector<128x32xf32> -> vector<512x32xf32>
    %53 = tpu.concatenate %41, %44, %47, %50 in 0 : vector<128x32xf32>, vector<128x32xf32>, vector<128x32xf32>, vector<128x32xf32> -> vector<512x32xf32>
    %54 = tpu.concatenate %44, %47, %50, %51 in 0 : vector<128x32xf32>, vector<128x32xf32>, vector<128x32xf32>, vector<128x32xf32> -> vector<512x32xf32>
    %c0_32 = arith.constant 0 : index
    %c0_33 = arith.constant 0 : index
    %c0_34 = arith.constant 0 : index
    %55 = vector.load %arg4[%c0_32, %c0_33, %c0_34] : memref<3x32x128xf32, #tpu.memory_space<vmem>>, vector<1x32x128xf32>
    %56 = vector.shape_cast %55 : vector<1x32x128xf32> to vector<32x128xf32>
    %cst_35 = arith.constant dense<0.000000e+00> : vector<512x128xf32>
    %57 = tpu.matmul %52, %56, %cst_35 {dimension_numbers = #tpu.dot_dimension_numbers<[1], [0], [0], [1], [0, 0, 1, 1], [], []>} : vector<512x32xf32>, vector<32x128xf32>, vector<512x128xf32> -> vector<512x128xf32>
    %c1_36 = arith.constant 1 : index
    %c0_37 = arith.constant 0 : index
    %c0_38 = arith.constant 0 : index
    %58 = vector.load %arg4[%c1_36, %c0_37, %c0_38] : memref<3x32x128xf32, #tpu.memory_space<vmem>>, vector<1x32x128xf32>
    %59 = vector.shape_cast %58 : vector<1x32x128xf32> to vector<32x128xf32>
    %cst_39 = arith.constant dense<0.000000e+00> : vector<512x128xf32>
    %60 = tpu.matmul %53, %59, %cst_39 {dimension_numbers = #tpu.dot_dimension_numbers<[1], [0], [0], [1], [0, 0, 1, 1], [], []>} : vector<512x32xf32>, vector<32x128xf32>, vector<512x128xf32> -> vector<512x128xf32>
    %61 = arith.addf %57, %60 : vector<512x128xf32>
    %c2_40 = arith.constant 2 : index
    %c0_41 = arith.constant 0 : index
    %c0_42 = arith.constant 0 : index
    %62 = vector.load %arg4[%c2_40, %c0_41, %c0_42] : memref<3x32x128xf32, #tpu.memory_space<vmem>>, vector<1x32x128xf32>
    %63 = vector.shape_cast %62 : vector<1x32x128xf32> to vector<32x128xf32>
    %cst_43 = arith.constant dense<0.000000e+00> : vector<512x128xf32>
    %64 = tpu.matmul %54, %63, %cst_43 {dimension_numbers = #tpu.dot_dimension_numbers<[1], [0], [0], [1], [0, 0, 1, 1], [], []>} : vector<512x32xf32>, vector<32x128xf32>, vector<512x128xf32> -> vector<512x128xf32>
    %65 = arith.addf %61, %64 : vector<512x128xf32>
    %c0_44 = arith.constant 0 : index
    %c0_45 = arith.constant 0 : index
    %66 = vector.load %arg5[%c0_44, %c0_45] : memref<1x128xf32, #tpu.memory_space<vmem>>, vector<1x128xf32>
    %67 = vector.broadcast %66 : vector<1x128xf32> to vector<512x128xf32>
    %68 = arith.addf %65, %67 : vector<512x128xf32>
    %cst_46 = arith.constant 0.000000e+00 : f32
    %69 = vector.broadcast %cst_46 : f32 to vector<512x128xf32>
    %70 = arith.maximumf %68, %69 : vector<512x128xf32>
    %71 = vector.extract_strided_slice %70 {offsets = [0, 0], sizes = [512, 64], strides = [1, 1]} : vector<512x128xf32> to vector<512x64xf32>
    %72 = vector.extract_strided_slice %70 {offsets = [0, 64], sizes = [512, 64], strides = [1, 1]} : vector<512x128xf32> to vector<512x64xf32>
    %73 = arith.maximumf %71, %72 : vector<512x64xf32>
    %74 = vector.extract_strided_slice %73 {offsets = [0, 0], sizes = [128, 64], strides = [1, 1]} : vector<512x64xf32> to vector<128x64xf32>
    %75 = vector.extract_strided_slice %73 {offsets = [128, 0], sizes = [128, 64], strides = [1, 1]} : vector<512x64xf32> to vector<128x64xf32>
    %76 = arith.maximumf %74, %75 : vector<128x64xf32>
    %77 = vector.extract_strided_slice %73 {offsets = [256, 0], sizes = [128, 64], strides = [1, 1]} : vector<512x64xf32> to vector<128x64xf32>
    %78 = vector.extract_strided_slice %73 {offsets = [384, 0], sizes = [128, 64], strides = [1, 1]} : vector<512x64xf32> to vector<128x64xf32>
    %79 = arith.maximumf %77, %78 : vector<128x64xf32>
    %c0_47 = arith.constant 0 : index
    %c0_48 = arith.constant 0 : index
    %80 = vector.load %arg8[%c0_47, %c0_48] : memref<1x128xf32, #tpu.memory_space<vmem>>, vector<1x128xf32>
    %c0_49 = arith.constant 0 : index
    %c0_50 = arith.constant 0 : index
    %c0_51 = arith.constant 0 : index
    %81 = vector.load %arg6[%c0_49, %c0_50, %c0_51] : memref<2x64x128xf32, #tpu.memory_space<vmem>>, vector<1x64x128xf32>
    %82 = vector.shape_cast %81 : vector<1x64x128xf32> to vector<64x128xf32>
    %cst_52 = arith.constant dense<0.000000e+00> : vector<128x128xf32>
    %83 = tpu.matmul %76, %82, %cst_52 {dimension_numbers = #tpu.dot_dimension_numbers<[1], [0], [0], [1], [0, 0, 1, 1], [], []>} : vector<128x64xf32>, vector<64x128xf32>, vector<128x128xf32> -> vector<128x128xf32>
    %84 = vector.broadcast %80 : vector<1x128xf32> to vector<128x128xf32>
    %85 = arith.addf %84, %83 : vector<128x128xf32>
    %c1_53 = arith.constant 1 : index
    %c0_54 = arith.constant 0 : index
    %c0_55 = arith.constant 0 : index
    %86 = vector.load %arg6[%c1_53, %c0_54, %c0_55] : memref<2x64x128xf32, #tpu.memory_space<vmem>>, vector<1x64x128xf32>
    %87 = vector.shape_cast %86 : vector<1x64x128xf32> to vector<64x128xf32>
    %cst_56 = arith.constant dense<0.000000e+00> : vector<128x128xf32>
    %88 = tpu.matmul %79, %87, %cst_56 {dimension_numbers = #tpu.dot_dimension_numbers<[1], [0], [0], [1], [0, 0, 1, 1], [], []>} : vector<128x64xf32>, vector<64x128xf32>, vector<128x128xf32> -> vector<128x128xf32>
    %89 = arith.addf %85, %88 : vector<128x128xf32>
    %90 = tpu.iota {dimensions = array<i32: 0>} : vector<64x128xi32>
    %91 = tpu.iota {dimensions = array<i32: 1>} : vector<64x128xi32>
    %cst_57 = arith.constant 0.000000e+00 : f32
    %92 = vector.broadcast %cst_57 : f32 to vector<64x32xf32>
    %cst_58 = arith.constant 0.000000e+00 : f32
    %93 = vector.broadcast %cst_58 : f32 to vector<64x32xf32>
    %c2_i32 = arith.constant 2 : i32
    %94 = vector.broadcast %c2_i32 : i32 to vector<64x128xi32>
    %95 = arith.muli %90, %94 : vector<64x128xi32>
    %c0_i32 = arith.constant 0 : i32
    %96 = vector.broadcast %c0_i32 : i32 to vector<64x128xi32>
    %97 = arith.addi %95, %96 : vector<64x128xi32>
    %98 = arith.cmpi eq, %91, %97 : vector<64x128xi32>
    %99 = arith.extui %98 : vector<64x128xi1> to vector<64x128xi32>
    %100 = arith.sitofp %99 : vector<64x128xi32> to vector<64x128xf32>
    %cst_59 = arith.constant dense<0.000000e+00> : vector<64x128xf32>
    %101 = tpu.matmul %100, %89, %cst_59 {dimension_numbers = #tpu.dot_dimension_numbers<[1], [0], [0], [1], [0, 0, 1, 1], [], []>} : vector<64x128xf32>, vector<128x128xf32>, vector<64x128xf32> -> vector<64x128xf32>
    %c0_60 = arith.constant 0 : index
    %c0_61 = arith.constant 0 : index
    %102 = vector.load %arg7[%c0_60, %c0_61] : memref<32x128xf32, #tpu.memory_space<vmem>>, vector<32x128xf32>
    %cst_62 = arith.constant dense<0.000000e+00> : vector<64x128xf32>
    %103 = tpu.matmul %92, %102, %cst_62 {dimension_numbers = #tpu.dot_dimension_numbers<[1], [0], [0], [1], [0, 0, 1, 1], [], []>} : vector<64x32xf32>, vector<32x128xf32>, vector<64x128xf32> -> vector<64x128xf32>
    %104 = arith.addf %101, %103 : vector<64x128xf32>
    %105 = vector.extract_strided_slice %104 {offsets = [0, 0], sizes = [64, 32], strides = [1, 1]} : vector<64x128xf32> to vector<64x32xf32>
    %106 = arith.negf %105 : vector<64x32xf32>
    %107 = math.exp %106 : vector<64x32xf32>
    %cst_63 = arith.constant 1.000000e+00 : f32
    %108 = vector.broadcast %cst_63 : f32 to vector<64x32xf32>
    %109 = arith.addf %108, %107 : vector<64x32xf32>
    %110 = arith.divf %108, %109 : vector<64x32xf32>
    %111 = vector.extract_strided_slice %104 {offsets = [0, 32], sizes = [64, 32], strides = [1, 1]} : vector<64x128xf32> to vector<64x32xf32>
    %112 = arith.negf %111 : vector<64x32xf32>
    %113 = math.exp %112 : vector<64x32xf32>
    %cst_64 = arith.constant 1.000000e+00 : f32
    %114 = vector.broadcast %cst_64 : f32 to vector<64x32xf32>
    %115 = arith.addf %114, %113 : vector<64x32xf32>
    %116 = arith.divf %114, %115 : vector<64x32xf32>
    %117 = vector.extract_strided_slice %104 {offsets = [0, 64], sizes = [64, 32], strides = [1, 1]} : vector<64x128xf32> to vector<64x32xf32>
    %118 = math.tanh %117 : vector<64x32xf32>
    %119 = vector.extract_strided_slice %104 {offsets = [0, 96], sizes = [64, 32], strides = [1, 1]} : vector<64x128xf32> to vector<64x32xf32>
    %120 = arith.negf %119 : vector<64x32xf32>
    %121 = math.exp %120 : vector<64x32xf32>
    %cst_65 = arith.constant 1.000000e+00 : f32
    %122 = vector.broadcast %cst_65 : f32 to vector<64x32xf32>
    %123 = arith.addf %122, %121 : vector<64x32xf32>
    %124 = arith.divf %122, %123 : vector<64x32xf32>
    %125 = arith.mulf %116, %93 : vector<64x32xf32>
    %126 = arith.mulf %110, %118 : vector<64x32xf32>
    %127 = arith.addf %125, %126 : vector<64x32xf32>
    %128 = math.tanh %127 : vector<64x32xf32>
    %129 = arith.mulf %124, %128 : vector<64x32xf32>
    %c0_66 = arith.constant 0 : index
    %c0_67 = arith.constant 0 : index
    %130 = vector.load %arg9[%c0_66, %c0_67] : memref<32x3xf32, #tpu.memory_space<vmem>>, vector<32x3xf32>
    %cst_68 = arith.constant dense<0.000000e+00> : vector<64x3xf32>
    %131 = tpu.matmul %129, %130, %cst_68 {dimension_numbers = #tpu.dot_dimension_numbers<[1], [0], [0], [1], [0, 0, 1, 1], [], []>} : vector<64x32xf32>, vector<32x3xf32>, vector<64x3xf32> -> vector<64x3xf32>
    %c0_69 = arith.constant 0 : index
    %c0_70 = arith.constant 0 : index
    %132 = vector.load %arg10[%c0_69, %c0_70] : memref<1x3xf32, #tpu.memory_space<vmem>>, vector<1x3xf32>
    %133 = vector.broadcast %132 : vector<1x3xf32> to vector<64x3xf32>
    %134 = arith.addf %131, %133 : vector<64x3xf32>
    %c0_71 = arith.constant 0 : index
    %c0_72 = arith.constant 0 : index
    %135 = vector.load %arg11[%c0_71, %c0_72] : memref<64x3xf32, #tpu.memory_space<vmem>>, vector<64x3xf32>
    tpu.vector_store %arg11[%c0_71, %c0_72], %134 {strides = array<i32>} : memref<64x3xf32, #tpu.memory_space<vmem>>, vector<64x3xf32>,
    return
  }
  func.func @transform_0(%arg0: i32) -> (i32, i32, i32) {
    %c0_i32 = arith.constant 0 : i32
    %c0_i32_0 = arith.constant 0 : i32
    %c0_i32_1 = arith.constant 0 : i32
    return %c0_i32, %arg0, %c0_i32_0 : i32, i32, i32
  }
  func.func @transform_1(%arg0: i32) -> (i32, i32, i32) {
    %c0_i32 = arith.constant 0 : i32
    %c0_i32_0 = arith.constant 0 : i32
    %c0_i32_1 = arith.constant 0 : i32
    %c0_i32_2 = arith.constant 0 : i32
    return %c0_i32, %c0_i32_0, %c0_i32_1 : i32, i32, i32
  }
  func.func @transform_2(%arg0: i32) -> (i32, i32) {
    %c0_i32 = arith.constant 0 : i32
    %c0_i32_0 = arith.constant 0 : i32
    %c0_i32_1 = arith.constant 0 : i32
    return %c0_i32, %c0_i32_0 : i32, i32
  }
  func.func @transform_3(%arg0: i32) -> (i32, i32, i32) {
    %c0_i32 = arith.constant 0 : i32
    %c0_i32_0 = arith.constant 0 : i32
    %c0_i32_1 = arith.constant 0 : i32
    %c0_i32_2 = arith.constant 0 : i32
    return %c0_i32, %c0_i32_0, %c0_i32_1 : i32, i32, i32
  }
  func.func @transform_4(%arg0: i32) -> (i32, i32) {
    %c0_i32 = arith.constant 0 : i32
    %c0_i32_0 = arith.constant 0 : i32
    %c0_i32_1 = arith.constant 0 : i32
    return %c0_i32, %c0_i32_0 : i32, i32
  }
  func.func @transform_5(%arg0: i32) -> (i32, i32, i32) {
    %c0_i32 = arith.constant 0 : i32
    %c0_i32_0 = arith.constant 0 : i32
    %c0_i32_1 = arith.constant 0 : i32
    %c0_i32_2 = arith.constant 0 : i32
    return %c0_i32, %c0_i32_0, %c0_i32_1 : i32, i32, i32
  }
  func.func @transform_6(%arg0: i32) -> (i32, i32) {
    %c0_i32 = arith.constant 0 : i32
    %c0_i32_0 = arith.constant 0 : i32
    %c0_i32_1 = arith.constant 0 : i32
    return %c0_i32, %c0_i32_0 : i32, i32
  }
  func.func @transform_7(%arg0: i32) -> (i32, i32) {
    %c0_i32 = arith.constant 0 : i32
    %c0_i32_0 = arith.constant 0 : i32
    %c0_i32_1 = arith.constant 0 : i32
    return %c0_i32, %c0_i32_0 : i32, i32
  }
  func.func @transform_8(%arg0: i32) -> (i32, i32) {
    %c0_i32 = arith.constant 0 : i32
    %c0_i32_0 = arith.constant 0 : i32
    %c0_i32_1 = arith.constant 0 : i32
    return %c0_i32, %c0_i32_0 : i32, i32
  }
  func.func @transform_9(%arg0: i32) -> (i32, i32) {
    %c0_i32 = arith.constant 0 : i32
    %c0_i32_0 = arith.constant 0 : i32
    %c0_i32_1 = arith.constant 0 : i32
    return %c0_i32, %c0_i32_0 : i32, i32
  }
  func.func @transform_10(%arg0: i32) -> (i32, i32) {
    %c0_i32 = arith.constant 0 : i32
    %c0_i32_0 = arith.constant 0 : i32
    return %arg0, %c0_i32 : i32, i32
  }
}

</mosaic_0001>

<bundles_post_ra>
// kernel: eeg3accel_forward.1
= control target key start
LH: loop header
LB: loop body
LE: loop exit
PB: predicated region body
PF: predicated region fallthrough
CT: control target
= control target key end

     0   :  { %s10867_s13 = smov 0   ;;  %s10869_s14 = smov 0   ;;  %s15339_s0 = inlined_call_operand.vmem [shape: f32[8,256,4], index: 0, kind: input, shape index: {}]   ;;  %s15340_s1 = inlined_call_operand.vmem [shape: f32[3,4,64], index: 1, kind: input, shape index: {}]   ;;  %s15341_s2 = inlined_call_operand.vmem [shape: f32[1,64], index: 2, kind: input, shape index: {}]   ;;  %s15342_s3 = inlined_call_operand.vmem [shape: f32[3,32,128], index: 3, kind: input, shape index: {}]   ;;  %s15343_s4 = inlined_call_operand.vmem [shape: f32[1,128], index: 4, kind: input, shape index: {}]   ;;  %s15344_s5 = inlined_call_operand.vmem [shape: f32[2,64,128], index: 5, kind: input, shape index: {}]   ;;  %s15345_s6 = inlined_call_operand.vmem [shape: f32[32,128], index: 6, kind: input, shape index: {}]   ;;  %s15346_s7 = inlined_call_operand.vmem [shape: f32[1,128], index: 7, kind: input, shape index: {}]   ;;  %s15347_s8 = inlined_call_operand.vmem [shape: f32[32,3], index: 8, kind: input, shape index: {}]   ;;  %s15348_s9 = inlined_call_operand.vmem [shape: f32[1,3], index: 9, kind: input, shape index: {}]   ;;  %s15349_s10 = inlined_call_operand.vmem [shape: f32[128,3], index: 10, kind: output, shape index: {}]  }
   0x1   :  { %s10871_s15 = smov 0  }
   0x2 LB: > { %s7687_s16 = sadd.s32 4294967295, %s10805_s15   ;;  %s10884_s17 = sadd.s32 1, %s10805_s15   ;;  %s10805_s15 = sphi %s10871_s15, %s16387_s15   ;;  %s10801_s14 = sphi %s10869_s14, %s16386_s14   ;;  %s10797_s13 = sphi %s10867_s13, %s16385_s13  }
   0x3   : > { %s24_s18 = ssub.s32 %s10805_s15, %s10884_s17  ;;  %s27_s19 = sadd.s32 1, %s10801_s14 }
   0x4   : > { %p25_p0 = scmp.eq.s32.totalorder %s24_s18, 0  ;;  %p34_p1 = scmp.ne.s32.totalorder %s10801_s14, %s10797_s13 }
   0x5   : > { %p35_p2 = scmp.eq.s32.totalorder %s10805_s15, 0  ;;  %p7690_p4 = scmp.ge.s32.totalorder %s10805_s15, 2 }
   0x6   : > { %s10893_s20 = scalar_select %p25_p0, %s10801_s14, %s27_s19  }
   0x7   : > { %p36_p3 = por %p35_p2, %p34_p1  ;;  %302 = sbr.rel (%p7690_p4) target bundleno = 82 (0x52), region = 52 }
   0xe   : > { %305 = sbr.rel (!%p36_p3) target bundleno = 82 (0x52), region = 56  ;;  %s307_s21 = sand.u32 (%p36_p3), 1, %s10801_s14  }
   0xf   : > { %s8413_s22 = sshll.u32 (%p36_p3), %s10805_s15, 7  ;;  %s7691_s23 = sshll.u32 (%p36_p3), %s307_s21, 10 }
  0x10   : > { %s10901_s26 = scalar_lea.vmem (%p36_p3), %s15339_s0, %s8413_s22  ;;  %s10906_s27 = scalar_lea.vmem (%p36_p3), [#allocation2], %s7691_s23 }
  0x11   : > { %v594_v0 = vld [vmem:[%s10901_s26] sm:$0xff] (%p36_p3)  ;;  %v596_v1 = vld [vmem:[%s10901_s26 + $0x8] sm:$0xff] (%p36_p3)  ;;  %v598_v2 = vld [vmem:[%s10901_s26 + $0x10] sm:$0xff] (%p36_p3) }
  0x12   : > { %595 = vst [vmem:[%s10906_s27] sm:$0xff] (%p36_p3), %v594_v0  ;;  %597 = vst [vmem:[%s10906_s27 + $0x8] sm:$0xff] (%p36_p3), %v596_v1  ;;  %v600_v3 = vld [vmem:[%s10901_s26 + $0x18] sm:$0xff] (%p36_p3)  ;;  %v602_v4 = vld [vmem:[%s10901_s26 + $0x20] sm:$0xff] (%p36_p3) }
  0x13   : > { %599 = vst [vmem:[%s10906_s27 + $0x10] sm:$0xff] (%p36_p3), %v598_v2  ;;  %v604_v5 = vld [vmem:[%s10901_s26 + $0x28] sm:$0xff] (%p36_p3)  ;;  %601 = vst [vmem:[%s10906_s27 + $0x18] sm:$0xff] (%p36_p3), %v600_v3  ;;  %v606_v6 = vld [vmem:[%s10901_s26 + $0x30] sm:$0xff] (%p36_p3) }
  0x14   : > { %603 = vst [vmem:[%s10906_s27 + $0x20] sm:$0xff] (%p36_p3), %v602_v4  ;;  %605 = vst [vmem:[%s10906_s27 + $0x28] sm:$0xff] (%p36_p3), %v604_v5  ;;  %v608_v7 = vld [vmem:[%s10901_s26 + $0x38] sm:$0xff] (%p36_p3)  ;;  %v610_v8 = vld [vmem:[%s10901_s26 + $0x40] sm:$0xff] (%p36_p3) }
  0x15   : > { %607 = vst [vmem:[%s10906_s27 + $0x30] sm:$0xff] %v606_v6  ;;  %609 = vst [vmem:[%s10906_s27 + $0x38] sm:$0xff] %v608_v7  ;;  %v612_v9 = vld [vmem:[%s10901_s26 + $0x48] sm:$0xff]  ;;  %v614_v10 = vld [vmem:[%s10901_s26 + $0x50] sm:$0xff] }
  0x16   : > { %611 = vst [vmem:[%s10906_s27 + $0x40] sm:$0xff] %v610_v8  ;;  %v616_v11 = vld [vmem:[%s10901_s26 + $0x58] sm:$0xff]  ;;  %613 = vst [vmem:[%s10906_s27 + $0x48] sm:$0xff] %v612_v9  ;;  %v618_v12 = vld [vmem:[%s10901_s26 + $0x60] sm:$0xff] }
  0x17   : > { %615 = vst [vmem:[%s10906_s27 + $0x50] sm:$0xff] %v614_v10  ;;  %617 = vst [vmem:[%s10906_s27 + $0x58] sm:$0xff] %v616_v11  ;;  %v620_v13 = vld [vmem:[%s10901_s26 + $0x68] sm:$0xff]  ;;  %v622_v14 = vld [vmem:[%s10901_s26 + $0x70] sm:$0xff] }
  0x18   : > { %619 = vst [vmem:[%s10906_s27 + $0x60] sm:$0xff] %v618_v12  ;;  %621 = vst [vmem:[%s10906_s27 + $0x68] sm:$0xff] %v620_v13  ;;  %v624_v15 = vld [vmem:[%s10901_s26 + $0x78] sm:$0xff]  ;;  %v626_v16 = vld [vmem:[%s10901_s26 + $0x100] sm:$0xff] }
  0x19   : > { %623 = vst [vmem:[%s10906_s27 + $0x70] sm:$0xff] %v622_v14  ;;  %v628_v17 = vld [vmem:[%s10901_s26 + $0x108] sm:$0xff]  ;;  %625 = vst [vmem:[%s10906_s27 + $0x78] sm:$0xff] %v624_v15  ;;  %v630_v18 = vld [vmem:[%s10901_s26 + $0x110] sm:$0xff] }
  0x1a   : > { %627 = vst [vmem:[%s10906_s27 + $0x80] sm:$0xff] %v626_v16  ;;  %629 = vst [vmem:[%s10906_s27 + $0x88] sm:$0xff] %v628_v17  ;;  %v632_v19 = vld [vmem:[%s10901_s26 + $0x118] sm:$0xff]  ;;  %v634_v20 = vld [vmem:[%s10901_s26 + $0x120] sm:$0xff] }
  0x1b   : > { %631 = vst [vmem:[%s10906_s27 + $0x90] sm:$0xff] %v630_v18  ;;  %633 = vst [vmem:[%s10906_s27 + $0x98] sm:$0xff] %v632_v19  ;;  %v636_v21 = vld [vmem:[%s10901_s26 + $0x128] sm:$0xff]  ;;  %v638_v22 = vld [vmem:[%s10901_s26 + $0x130] sm:$0xff] }
  0x1c   : > { %635 = vst [vmem:[%s10906_s27 + $0xa0] sm:$0xff] %v634_v20  ;;  %v640_v23 = vld [vmem:[%s10901_s26 + $0x138] sm:$0xff]  ;;  %637 = vst [vmem:[%s10906_s27 + $0xa8] sm:$0xff] %v636_v21  ;;  %v642_v24 = vld [vmem:[%s10901_s26 + $0x140] sm:$0xff] }
  0x1d   : > { %639 = vst [vmem:[%s10906_s27 + $0xb0] sm:$0xff] %v638_v22  ;;  %641 = vst [vmem:[%s10906_s27 + $0xb8] sm:$0xff] %v640_v23  ;;  %v644_v25 = vld [vmem:[%s10901_s26 + $0x148] sm:$0xff]  ;;  %v646_v26 = vld [vmem:[%s10901_s26 + $0x150] sm:$0xff] }
  0x1e   : > { %643 = vst [vmem:[%s10906_s27 + $0xc0] sm:$0xff] %v642_v24  ;;  %645 = vst [vmem:[%s10906_s27 + $0xc8] sm:$0xff] %v644_v25  ;;  %v648_v27 = vld [vmem:[%s10901_s26 + $0x158] sm:$0xff]  ;;  %v650_v28 = vld [vmem:[%s10901_s26 + $0x160] sm:$0xff] }
  0x1f   : > { %647 = vst [vmem:[%s10906_s27 + $0xd0] sm:$0xff] %v646_v26  ;;  %v652_v29 = vld [vmem:[%s10901_s26 + $0x168] sm:$0xff]  ;;  %649 = vst [vmem:[%s10906_s27 + $0xd8] sm:$0xff] %v648_v27  ;;  %v654_v30 = vld [vmem:[%s10901_s26 + $0x170] sm:$0xff] }
  0x20   : > { %651 = vst [vmem:[%s10906_s27 + $0xe0] sm:$0xff] %v650_v28  ;;  %653 = vst [vmem:[%s10906_s27 + $0xe8] sm:$0xff] %v652_v29  ;;  %v656_v31 = vld [vmem:[%s10901_s26 + $0x178] sm:$0xff]  ;;  %v658_v32 = vld [vmem:[%s10901_s26 + $0x200] sm:$0xff] }
  0x21   : > { %655 = vst [vmem:[%s10906_s27 + $0xf0] sm:$0xff] %v654_v30  ;;  %657 = vst [vmem:[%s10906_s27 + $0xf8] sm:$0xff] %v656_v31  ;;  %v660_v33 = vld [vmem:[%s10901_s26 + $0x208] sm:$0xff]  ;;  %v662_v34 = vld [vmem:[%s10901_s26 + $0x210] sm:$0xff] }
  0x22   : > { %659 = vst [vmem:[%s10906_s27 + $0x100] sm:$0xff] %v658_v32  ;;  %v664_v35 = vld [vmem:[%s10901_s26 + $0x218] sm:$0xff]  ;;  %661 = vst [vmem:[%s10906_s27 + $0x108] sm:$0xff] %v660_v33  ;;  %v666_v36 = vld [vmem:[%s10901_s26 + $0x220] sm:$0xff] }
  0x23   : > { %663 = vst [vmem:[%s10906_s27 + $0x110] sm:$0xff] %v662_v34  ;;  %665 = vst [vmem:[%s10906_s27 + $0x118] sm:$0xff] %v664_v35  ;;  %v668_v37 = vld [vmem:[%s10901_s26 + $0x228] sm:$0xff]  ;;  %v670_v38 = vld [vmem:[%s10901_s26 + $0x230] sm:$0xff] }
  0x24   : > { %667 = vst [vmem:[%s10906_s27 + $0x120] sm:$0xff] %v666_v36  ;;  %669 = vst [vmem:[%s10906_s27 + $0x128] sm:$0xff] %v668_v37  ;;  %v672_v39 = vld [vmem:[%s10901_s26 + $0x238] sm:$0xff]  ;;  %v674_v40 = vld [vmem:[%s10901_s26 + $0x240] sm:$0xff] }
  0x25   : > { %671 = vst [vmem:[%s10906_s27 + $0x130] sm:$0xff] %v670_v38  ;;  %v676_v41 = vld [vmem:[%s10901_s26 + $0x248] sm:$0xff]  ;;  %673 = vst [vmem:[%s10906_s27 + $0x138] sm:$0xff] %v672_v39  ;;  %v678_v42 = vld [vmem:[%s10901_s26 + $0x250] sm:$0xff] }
  0x26   : > { %675 = vst [vmem:[%s10906_s27 + $0x140] sm:$0xff] %v674_v40  ;;  %677 = vst [vmem:[%s10906_s27 + $0x148] sm:$0xff] %v676_v41  ;;  %v680_v43 = vld [vmem:[%s10901_s26 + $0x258] sm:$0xff]  ;;  %v682_v44 = vld [vmem:[%s10901_s26 + $0x260] sm:$0xff] }
  0x27   : > { %679 = vst [vmem:[%s10906_s27 + $0x150] sm:$0xff] %v678_v42  ;;  %681 = vst [vmem:[%s10906_s27 + $0x158] sm:$0xff] %v680_v43  ;;  %v684_v45 = vld [vmem:[%s10901_s26 + $0x268] sm:$0xff]  ;;  %v686_v46 = vld [vmem:[%s10901_s26 + $0x270] sm:$0xff] }
  0x28   : > { %683 = vst [vmem:[%s10906_s27 + $0x160] sm:$0xff] %v682_v44  ;;  %v688_v47 = vld [vmem:[%s10901_s26 + $0x278] sm:$0xff]  ;;  %685 = vst [vmem:[%s10906_s27 + $0x168] sm:$0xff] %v684_v45  ;;  %v690_v48 = vld [vmem:[%s10901_s26 + $0x300] sm:$0xff] }
  0x29   : > { %687 = vst [vmem:[%s10906_s27 + $0x170] sm:$0xff] %v686_v46  ;;  %689 = vst [vmem:[%s10906_s27 + $0x178] sm:$0xff] %v688_v47  ;;  %v692_v49 = vld [vmem:[%s10901_s26 + $0x308] sm:$0xff]  ;;  %v694_v50 = vld [vmem:[%s10901_s26 + $0x310] sm:$0xff] }
  0x2a   : > { %691 = vst [vmem:[%s10906_s27 + $0x180] sm:$0xff] %v690_v48  ;;  %693 = vst [vmem:[%s10906_s27 + $0x188] sm:$0xff] %v692_v49  ;;  %v696_v51 = vld [vmem:[%s10901_s26 + $0x318] sm:$0xff]  ;;  %v698_v52 = vld [vmem:[%s10901_s26 + $0x320] sm:$0xff] }
  0x2b   : > { %695 = vst [vmem:[%s10906_s27 + $0x190] sm:$0xff] %v694_v50  ;;  %v700_v53 = vld [vmem:[%s10901_s26 + $0x328] sm:$0xff]  ;;  %697 = vst [vmem:[%s10906_s27 + $0x198] sm:$0xff] %v696_v51  ;;  %v702_v54 = vld [vmem:[%s10901_s26 + $0x330] sm:$0xff] }
  0x2c   : > { %699 = vst [vmem:[%s10906_s27 + $0x1a0] sm:$0xff] %v698_v52  ;;  %701 = vst [vmem:[%s10906_s27 + $0x1a8] sm:$0xff] %v700_v53  ;;  %v704_v55 = vld [vmem:[%s10901_s26 + $0x338] sm:$0xff]  ;;  %v706_v56 = vld [vmem:[%s10901_s26 + $0x340] sm:$0xff] }
  0x2d   : > { %703 = vst [vmem:[%s10906_s27 + $0x1b0] sm:$0xff] %v702_v54  ;;  %705 = vst [vmem:[%s10906_s27 + $0x1b8] sm:$0xff] %v704_v55  ;;  %v708_v57 = vld [vmem:[%s10901_s26 + $0x348] sm:$0xff]  ;;  %v710_v58 = vld [vmem:[%s10901_s26 + $0x350] sm:$0xff] }
  0x2e   : > { %707 = vst [vmem:[%s10906_s27 + $0x1c0] sm:$0xff] %v706_v56  ;;  %v712_v59 = vld [vmem:[%s10901_s26 + $0x358] sm:$0xff]  ;;  %709 = vst [vmem:[%s10906_s27 + $0x1c8] sm:$0xff] %v708_v57  ;;  %v714_v60 = vld [vmem:[%s10901_s26 + $0x360] sm:$0xff] }
  0x2f   : > { %711 = vst [vmem:[%s10906_s27 + $0x1d0] sm:$0xff] %v710_v58  ;;  %713 = vst [vmem:[%s10906_s27 + $0x1d8] sm:$0xff] %v712_v59  ;;  %v716_v61 = vld [vmem:[%s10901_s26 + $0x368] sm:$0xff]  ;;  %v718_v62 = vld [vmem:[%s10901_s26 + $0x370] sm:$0xff] }
  0x30   : > { %715 = vst [vmem:[%s10906_s27 + $0x1e0] sm:$0xff] %v714_v60  ;;  %717 = vst [vmem:[%s10906_s27 + $0x1e8] sm:$0xff] %v716_v61  ;;  %v720_v63 = vld [vmem:[%s10901_s26 + $0x378] sm:$0xff]  ;;  %v722_v0 = vld [vmem:[%s10901_s26 + $0x400] sm:$0xff] }
  0x31   : > { %719 = vst [vmem:[%s10906_s27 + $0x1f0] sm:$0xff] %v718_v62  ;;  %v724_v1 = vld [vmem:[%s10901_s26 + $0x408] sm:$0xff]  ;;  %721 = vst [vmem:[%s10906_s27 + $0x1f8] sm:$0xff] %v720_v63  ;;  %v726_v2 = vld [vmem:[%s10901_s26 + $0x410] sm:$0xff] }
  0x32   : > { %723 = vst [vmem:[%s10906_s27 + $0x200] sm:$0xff] %v722_v0  ;;  %725 = vst [vmem:[%s10906_s27 + $0x208] sm:$0xff] %v724_v1  ;;  %v728_v3 = vld [vmem:[%s10901_s26 + $0x418] sm:$0xff]  ;;  %v730_v4 = vld [vmem:[%s10901_s26 + $0x420] sm:$0xff] }
  0x33   : > { %727 = vst [vmem:[%s10906_s27 + $0x210] sm:$0xff] %v726_v2  ;;  %729 = vst [vmem:[%s10906_s27 + $0x218] sm:$0xff] %v728_v3  ;;  %v732_v5 = vld [vmem:[%s10901_s26 + $0x428] sm:$0xff]  ;;  %v734_v6 = vld [vmem:[%s10901_s26 + $0x430] sm:$0xff] }
  0x34   : > { %731 = vst [vmem:[%s10906_s27 + $0x220] sm:$0xff] %v730_v4  ;;  %v736_v7 = vld [vmem:[%s10901_s26 + $0x438] sm:$0xff]  ;;  %733 = vst [vmem:[%s10906_s27 + $0x228] sm:$0xff] %v732_v5  ;;  %v738_v8 = vld [vmem:[%s10901_s26 + $0x440] sm:$0xff] }
  0x35   : > { %735 = vst [vmem:[%s10906_s27 + $0x230] sm:$0xff] %v734_v6  ;;  %737 = vst [vmem:[%s10906_s27 + $0x238] sm:$0xff] %v736_v7  ;;  %v740_v9 = vld [vmem:[%s10901_s26 + $0x448] sm:$0xff]  ;;  %v742_v10 = vld [vmem:[%s10901_s26 + $0x450] sm:$0xff] }
  0x36   : > { %739 = vst [vmem:[%s10906_s27 + $0x240] sm:$0xff] %v738_v8  ;;  %741 = vst [vmem:[%s10906_s27 + $0x248] sm:$0xff] %v740_v9  ;;  %v744_v11 = vld [vmem:[%s10901_s26 + $0x458] sm:$0xff]  ;;  %v746_v12 = vld [vmem:[%s10901_s26 + $0x460] sm:$0xff] }
  0x37   : > { %743 = vst [vmem:[%s10906_s27 + $0x250] sm:$0xff] %v742_v10  ;;  %v748_v13 = vld [vmem:[%s10901_s26 + $0x468] sm:$0xff]  ;;  %745 = vst [vmem:[%s10906_s27 + $0x258] sm:$0xff] %v744_v11  ;;  %v750_v14 = vld [vmem:[%s10901_s26 + $0x470] sm:$0xff] }
  0x38   : > { %747 = vst [vmem:[%s10906_s27 + $0x260] sm:$0xff] %v746_v12  ;;  %749 = vst [vmem:[%s10906_s27 + $0x268] sm:$0xff] %v748_v13  ;;  %v752_v15 = vld [vmem:[%s10901_s26 + $0x478] sm:$0xff]  ;;  %v754_v16 = vld [vmem:[%s10901_s26 + $0x500] sm:$0xff] }
  0x39   : > { %751 = vst [vmem:[%s10906_s27 + $0x270] sm:$0xff] %v750_v14  ;;  %753 = vst [vmem:[%s10906_s27 + $0x278] sm:$0xff] %v752_v15  ;;  %v756_v17 = vld [vmem:[%s10901_s26 + $0x508] sm:$0xff]  ;;  %v758_v18 = vld [vmem:[%s10901_s26 + $0x510] sm:$0xff] }
  0x3a   : > { %755 = vst [vmem:[%s10906_s27 + $0x280] sm:$0xff] %v754_v16  ;;  %v760_v19 = vld [vmem:[%s10901_s26 + $0x518] sm:$0xff]  ;;  %757 = vst [vmem:[%s10906_s27 + $0x288] sm:$0xff] %v756_v17  ;;  %v762_v20 = vld [vmem:[%s10901_s26 + $0x520] sm:$0xff] }
  0x3b   : > { %759 = vst [vmem:[%s10906_s27 + $0x290] sm:$0xff] %v758_v18  ;;  %761 = vst [vmem:[%s10906_s27 + $0x298] sm:$0xff] %v760_v19  ;;  %v764_v21 = vld [vmem:[%s10901_s26 + $0x528] sm:$0xff]  ;;  %v766_v22 = vld [vmem:[%s10901_s26 + $0x530] sm:$0xff] }
  0x3c   : > { %763 = vst [vmem:[%s10906_s27 + $0x2a0] sm:$0xff] %v762_v20  ;;  %765 = vst [vmem:[%s10906_s27 + $0x2a8] sm:$0xff] %v764_v21  ;;  %v768_v23 = vld [vmem:[%s10901_s26 + $0x538] sm:$0xff]  ;;  %v770_v24 = vld [vmem:[%s10901_s26 + $0x540] sm:$0xff] }
  0x3d   : > { %767 = vst [vmem:[%s10906_s27 + $0x2b0] sm:$0xff] %v766_v22  ;;  %v772_v25 = vld [vmem:[%s10901_s26 + $0x548] sm:$0xff]  ;;  %769 = vst [vmem:[%s10906_s27 + $0x2b8] sm:$0xff] %v768_v23  ;;  %v774_v26 = vld [vmem:[%s10901_s26 + $0x550] sm:$0xff] }
  0x3e   : > { %771 = vst [vmem:[%s10906_s27 + $0x2c0] sm:$0xff] %v770_v24  ;;  %773 = vst [vmem:[%s10906_s27 + $0x2c8] sm:$0xff] %v772_v25  ;;  %v776_v27 = vld [vmem:[%s10901_s26 + $0x558] sm:$0xff]  ;;  %v778_v28 = vld [vmem:[%s10901_s26 + $0x560] sm:$0xff] }
  0x3f   : > { %775 = vst [vmem:[%s10906_s27 + $0x2d0] sm:$0xff] %v774_v26  ;;  %777 = vst [vmem:[%s10906_s27 + $0x2d8] sm:$0xff] %v776_v27  ;;  %v780_v29 = vld [vmem:[%s10901_s26 + $0x568] sm:$0xff]  ;;  %v782_v30 = vld [vmem:[%s10901_s26 + $0x570] sm:$0xff] }
  0x40   : > { %779 = vst [vmem:[%s10906_s27 + $0x2e0] sm:$0xff] %v778_v28  ;;  %v784_v31 = vld [vmem:[%s10901_s26 + $0x578] sm:$0xff]  ;;  %781 = vst [vmem:[%s10906_s27 + $0x2e8] sm:$0xff] %v780_v29  ;;  %v786_v32 = vld [vmem:[%s10901_s26 + $0x600] sm:$0xff] }
  0x41   : > { %783 = vst [vmem:[%s10906_s27 + $0x2f0] sm:$0xff] %v782_v30  ;;  %785 = vst [vmem:[%s10906_s27 + $0x2f8] sm:$0xff] %v784_v31  ;;  %v788_v33 = vld [vmem:[%s10901_s26 + $0x608] sm:$0xff]  ;;  %v790_v34 = vld [vmem:[%s10901_s26 + $0x610] sm:$0xff] }
  0x42   : > { %787 = vst [vmem:[%s10906_s27 + $0x300] sm:$0xff] %v786_v32  ;;  %789 = vst [vmem:[%s10906_s27 + $0x308] sm:$0xff] %v788_v33  ;;  %v792_v35 = vld [vmem:[%s10901_s26 + $0x618] sm:$0xff]  ;;  %v794_v36 = vld [vmem:[%s10901_s26 + $0x620] sm:$0xff] }
  0x43   : > { %791 = vst [vmem:[%s10906_s27 + $0x310] sm:$0xff] %v790_v34  ;;  %v796_v37 = vld [vmem:[%s10901_s26 + $0x628] sm:$0xff]  ;;  %793 = vst [vmem:[%s10906_s27 + $0x318] sm:$0xff] %v792_v35  ;;  %v798_v38 = vld [vmem:[%s10901_s26 + $0x630] sm:$0xff] }
  0x44   : > { %795 = vst [vmem:[%s10906_s27 + $0x320] sm:$0xff] %v794_v36  ;;  %797 = vst [vmem:[%s10906_s27 + $0x328] sm:$0xff] %v796_v37  ;;  %v800_v39 = vld [vmem:[%s10901_s26 + $0x638] sm:$0xff]  ;;  %v802_v40 = vld [vmem:[%s10901_s26 + $0x640] sm:$0xff] }
  0x45   : > { %799 = vst [vmem:[%s10906_s27 + $0x330] sm:$0xff] %v798_v38  ;;  %801 = vst [vmem:[%s10906_s27 + $0x338] sm:$0xff] %v800_v39  ;;  %v804_v41 = vld [vmem:[%s10901_s26 + $0x648] sm:$0xff]  ;;  %v806_v42 = vld [vmem:[%s10901_s26 + $0x650] sm:$0xff] }
  0x46   : > { %803 = vst [vmem:[%s10906_s27 + $0x340] sm:$0xff] %v802_v40  ;;  %v808_v43 = vld [vmem:[%s10901_s26 + $0x658] sm:$0xff]  ;;  %805 = vst [vmem:[%s10906_s27 + $0x348] sm:$0xff] %v804_v41  ;;  %v810_v44 = vld [vmem:[%s10901_s26 + $0x660] sm:$0xff] }
  0x47   : > { %807 = vst [vmem:[%s10906_s27 + $0x350] sm:$0xff] %v806_v42  ;;  %809 = vst [vmem:[%s10906_s27 + $0x358] sm:$0xff] %v808_v43  ;;  %v812_v45 = vld [vmem:[%s10901_s26 + $0x668] sm:$0xff]  ;;  %v814_v46 = vld [vmem:[%s10901_s26 + $0x670] sm:$0xff] }
  0x48   : > { %811 = vst [vmem:[%s10906_s27 + $0x360] sm:$0xff] %v810_v44  ;;  %813 = vst [vmem:[%s10906_s27 + $0x368] sm:$0xff] %v812_v45  ;;  %v816_v47 = vld [vmem:[%s10901_s26 + $0x678] sm:$0xff]  ;;  %v818_v48 = vld [vmem:[%s10901_s26 + $0x700] sm:$0xff] }
  0x49   : > { %815 = vst [vmem:[%s10906_s27 + $0x370] sm:$0xff] %v814_v46  ;;  %v820_v49 = vld [vmem:[%s10901_s26 + $0x708] sm:$0xff]  ;;  %817 = vst [vmem:[%s10906_s27 + $0x378] sm:$0xff] %v816_v47  ;;  %v822_v50 = vld [vmem:[%s10901_s26 + $0x710] sm:$0xff] }
  0x4a   : > { %819 = vst [vmem:[%s10906_s27 + $0x380] sm:$0xff] %v818_v48  ;;  %821 = vst [vmem:[%s10906_s27 + $0x388] sm:$0xff] %v820_v49  ;;  %v824_v51 = vld [vmem:[%s10901_s26 + $0x718] sm:$0xff]  ;;  %v826_v52 = vld [vmem:[%s10901_s26 + $0x720] sm:$0xff] }
  0x4b   : > { %823 = vst [vmem:[%s10906_s27 + $0x390] sm:$0xff] %v822_v50  ;;  %825 = vst [vmem:[%s10906_s27 + $0x398] sm:$0xff] %v824_v51  ;;  %v828_v53 = vld [vmem:[%s10901_s26 + $0x728] sm:$0xff]  ;;  %v830_v54 = vld [vmem:[%s10901_s26 + $0x730] sm:$0xff] }
  0x4c   : > { %827 = vst [vmem:[%s10906_s27 + $0x3a0] sm:$0xff] %v826_v52  ;;  %v832_v55 = vld [vmem:[%s10901_s26 + $0x738] sm:$0xff]  ;;  %829 = vst [vmem:[%s10906_s27 + $0x3a8] sm:$0xff] %v828_v53  ;;  %v834_v56 = vld [vmem:[%s10901_s26 + $0x740] sm:$0xff] }
  0x4d   : > { %831 = vst [vmem:[%s10906_s27 + $0x3b0] sm:$0xff] %v830_v54  ;;  %833 = vst [vmem:[%s10906_s27 + $0x3b8] sm:$0xff] %v832_v55  ;;  %v836_v57 = vld [vmem:[%s10901_s26 + $0x748] sm:$0xff]  ;;  %v838_v58 = vld [vmem:[%s10901_s26 + $0x750] sm:$0xff] }
  0x4e   : > { %835 = vst [vmem:[%s10906_s27 + $0x3c0] sm:$0xff] %v834_v56  ;;  %837 = vst [vmem:[%s10906_s27 + $0x3c8] sm:$0xff] %v836_v57  ;;  %v840_v59 = vld [vmem:[%s10901_s26 + $0x758] sm:$0xff]  ;;  %v842_v60 = vld [vmem:[%s10901_s26 + $0x760] sm:$0xff] }
  0x4f   : > { %839 = vst [vmem:[%s10906_s27 + $0x3d0] sm:$0xff] %v838_v58  ;;  %v844_v61 = vld [vmem:[%s10901_s26 + $0x768] sm:$0xff]  ;;  %841 = vst [vmem:[%s10906_s27 + $0x3d8] sm:$0xff] %v840_v59  ;;  %v846_v62 = vld [vmem:[%s10901_s26 + $0x770] sm:$0xff] }
  0x50   : > { %843 = vst [vmem:[%s10906_s27 + $0x3e0] sm:$0xff] %v842_v60  ;;  %845 = vst [vmem:[%s10906_s27 + $0x3e8] sm:$0xff] %v844_v61  ;;  %v848_v63 = vld [vmem:[%s10901_s26 + $0x778] sm:$0xff] }
  0x51   : > { %847 = vst [vmem:[%s10906_s27 + $0x3f0] sm:$0xff] %v846_v62  ;;  %849 = vst [vmem:[%s10906_s27 + $0x3f8] sm:$0xff] %v848_v63 }
  0x52 PF: > { %p7694_p5 = scmp.ge.s32.totalorder %s10805_s15, 1  ;;  %p854_p6 = scmp.lt.s32.totalorder %s10805_s15, 3 }
  0x54   : > { %p855_p7 = pnand %p7694_p5, %p854_p6 }
  0x56   : > { %858 = sbr.rel (%p855_p7) target bundleno = 2880 (0xb40), region = 94 }
  0x5d   : > { %v7810_v0 = vld [vmem:[%s15340_s1 + $0x4] sm:$0xf]  ;;  %vm1428_vm0 = vcmask 1043456   ;;  %s861_s30 = sand.u32 1, %s10797_s13   ;;  %vm1043_vm1 = vcmask 31744   ;;  %s10808_s24 = smov 96  }
  0x5e   : > { %9101 = vmatprep.subr.msk.mxu0 %vm1428_vm0, %v7810_v0  ;;  %s7695_s11 = sshll.u32 %s861_s30, 10  ;;  %v1040_v1 = vld [vmem:[%s15340_s1] sm:$0xf]  ;;  %10263 = vmatprep.subr.msk.mxu1 %vm1428_vm0, %v7810_v0  ;;  %v11191_v5 = vld [vmem:[%s15340_s1 + $0x8] sm:$0xf]  ;;  %vm4662_vm2 = vcmask 261120  }
  0x5f   : > { %9102 = vmatpush3.msk.msra.mxu0 %vm1428_vm0, %v7810_v0  ;;  %10264 = vmatpush3.msk.msra.mxu1 %vm1428_vm0, %v7810_v0  ;;  %s11174_s19 = scalar_lea.vmem [#allocation2], %s7695_s11  ;;  %s10809_s12 = smov 64   ;;  %vm6577_vm3 = vcmask 523264   ;;  %vm7616_vm12 = vcmask 23552  }
  0x60   : > { %v11177_v2 = vld [vmem:[%s11174_s19] sm:$0xff]  ;;  %9295 = vmatprep.subr.msk.mxu0 %vm1428_vm0, %v1040_v1  ;;  %v11181_v3 = vld [vmem:[%s11174_s19 + $0x8] sm:$0xff]  ;;  %v11184_v4 = vld [vmem:[%s11174_s19 + $0x10] sm:$0xff]  ;;  %s10811_s23 = smov 32  }
  0x61   : > { %9103 = vmatprep.mubr.msk.f32.mxu0 %vm1043_vm1, %v11177_v2  ;;  %v11199_v6 = vld [vmem:[%s11174_s19 + $0x18] sm:$0xff]  ;;  %v11202_v7 = vld [vmem:[%s11174_s19 + $0x20] sm:$0xff]  ;;  %v11211_v8 = vld [vmem:[%s11174_s19 + $0x28] sm:$0xff] }
  0x62   : > { %9104 = vmatmul.mubr.msk.f32.vlgmr.msra.gmra.mrb[0].mxu0 %vm1043_vm1, %v11181_v3  ;;  %v11214_v9 = vld [vmem:[%s11174_s19 + $0x30] sm:$0xff]  ;;  %v11221_v10 = vld [vmem:[%s11174_s19 + $0x38] sm:$0xff]  ;;  %v11224_v11 = vld [vmem:[%s11174_s19 + $0x40] sm:$0xff] }
  0x63   : > { %9296 = vmatpush3.msk.msra.mxu0 %vm1428_vm0, %v1040_v1  ;;  %9106 = vmatprep.mubr.msk.f32.mxu0 %vm1043_vm1, %v11184_v4  ;;  %v11231_v12 = vld [vmem:[%s11174_s19 + $0x48] sm:$0xff]  ;;  %v11234_v13 = vld [vmem:[%s11174_s19 + $0x50] sm:$0xff]  ;;  %v11241_v14 = vld [vmem:[%s11174_s19 + $0x58] sm:$0xff] }
  0x64   : > { %9489 = vmatprep.subr.msk.mxu0 %vm1428_vm0, %v11191_v5  ;;  %v11244_v15 = vld [vmem:[%s11174_s19 + $0x60] sm:$0xff]  ;;  %v11251_v16 = vld [vmem:[%s11174_s19 + $0x68] sm:$0xff]  ;;  %v11254_v17 = vld [vmem:[%s11174_s19 + $0x70] sm:$0xff] }
  0x65   : > { %v11261_v18 = vld [vmem:[%s11174_s19 + $0x78] sm:$0xff]  ;;  %v11264_v19 = vld [vmem:[%s11174_s19 + $0x80] sm:$0xff]  ;;  %v11271_v20 = vld [vmem:[%s11174_s19 + $0x88] sm:$0xff] }
  0x66   : > { %9107 = vmatmul.mubr.msk.f32.gmra.mrb[2].mxu0 %vm1043_vm1, %v11199_v6  ;;  %15734 = vst [vmem:[#allocation3_spill] sm:$0xff] %v11264_v19  ;;  %15735 = vst [vmem:[#allocation4_spill] sm:$0xff] %v11271_v20  ;;  %v11274_v21 = vld [vmem:[%s11174_s19 + $0x90] sm:$0xff]  ;;  %v11281_v22 = vld [vmem:[%s11174_s19 + $0x98] sm:$0xff] }
  0x67   : > { %9109 = vmatprep.mubr.msk.f32.mxu0 %vm1043_vm1, %v11202_v7  ;;  %15736 = vst [vmem:[#allocation5_spill] sm:$0xff] %v11274_v21  ;;  %15737 = vst [vmem:[#allocation6_spill] sm:$0xff] %v11281_v22  ;;  %v11284_v23 = vld [vmem:[%s11174_s19 + $0xa0] sm:$0xff]  ;;  %v11291_v24 = vld [vmem:[%s11174_s19 + $0xa8] sm:$0xff] }
  0x68   : > { %15738 = vst [vmem:[#allocation7_spill] sm:$0xff] %v11284_v23  ;;  %15739 = vst [vmem:[#allocation8_spill] sm:$0xff] %v11291_v24  ;;  %v11294_v25 = vld [vmem:[%s11174_s19 + $0xb0] sm:$0xff]  ;;  %v11301_v26 = vld [vmem:[%s11174_s19 + $0xb8] sm:$0xff] }
  0x69   : > { %15740 = vst [vmem:[#allocation9_spill] sm:$0xff] %v11294_v25  ;;  %15741 = vst [vmem:[#allocation10_spill] sm:$0xff] %v11301_v26  ;;  %v11304_v27 = vld [vmem:[%s11174_s19 + $0xc0] sm:$0xff]  ;;  %v11311_v28 = vld [vmem:[%s11174_s19 + $0xc8] sm:$0xff] }
  0x6a   : > { %9110 = vmatmul.mubr.msk.f32.gmra.mrb[4].mxu0 %vm1043_vm1, %v11211_v8  ;;  %15742 = vst [vmem:[#allocation11_spill] sm:$0xff] %v11304_v27  ;;  %15743 = vst [vmem:[#allocation12_spill] sm:$0xff] %v11311_v28  ;;  %v11314_v29 = vld [vmem:[%s11174_s19 + $0xd0] sm:$0xff]  ;;  %v11321_v30 = vld [vmem:[%s11174_s19 + $0xd8] sm:$0xff] }
  0x6b   : > { %9112 = vmatprep.mubr.msk.f32.mxu0 %vm1043_vm1, %v11214_v9  ;;  %15744 = vst [vmem:[#allocation13_spill] sm:$0xff] %v11314_v29  ;;  %15745 = vst [vmem:[#allocation14_spill] sm:$0xff] %v11321_v30  ;;  %v11324_v31 = vld [vmem:[%s11174_s19 + $0xe0] sm:$0xff]  ;;  %v11331_v32 = vld [vmem:[%s11174_s19 + $0xe8] sm:$0xff] }
  0x6c   : > { %15746 = vst [vmem:[#allocation15_spill] sm:$0xff] %v11324_v31  ;;  %15747 = vst [vmem:[#allocation16_spill] sm:$0xff] %v11331_v32  ;;  %v11334_v33 = vld [vmem:[%s11174_s19 + $0xf0] sm:$0xff]  ;;  %v11341_v34 = vld [vmem:[%s11174_s19 + $0xf8] sm:$0xff] }
  0x6d   : > { %15748 = vst [vmem:[#allocation17_spill] sm:$0xff] %v11334_v33  ;;  %15749 = vst [vmem:[#allocation18_spill] sm:$0xff] %v11341_v34  ;;  %v11344_v35 = vld [vmem:[%s11174_s19 + $0x100] sm:$0xff]  ;;  %v11351_v36 = vld [vmem:[%s11174_s19 + $0x108] sm:$0xff] }
  0x6e   : > { %9113 = vmatmul.mubr.msk.f32.gmra.mrb[6].mxu0 %vm1043_vm1, %v11221_v10  ;;  %15750 = vst [vmem:[#allocation19_spill] sm:$0xff] %v11344_v35  ;;  %15751 = vst [vmem:[#allocation20_spill] sm:$0xff] %v11351_v36  ;;  %v11354_v37 = vld [vmem:[%s11174_s19 + $0x110] sm:$0xff]  ;;  %v11361_v38 = vld [vmem:[%s11174_s19 + $0x118] sm:$0xff] }
  0x6f   : > { %9115 = vmatprep.mubr.msk.f32.mxu0 %vm1043_vm1, %v11224_v11  ;;  %15752 = vst [vmem:[#allocation21_spill] sm:$0xff] %v11354_v37  ;;  %15753 = vst [vmem:[#allocation22_spill] sm:$0xff] %v11361_v38  ;;  %v11364_v39 = vld [vmem:[%s11174_s19 + $0x120] sm:$0xff]  ;;  %v11371_v40 = vld [vmem:[%s11174_s19 + $0x128] sm:$0xff] }
  0x70   : > { %15754 = vst [vmem:[#allocation23_spill] sm:$0xff] %v11364_v39  ;;  %15755 = vst [vmem:[#allocation24_spill] sm:$0xff] %v11371_v40  ;;  %v11374_v41 = vld [vmem:[%s11174_s19 + $0x130] sm:$0xff]  ;;  %v11381_v42 = vld [vmem:[%s11174_s19 + $0x138] sm:$0xff] }
  0x71   : > { %15756 = vst [vmem:[#allocation25_spill] sm:$0xff] %v11374_v41  ;;  %15757 = vst [vmem:[#allocation26_spill] sm:$0xff] %v11381_v42  ;;  %v11384_v43 = vld [vmem:[%s11174_s19 + $0x140] sm:$0xff]  ;;  %v11391_v44 = vld [vmem:[%s11174_s19 + $0x148] sm:$0xff] }
  0x72   : > { %9116 = vmatmul.mubr.msk.f32.gmra.mrb[8].mxu0 %vm1043_vm1, %v11231_v12  ;;  %15758 = vst [vmem:[#allocation27_spill] sm:$0xff] %v11384_v43  ;;  %15759 = vst [vmem:[#allocation28_spill] sm:$0xff] %v11391_v44  ;;  %v11394_v45 = vld [vmem:[%s11174_s19 + $0x150] sm:$0xff]  ;;  %v11401_v46 = vld [vmem:[%s11174_s19 + $0x158] sm:$0xff] }
  0x73   : > { %9118 = vmatprep.mubr.msk.f32.mxu0 %vm1043_vm1, %v11234_v13  ;;  %15760 = vst [vmem:[#allocation29_spill] sm:$0xff] %v11394_v45  ;;  %15761 = vst [vmem:[#allocation30_spill] sm:$0xff] %v11401_v46  ;;  %v11404_v47 = vld [vmem:[%s11174_s19 + $0x160] sm:$0xff]  ;;  %v11411_v48 = vld [vmem:[%s11174_s19 + $0x168] sm:$0xff] }
  0x74   : > { %v11414_v49 = vld [vmem:[%s11174_s19 + $0x170] sm:$0xff]  ;;  %v11421_v50 = vld [vmem:[%s11174_s19 + $0x178] sm:$0xff]  ;;  %v11424_v51 = vld [vmem:[%s11174_s19 + $0x180] sm:$0xff] }
  0x75   : > { %v11431_v52 = vld [vmem:[%s11174_s19 + $0x188] sm:$0xff]  ;;  %v11434_v53 = vld [vmem:[%s11174_s19 + $0x190] sm:$0xff]  ;;  %v11441_v54 = vld [vmem:[%s11174_s19 + $0x198] sm:$0xff] }
  0x76   : > { %9119 = vmatmul.mubr.msk.f32.gmra.mrb[10].mxu0 %vm1043_vm1, %v11241_v14  ;;  %15762 = vst [vmem:[#allocation31_spill] sm:$0xff] %v11431_v52  ;;  %15763 = vst [vmem:[#allocation32_spill] sm:$0xff] %v11434_v53  ;;  %v11444_v55 = vld [vmem:[%s11174_s19 + $0x1a0] sm:$0xff]  ;;  %v11451_v56 = vld [vmem:[%s11174_s19 + $0x1a8] sm:$0xff] }
  0x77   : > { %9121 = vmatprep.mubr.msk.f32.mxu0 %vm1043_vm1, %v11244_v15  ;;  %v11454_v57 = vld [vmem:[%s11174_s19 + $0x1b0] sm:$0xff]  ;;  %v11461_v58 = vld [vmem:[%s11174_s19 + $0x1b8] sm:$0xff]  ;;  %v11464_v59 = vld [vmem:[%s11174_s19 + $0x1c0] sm:$0xff] }
  0x78   : > { %15764 = vst [vmem:[#allocation33_spill] sm:$0xff] %v11454_v57  ;;  %15765 = vst [vmem:[#allocation34_spill] sm:$0xff] %v11461_v58  ;;  %v11471_v60 = vld [vmem:[%s11174_s19 + $0x1c8] sm:$0xff]  ;;  %v11474_v61 = vld [vmem:[%s11174_s19 + $0x1d0] sm:$0xff] }
  0x79   : > { %15766 = vst [vmem:[#allocation35_spill] sm:$0xff] %v11471_v60  ;;  %15767 = vst [vmem:[#allocation36_spill] sm:$0xff] %v11474_v61  ;;  %v11481_v62 = vld [vmem:[%s11174_s19 + $0x1d8] sm:$0xff]  ;;  %v11484_v63 = vld [vmem:[%s11174_s19 + $0x1e0] sm:$0xff] }
  0x7a   : > { %9122 = vmatmul.mubr.msk.f32.gmra.mrb[12].mxu0 %vm1043_vm1, %v11251_v16  ;;  %v11491_v0 = vld [vmem:[%s11174_s19 + $0x1e8] sm:$0xff]  ;;  %v11494_v1 = vld [vmem:[%s11174_s19 + $0x1f0] sm:$0xff] }
  0x7b   : > { %9124 = vmatprep.mubr.msk.f32.mxu0 %vm1043_vm1, %v11254_v17  ;;  %15768 = vst [vmem:[#allocation37_spill] sm:$0xff] %v11494_v1 }
  0x7e   : > { %9125 = vmatmul.mubr.msk.f32.gmra.mrb[14].mxu0 %vm1043_vm1, %v11261_v18 }
  0x7f   : > { %9127 = vmatprep.mubr.msk.f32.mxu0 %vm1043_vm1, %v11264_v19 }
  0x82   : > { %9128 = vmatmul.mubr.msk.f32.gmra.mrb[16].mxu0 %vm1043_vm1, %v11271_v20 }
  0x83   : > { %9130 = vmatprep.mubr.msk.f32.mxu0 %vm1043_vm1, %v11274_v21 }
  0x86   : > { %9131 = vmatmul.mubr.msk.f32.gmra.mrb[18].mxu0 %vm1043_vm1, %v11281_v22 }
  0x87   : > { %9133 = vmatprep.mubr.msk.f32.mxu0 %vm1043_vm1, %v11284_v23 }
  0x8a   : > { %9134 = vmatmul.mubr.msk.f32.gmra.mrb[20].mxu0 %vm1043_vm1, %v11291_v24 }
  0x8b   : > { %9136 = vmatprep.mubr.msk.f32.mxu0 %vm1043_vm1, %v11294_v25 }
  0x8e   : > { %9137 = vmatmul.mubr.msk.f32.gmra.mrb[22].mxu0 %vm1043_vm1, %v11301_v26 }
  0x8f   : > { %9139 = vmatprep.mubr.msk.f32.mxu0 %vm1043_vm1, %v11304_v27 }
  0x92   : > { %9140 = vmatmul.mubr.msk.f32.gmra.mrb[24].mxu0 %vm1043_vm1, %v11311_v28 }
  0x93   : > { %9142 = vmatprep.mubr.msk.f32.mxu0 %vm1043_vm1, %v11314_v29 }
  0x96   : > { %9143 = vmatmul.mubr.msk.f32.gmra.mrb[26].mxu0 %vm1043_vm1, %v11321_v30 }
  0x97   : > { %9145 = vmatprep.mubr.msk.f32.mxu0 %vm1043_vm1, %v11324_v31 }
  0x9a   : > { %9146 = vmatmul.mubr.msk.f32.gmra.mrb[28].mxu0 %vm1043_vm1, %v11331_v32 }
  0x9b   : > { %9148 = vmatprep.mubr.msk.f32.mxu0 %vm1043_vm1, %v11334_v33 }
  0x9e   : > { %9149 = vmatmul.mubr.msk.f32.gmra.mrb[30].mxu0 %vm1043_vm1, %v11341_v34 }
  0x9f   : > { %9151 = vmatprep.mubr.msk.f32.mxu0 %vm1043_vm1, %v11344_v35 }
  0xa2   : > { %9152 = vmatmul.mubr.msk.f32.gmra.mrb[32].mxu0 %vm1043_vm1, %v11351_v36 }
  0xa3   : > { %9154 = vmatprep.mubr.msk.f32.mxu0 %vm1043_vm1, %v11354_v37 }
  0xa6   : > { %9155 = vmatmul.mubr.msk.f32.gmra.mrb[34].mxu0 %vm1043_vm1, %v11361_v38 }
  0xa7   : > { %9157 = vmatprep.mubr.msk.f32.mxu0 %vm1043_vm1, %v11364_v39 }
  0xaa   : > { %9158 = vmatmul.mubr.msk.f32.gmra.mrb[36].mxu0 %vm1043_vm1, %v11371_v40 }
  0xab   : > { %9160 = vmatprep.mubr.msk.f32.mxu0 %vm1043_vm1, %v11374_v41 }
  0xae   : > { %9161 = vmatmul.mubr.msk.f32.gmra.mrb[38].mxu0 %vm1043_vm1, %v11381_v42 }
  0xaf   : > { %9163 = vmatprep.mubr.msk.f32.mxu0 %vm1043_vm1, %v11384_v43 }
  0xb2   : > { %9164 = vmatmul.mubr.msk.f32.gmra.mrb[40].mxu0 %vm1043_vm1, %v11391_v44 }
  0xb3   : > { %9166 = vmatprep.mubr.msk.f32.mxu0 %vm1043_vm1, %v11394_v45 }
  0xb6   : > { %9167 = vmatmul.mubr.msk.f32.gmra.mrb[42].mxu0 %vm1043_vm1, %v11401_v46 }
  0xb7   : > { %9169 = vmatprep.mubr.msk.f32.mxu0 %vm1043_vm1, %v11404_v47 }
  0xba   : > { %9170 = vmatmul.mubr.msk.f32.gmra.mrb[44].mxu0 %vm1043_vm1, %v11411_v48 }
  0xbb   : > { %9172 = vmatprep.mubr.msk.f32.mxu0 %vm1043_vm1, %v11414_v49 }
  0xbe   : > { %9173 = vmatmul.mubr.msk.f32.gmra.mrb[46].mxu0 %vm1043_vm1, %v11421_v50 }
  0xbf   : > { %9175 = vmatprep.mubr.msk.f32.mxu0 %vm1043_vm1, %v11424_v51 }
  0xc2   : > { %9176 = vmatmul.mubr.msk.f32.gmra.mrb[48].mxu0 %vm1043_vm1, %v11431_v52 }
  0xc3   : > { %9178 = vmatprep.mubr.msk.f32.mxu0 %vm1043_vm1, %v11434_v53 }
  0xc6   : > { %9179 = vmatmul.mubr.msk.f32.gmra.mrb[50].mxu0 %vm1043_vm1, %v11441_v54 }
  0xc7   : > { %9181 = vmatprep.mubr.msk.f32.mxu0 %vm1043_vm1, %v11444_v55 }
  0xca   : > { %9182 = vmatmul.mubr.msk.f32.gmra.mrb[52].mxu0 %vm1043_vm1, %v11451_v56 }
  0xcb   : > { %9184 = vmatprep.mubr.msk.f32.mxu0 %vm1043_vm1, %v11454_v57 }
  0xce   : > { %9185 = vmatmul.mubr.msk.f32.gmra.mrb[54].mxu0 %vm1043_vm1, %v11461_v58 }
  0xcf   : > { %9187 = vmatprep.mubr.msk.f32.mxu0 %vm1043_vm1, %v11464_v59 }
  0xd2   : > { %9188 = vmatmul.mubr.msk.f32.gmra.mrb[56].mxu0 %vm1043_vm1, %v11471_v60  ;;  %v15358_v60 = vmov 0.0  }
  0xd3   : > { %9190 = vmatprep.mubr.msk.f32.mxu0 %vm1043_vm1, %v11474_v61  ;;  %v11501_v61 = vld [vmem:[%s11174_s19 + $0x1f8] sm:$0xff] }
  0xd4   : > { %15769 = vst [vmem:[#allocation38_spill] sm:$0xff] %v11501_v61 }
  0xd6   : > { %9191 = vmatmul.mubr.msk.f32.gmra.mrb[58].mxu0 %vm1043_vm1, %v11481_v62 }
  0xd7   : > { %9193 = vmatprep.mubr.msk.f32.mxu0 %vm1043_vm1, %v11484_v63 }
  0xda   : > { %9194 = vmatmul.mubr.msk.f32.gmra.mrb[60].mxu0 %vm1043_vm1, %v11491_v0 }
  0xdb   : > { %9196 = vmatprep.mubr.msk.f32.mxu0 %vm1043_vm1, %v11494_v1  ;;  %v11538_v1 = vld [vmem:[%s11174_s19 + $0x210] sm:$0xff] }
  0xde   : > { %9197 = vmatmul.mubr.msk.f32.gmra.mrb[62].mxu0 %vm1043_vm1, %v11501_v61  ;;  %v11529_v61 = vld [vmem:[%s11174_s19 + $0x208] sm:$0xff] }
  0xdf   : > { %9297 = vmatprep.mubr.f32.mxu0 %v15358_v60 }
  0xe2   : > { %9298 = vmatmul.mubr.f32.vlgmr.msra.gmra.mrb[0].mxu0 %v15358_v60 }
  0xe3   : > { %9490 = vmatpush3.msk.msra.mxu0 %vm1428_vm0, %v11191_v5  ;;  %9300 = vmatprep.mubr.f32.mxu0 %v15358_v60  ;;  %v11524_v5 = vld [vmem:[%s11174_s19 + $0x200] sm:$0xff] }
  0xe4   : > { %9199 = vmatprep.mubr.msk.f32.mxu1 %vm1043_vm1, %v11524_v5 }
  0xe5   : > { %9200 = vmatmul.mubr.msk.f32.vlgmr.msra.gmra.mrb[0].mxu1 %vm1043_vm1, %v11529_v61 }
  0xe6   : > { %9301 = vmatmul.mubr.f32.gmra.mrb[2].mxu0 %v15358_v60  ;;  %9202 = vmatprep.mubr.msk.f32.mxu1 %vm1043_vm1, %v11538_v1 }
  0xe7   : > { %9303 = vmatprep.mubr.f32.mxu0 %v15358_v60 }
  0xea   : > { %9304 = vmatmul.mubr.f32.gmra.mrb[4].mxu0 %v15358_v60 }
  0xeb   : > { %9306 = vmatprep.mubr.f32.mxu0 %v15358_v60 }
  0xee   : > { %9307 = vmatmul.mubr.f32.gmra.mrb[6].mxu0 %v15358_v60 }
  0xef   : > { %9309 = vmatprep.mubr.f32.mxu0 %v15358_v60 }
  0xf2   : > { %9310 = vmatmul.mubr.f32.gmra.mrb[8].mxu0 %v15358_v60 }
  0xf3   : > { %9312 = vmatprep.mubr.f32.mxu0 %v15358_v60 }
  0xf6   : > { %9313 = vmatmul.mubr.f32.gmra.mrb[10].mxu0 %v15358_v60 }
  0xf7   : > { %9315 = vmatprep.mubr.f32.mxu0 %v15358_v60 }
  0xfa   : > { %9316 = vmatmul.mubr.f32.gmra.mrb[12].mxu0 %v15358_v60 }
  0xfb   : > { %9318 = vmatprep.mubr.f32.mxu0 %v15358_v60 }
  0xfe   : > { %9319 = vmatmul.mubr.f32.gmra.mrb[14].mxu0 %v15358_v60  ;;  %v11543_v60 = vld [vmem:[%s11174_s19 + $0x218] sm:$0xff] }
  0xff   : > { %9321 = vmatprep.mubr.msk.f32.mxu0 %vm1043_vm1, %v11177_v2  ;;  %9203 = vmatmul.mubr.msk.f32.gmra.mrb[2].mxu1 %vm1043_vm1, %v11543_v60  ;;  %v11552_v2 = vld [vmem:[%s11174_s19 + $0x220] sm:$0xff] }
 0x100   : > { %9205 = vmatprep.mubr.msk.f32.mxu1 %vm1043_vm1, %v11552_v2 }
 0x102   : > { %9322 = vmatmul.mubr.msk.f32.gmra.mrb[16].mxu0 %vm1043_vm1, %v11181_v3  ;;  %v11557_v3 = vld [vmem:[%s11174_s19 + $0x228] sm:$0xff] }
 0x103   : > { %9324 = vmatprep.mubr.msk.f32.mxu0 %vm1043_vm1, %v11184_v4  ;;  %9206 = vmatmul.mubr.msk.f32.gmra.mrb[4].mxu1 %vm1043_vm1, %v11557_v3  ;;  %v11566_v4 = vld [vmem:[%s11174_s19 + $0x230] sm:$0xff] }
 0x104   : > { %9208 = vmatprep.mubr.msk.f32.mxu1 %vm1043_vm1, %v11566_v4 }
 0x106   : > { %9325 = vmatmul.mubr.msk.f32.gmra.mrb[18].mxu0 %vm1043_vm1, %v11199_v6  ;;  %v11571_v6 = vld [vmem:[%s11174_s19 + $0x238] sm:$0xff] }
 0x107   : > { %9327 = vmatprep.mubr.msk.f32.mxu0 %vm1043_vm1, %v11202_v7  ;;  %9209 = vmatmul.mubr.msk.f32.gmra.mrb[6].mxu1 %vm1043_vm1, %v11571_v6  ;;  %v11580_v7 = vld [vmem:[%s11174_s19 + $0x240] sm:$0xff] }
 0x108   : > { %9211 = vmatprep.mubr.msk.f32.mxu1 %vm1043_vm1, %v11580_v7 }
 0x10a   : > { %9328 = vmatmul.mubr.msk.f32.gmra.mrb[20].mxu0 %vm1043_vm1, %v11211_v8  ;;  %v11585_v8 = vld [vmem:[%s11174_s19 + $0x248] sm:$0xff] }
 0x10b   : > { %9330 = vmatprep.mubr.msk.f32.mxu0 %vm1043_vm1, %v11214_v9  ;;  %9212 = vmatmul.mubr.msk.f32.gmra.mrb[8].mxu1 %vm1043_vm1, %v11585_v8  ;;  %v11594_v9 = vld [vmem:[%s11174_s19 + $0x250] sm:$0xff] }
 0x10c   : > { %9214 = vmatprep.mubr.msk.f32.mxu1 %vm1043_vm1, %v11594_v9 }
 0x10e   : > { %9331 = vmatmul.mubr.msk.f32.gmra.mrb[22].mxu0 %vm1043_vm1, %v11221_v10  ;;  %v11599_v10 = vld [vmem:[%s11174_s19 + $0x258] sm:$0xff] }
 0x10f   : > { %9333 = vmatprep.mubr.msk.f32.mxu0 %vm1043_vm1, %v11224_v11  ;;  %9215 = vmatmul.mubr.msk.f32.gmra.mrb[10].mxu1 %vm1043_vm1, %v11599_v10  ;;  %v11608_v11 = vld [vmem:[%s11174_s19 + $0x260] sm:$0xff] }
 0x110   : > { %9217 = vmatprep.mubr.msk.f32.mxu1 %vm1043_vm1, %v11608_v11 }
 0x112   : > { %9334 = vmatmul.mubr.msk.f32.gmra.mrb[24].mxu0 %vm1043_vm1, %v11231_v12  ;;  %v11613_v12 = vld [vmem:[%s11174_s19 + $0x268] sm:$0xff] }
 0x113   : > { %9336 = vmatprep.mubr.msk.f32.mxu0 %vm1043_vm1, %v11234_v13  ;;  %9218 = vmatmul.mubr.msk.f32.gmra.mrb[12].mxu1 %vm1043_vm1, %v11613_v12  ;;  %v11622_v13 = vld [vmem:[%s11174_s19 + $0x270] sm:$0xff] }
 0x114   : > { %9220 = vmatprep.mubr.msk.f32.mxu1 %vm1043_vm1, %v11622_v13 }
 0x116   : > { %9337 = vmatmul.mubr.msk.f32.gmra.mrb[26].mxu0 %vm1043_vm1, %v11241_v14  ;;  %v11627_v14 = vld [vmem:[%s11174_s19 + $0x278] sm:$0xff] }
 0x117   : > { %9339 = vmatprep.mubr.msk.f32.mxu0 %vm1043_vm1, %v11244_v15  ;;  %9221 = vmatmul.mubr.msk.f32.gmra.mrb[14].mxu1 %vm1043_vm1, %v11627_v14  ;;  %v11636_v15 = vld [vmem:[%s11174_s19 + $0x280] sm:$0xff] }
 0x118   : > { %9223 = vmatprep.mubr.msk.f32.mxu1 %vm1043_vm1, %v11636_v15 }
 0x11a   : > { %9340 = vmatmul.mubr.msk.f32.gmra.mrb[28].mxu0 %vm1043_vm1, %v11251_v16  ;;  %v11641_v16 = vld [vmem:[%s11174_s19 + $0x288] sm:$0xff] }
 0x11b   : > { %9342 = vmatprep.mubr.msk.f32.mxu0 %vm1043_vm1, %v11254_v17  ;;  %9224 = vmatmul.mubr.msk.f32.gmra.mrb[16].mxu1 %vm1043_vm1, %v11641_v16  ;;  %v11650_v17 = vld [vmem:[%s11174_s19 + $0x290] sm:$0xff] }
 0x11c   : > { %9226 = vmatprep.mubr.msk.f32.mxu1 %vm1043_vm1, %v11650_v17 }
 0x11e   : > { %9343 = vmatmul.mubr.msk.f32.gmra.mrb[30].mxu0 %vm1043_vm1, %v11261_v18  ;;  %v11655_v18 = vld [vmem:[%s11174_s19 + $0x298] sm:$0xff] }
 0x11f   : > { %9345 = vmatprep.mubr.msk.f32.mxu0 %vm1043_vm1, %v11264_v19  ;;  %9227 = vmatmul.mubr.msk.f32.gmra.mrb[18].mxu1 %vm1043_vm1, %v11655_v18  ;;  %v11664_v19 = vld [vmem:[%s11174_s19 + $0x2a0] sm:$0xff] }
 0x120   : > { %9229 = vmatprep.mubr.msk.f32.mxu1 %vm1043_vm1, %v11664_v19 }
 0x122   : > { %9346 = vmatmul.mubr.msk.f32.gmra.mrb[32].mxu0 %vm1043_vm1, %v11271_v20  ;;  %v11669_v20 = vld [vmem:[%s11174_s19 + $0x2a8] sm:$0xff] }
 0x123   : > { %9348 = vmatprep.mubr.msk.f32.mxu0 %vm1043_vm1, %v11274_v21  ;;  %9230 = vmatmul.mubr.msk.f32.gmra.mrb[20].mxu1 %vm1043_vm1, %v11669_v20  ;;  %v11678_v21 = vld [vmem:[%s11174_s19 + $0x2b0] sm:$0xff] }
 0x124   : > { %9232 = vmatprep.mubr.msk.f32.mxu1 %vm1043_vm1, %v11678_v21 }
 0x126   : > { %9349 = vmatmul.mubr.msk.f32.gmra.mrb[34].mxu0 %vm1043_vm1, %v11281_v22  ;;  %v11683_v22 = vld [vmem:[%s11174_s19 + $0x2b8] sm:$0xff] }
 0x127   : > { %9351 = vmatprep.mubr.msk.f32.mxu0 %vm1043_vm1, %v11284_v23  ;;  %9233 = vmatmul.mubr.msk.f32.gmra.mrb[22].mxu1 %vm1043_vm1, %v11683_v22  ;;  %v11692_v23 = vld [vmem:[%s11174_s19 + $0x2c0] sm:$0xff] }
 0x128   : > { %9235 = vmatprep.mubr.msk.f32.mxu1 %vm1043_vm1, %v11692_v23 }
 0x12a   : > { %9352 = vmatmul.mubr.msk.f32.gmra.mrb[36].mxu0 %vm1043_vm1, %v11291_v24  ;;  %v11697_v24 = vld [vmem:[%s11174_s19 + $0x2c8] sm:$0xff] }
 0x12b   : > { %9354 = vmatprep.mubr.msk.f32.mxu0 %vm1043_vm1, %v11294_v25  ;;  %9236 = vmatmul.mubr.msk.f32.gmra.mrb[24].mxu1 %vm1043_vm1, %v11697_v24  ;;  %v11706_v25 = vld [vmem:[%s11174_s19 + $0x2d0] sm:$0xff] }
 0x12c   : > { %9238 = vmatprep.mubr.msk.f32.mxu1 %vm1043_vm1, %v11706_v25 }
 0x12e   : > { %9355 = vmatmul.mubr.msk.f32.gmra.mrb[38].mxu0 %vm1043_vm1, %v11301_v26  ;;  %v11711_v26 = vld [vmem:[%s11174_s19 + $0x2d8] sm:$0xff] }
 0x12f   : > { %9357 = vmatprep.mubr.msk.f32.mxu0 %vm1043_vm1, %v11304_v27  ;;  %9239 = vmatmul.mubr.msk.f32.gmra.mrb[26].mxu1 %vm1043_vm1, %v11711_v26  ;;  %v11720_v27 = vld [vmem:[%s11174_s19 + $0x2e0] sm:$0xff] }
 0x130   : > { %9241 = vmatprep.mubr.msk.f32.mxu1 %vm1043_vm1, %v11720_v27 }
 0x132   : > { %9358 = vmatmul.mubr.msk.f32.gmra.mrb[40].mxu0 %vm1043_vm1, %v11311_v28  ;;  %v11725_v28 = vld [vmem:[%s11174_s19 + $0x2e8] sm:$0xff] }
 0x133   : > { %9360 = vmatprep.mubr.msk.f32.mxu0 %vm1043_vm1, %v11314_v29  ;;  %9242 = vmatmul.mubr.msk.f32.gmra.mrb[28].mxu1 %vm1043_vm1, %v11725_v28  ;;  %v11734_v29 = vld [vmem:[%s11174_s19 + $0x2f0] sm:$0xff] }
 0x134   : > { %9244 = vmatprep.mubr.msk.f32.mxu1 %vm1043_vm1, %v11734_v29 }
 0x136   : > { %9361 = vmatmul.mubr.msk.f32.gmra.mrb[42].mxu0 %vm1043_vm1, %v11321_v30  ;;  %v11739_v30 = vld [vmem:[%s11174_s19 + $0x2f8] sm:$0xff] }
 0x137   : > { %9363 = vmatprep.mubr.msk.f32.mxu0 %vm1043_vm1, %v11324_v31  ;;  %9245 = vmatmul.mubr.msk.f32.gmra.mrb[30].mxu1 %vm1043_vm1, %v11739_v30  ;;  %v11748_v31 = vld [vmem:[%s11174_s19 + $0x300] sm:$0xff] }
 0x138   : > { %9247 = vmatprep.mubr.msk.f32.mxu1 %vm1043_vm1, %v11748_v31 }
 0x13a   : > { %9364 = vmatmul.mubr.msk.f32.gmra.mrb[44].mxu0 %vm1043_vm1, %v11331_v32  ;;  %v11753_v32 = vld [vmem:[%s11174_s19 + $0x308] sm:$0xff] }
 0x13b   : > { %9366 = vmatprep.mubr.msk.f32.mxu0 %vm1043_vm1, %v11334_v33  ;;  %9248 = vmatmul.mubr.msk.f32.gmra.mrb[32].mxu1 %vm1043_vm1, %v11753_v32  ;;  %v11762_v33 = vld [vmem:[%s11174_s19 + $0x310] sm:$0xff] }
 0x13c   : > { %9250 = vmatprep.mubr.msk.f32.mxu1 %vm1043_vm1, %v11762_v33 }
 0x13e   : > { %9367 = vmatmul.mubr.msk.f32.gmra.mrb[46].mxu0 %vm1043_vm1, %v11341_v34  ;;  %v11767_v34 = vld [vmem:[%s11174_s19 + $0x318] sm:$0xff] }
 0x13f   : > { %9369 = vmatprep.mubr.msk.f32.mxu0 %vm1043_vm1, %v11344_v35  ;;  %9251 = vmatmul.mubr.msk.f32.gmra.mrb[34].mxu1 %vm1043_vm1, %v11767_v34  ;;  %v11776_v35 = vld [vmem:[%s11174_s19 + $0x320] sm:$0xff] }
 0x140   : > { %9253 = vmatprep.mubr.msk.f32.mxu1 %vm1043_vm1, %v11776_v35 }
 0x142   : > { %9370 = vmatmul.mubr.msk.f32.gmra.mrb[48].mxu0 %vm1043_vm1, %v11351_v36  ;;  %v11781_v36 = vld [vmem:[%s11174_s19 + $0x328] sm:$0xff] }
 0x143   : > { %9372 = vmatprep.mubr.msk.f32.mxu0 %vm1043_vm1, %v11354_v37  ;;  %9254 = vmatmul.mubr.msk.f32.gmra.mrb[36].mxu1 %vm1043_vm1, %v11781_v36  ;;  %v11790_v37 = vld [vmem:[%s11174_s19 + $0x330] sm:$0xff] }
 0x144   : > { %9256 = vmatprep.mubr.msk.f32.mxu1 %vm1043_vm1, %v11790_v37 }
 0x146   : > { %9373 = vmatmul.mubr.msk.f32.gmra.mrb[50].mxu0 %vm1043_vm1, %v11361_v38  ;;  %v11795_v38 = vld [vmem:[%s11174_s19 + $0x338] sm:$0xff] }
 0x147   : > { %9375 = vmatprep.mubr.msk.f32.mxu0 %vm1043_vm1, %v11364_v39  ;;  %9257 = vmatmul.mubr.msk.f32.gmra.mrb[38].mxu1 %vm1043_vm1, %v11795_v38  ;;  %v11804_v39 = vld [vmem:[%s11174_s19 + $0x340] sm:$0xff] }
 0x148   : > { %15770 = vst [vmem:[#allocation39_spill] sm:$0xff] %v11804_v39  ;;  %9259 = vmatprep.mubr.msk.f32.mxu1 %vm1043_vm1, %v11804_v39 }
 0x14a   : > { %9376 = vmatmul.mubr.msk.f32.gmra.mrb[52].mxu0 %vm1043_vm1, %v11371_v40  ;;  %v11809_v40 = vld [vmem:[%s11174_s19 + $0x348] sm:$0xff] }
 0x14b   : > { %9378 = vmatprep.mubr.msk.f32.mxu0 %vm1043_vm1, %v11374_v41  ;;  %15771 = vst [vmem:[#allocation40_spill] sm:$0xff] %v11809_v40  ;;  %9260 = vmatmul.mubr.msk.f32.gmra.mrb[40].mxu1 %vm1043_vm1, %v11809_v40  ;;  %v11818_v41 = vld [vmem:[%s11174_s19 + $0x350] sm:$0xff] }
 0x14c   : > { %15772 = vst [vmem:[#allocation41_spill] sm:$0xff] %v11818_v41  ;;  %9262 = vmatprep.mubr.msk.f32.mxu1 %vm1043_vm1, %v11818_v41 }
 0x14e   : > { %9379 = vmatmul.mubr.msk.f32.gmra.mrb[54].mxu0 %vm1043_vm1, %v11381_v42  ;;  %v11823_v42 = vld [vmem:[%s11174_s19 + $0x358] sm:$0xff] }
 0x14f   : > { %9381 = vmatprep.mubr.msk.f32.mxu0 %vm1043_vm1, %v11384_v43  ;;  %15773 = vst [vmem:[#allocation42_spill] sm:$0xff] %v11823_v42  ;;  %9263 = vmatmul.mubr.msk.f32.gmra.mrb[42].mxu1 %vm1043_vm1, %v11823_v42  ;;  %v11832_v43 = vld [vmem:[%s11174_s19 + $0x360] sm:$0xff] }
 0x150   : > { %15774 = vst [vmem:[#allocation43_spill] sm:$0xff] %v11832_v43  ;;  %9265 = vmatprep.mubr.msk.f32.mxu1 %vm1043_vm1, %v11832_v43 }
 0x152   : > { %9382 = vmatmul.mubr.msk.f32.gmra.mrb[56].mxu0 %vm1043_vm1, %v11391_v44  ;;  %v11837_v44 = vld [vmem:[%s11174_s19 + $0x368] sm:$0xff] }
 0x153   : > { %9384 = vmatprep.mubr.msk.f32.mxu0 %vm1043_vm1, %v11394_v45  ;;  %15775 = vst [vmem:[#allocation44_spill] sm:$0xff] %v11837_v44  ;;  %9266 = vmatmul.mubr.msk.f32.gmra.mrb[44].mxu1 %vm1043_vm1, %v11837_v44  ;;  %v11846_v45 = vld [vmem:[%s11174_s19 + $0x370] sm:$0xff] }
 0x154   : > { %15776 = vst [vmem:[#allocation45_spill] sm:$0xff] %v11846_v45  ;;  %9268 = vmatprep.mubr.msk.f32.mxu1 %vm1043_vm1, %v11846_v45 }
 0x156   : > { %9385 = vmatmul.mubr.msk.f32.gmra.mrb[58].mxu0 %vm1043_vm1, %v11401_v46  ;;  %v11851_v46 = vld [vmem:[%s11174_s19 + $0x378] sm:$0xff] }
 0x157   : > { %9387 = vmatprep.mubr.msk.f32.mxu0 %vm1043_vm1, %v11404_v47  ;;  %15777 = vst [vmem:[#allocation46_spill] sm:$0xff] %v11851_v46  ;;  %9269 = vmatmul.mubr.msk.f32.gmra.mrb[46].mxu1 %vm1043_vm1, %v11851_v46 }
 0x15a   : > { %9388 = vmatmul.mubr.msk.f32.gmra.mrb[60].mxu0 %vm1043_vm1, %v11411_v48 }
 0x15b   : > { %9390 = vmatprep.mubr.msk.f32.mxu0 %vm1043_vm1, %v11414_v49 }
 0x15e   : > { %9391 = vmatmul.mubr.msk.f32.gmra.mrb[62].mxu0 %vm1043_vm1, %v11421_v50 }
 0x15f   : > { %9393 = vmatprep.mubr.msk.f32.mxu0 %vm1043_vm1, %v11424_v51 }
 0x162   : > { %9394 = vmatmul.mubr.msk.f32.gmra.mrb[64].mxu0 %vm1043_vm1, %v11431_v52  ;;  %v15778_v52 = vld [vmem:[#allocation35_spill] sm:$0xff] }
 0x163   : > { %9396 = vmatprep.mubr.msk.f32.mxu0 %vm1043_vm1, %v11434_v53  ;;  %v15779_v53 = vld [vmem:[#allocation36_spill] sm:$0xff] }
 0x166   : > { %9397 = vmatmul.mubr.msk.f32.gmra.mrb[66].mxu0 %vm1043_vm1, %v11441_v54 }
 0x167   : > { %9399 = vmatprep.mubr.msk.f32.mxu0 %vm1043_vm1, %v11444_v55 }
 0x16a   : > { %9400 = vmatmul.mubr.msk.f32.gmra.mrb[68].mxu0 %vm1043_vm1, %v11451_v56 }
 0x16b   : > { %9402 = vmatprep.mubr.msk.f32.mxu0 %vm1043_vm1, %v11454_v57  ;;  %v15780_v57 = vld [vmem:[#allocation37_spill] sm:$0xff] }
 0x16e   : > { %9403 = vmatmul.mubr.msk.f32.gmra.mrb[70].mxu0 %vm1043_vm1, %v11461_v58  ;;  %v15781_v58 = vld [vmem:[#allocation38_spill] sm:$0xff] }
 0x16f   : > { %9405 = vmatprep.mubr.msk.f32.mxu0 %vm1043_vm1, %v11464_v59 }
 0x172   : > { %9406 = vmatmul.mubr.msk.f32.gmra.mrb[72].mxu0 %vm1043_vm1, %v15778_v52 }
 0x173   : > { %9408 = vmatprep.mubr.msk.f32.mxu0 %vm1043_vm1, %v15779_v53 }
 0x176   : > { %9409 = vmatmul.mubr.msk.f32.gmra.mrb[74].mxu0 %vm1043_vm1, %v11481_v62 }
 0x177   : > { %9411 = vmatprep.mubr.msk.f32.mxu0 %vm1043_vm1, %v11484_v63 }
 0x17a   : > { %9412 = vmatmul.mubr.msk.f32.gmra.mrb[76].mxu0 %vm1043_vm1, %v11491_v0 }
 0x17b   : > { %9414 = vmatprep.mubr.msk.f32.mxu0 %vm1043_vm1, %v15780_v57 }
 0x17e   : > { %9415 = vmatmul.mubr.msk.f32.gmra.mrb[78].mxu0 %vm1043_vm1, %v15781_v58 }
 0x17f   : > { %9417 = vmatprep.mubr.msk.f32.mxu0 %vm1043_vm1, %v11524_v5 }
 0x182   : > { %9418 = vmatmul.mubr.msk.f32.gmra.mrb[80].mxu0 %vm1043_vm1, %v11529_v61 }
 0x183   : > { %9420 = vmatprep.mubr.msk.f32.mxu0 %vm1043_vm1, %v11538_v1 }
 0x186   : > { %9421 = vmatmul.mubr.msk.f32.gmra.mrb[82].mxu0 %vm1043_vm1, %v11543_v60 }
 0x187   : > { %9423 = vmatprep.mubr.msk.f32.mxu0 %vm1043_vm1, %v11552_v2 }
 0x18a   : > { %9424 = vmatmul.mubr.msk.f32.gmra.mrb[84].mxu0 %vm1043_vm1, %v11557_v3 }
 0x18b   : > { %9426 = vmatprep.mubr.msk.f32.mxu0 %vm1043_vm1, %v11566_v4 }
 0x18e   : > { %9427 = vmatmul.mubr.msk.f32.gmra.mrb[86].mxu0 %vm1043_vm1, %v11571_v6 }
 0x18f   : > { %9429 = vmatprep.mubr.msk.f32.mxu0 %vm1043_vm1, %v11580_v7 }
 0x192   : > { %9430 = vmatmul.mubr.msk.f32.gmra.mrb[88].mxu0 %vm1043_vm1, %v11585_v8 }
 0x193   : > { %9432 = vmatprep.mubr.msk.f32.mxu0 %vm1043_vm1, %v11594_v9 }
 0x196   : > { %9433 = vmatmul.mubr.msk.f32.gmra.mrb[90].mxu0 %vm1043_vm1, %v11599_v10 }
 0x197   : > { %9435 = vmatprep.mubr.msk.f32.mxu0 %vm1043_vm1, %v11608_v11 }
 0x19a   : > { %9436 = vmatmul.mubr.msk.f32.gmra.mrb[92].mxu0 %vm1043_vm1, %v11613_v12 }
 0x19b   : > { %9438 = vmatprep.mubr.msk.f32.mxu0 %vm1043_vm1, %v11622_v13 }
 0x19e   : > { %9439 = vmatmul.mubr.msk.f32.gmra.mrb[94].mxu0 %vm1043_vm1, %v11627_v14 }
 0x19f   : > { %9441 = vmatprep.mubr.msk.f32.mxu0 %vm1043_vm1, %v11636_v15 }
 0x1a2   : > { %9442 = vmatmul.mubr.msk.f32.gmra.mrb[96].mxu0 %vm1043_vm1, %v11641_v16 }
 0x1a3   : > { %9444 = vmatprep.mubr.msk.f32.mxu0 %vm1043_vm1, %v11650_v17 }
 0x1a6   : > { %9445 = vmatmul.mubr.msk.f32.gmra.mrb[98].mxu0 %vm1043_vm1, %v11655_v18 }
 0x1a7   : > { %9447 = vmatprep.mubr.msk.f32.mxu0 %vm1043_vm1, %v11664_v19 }
 0x1aa   : > { %9448 = vmatmul.mubr.msk.f32.gmra.mrb[100].mxu0 %vm1043_vm1, %v11669_v20 }
 0x1ab   : > { %9450 = vmatprep.mubr.msk.f32.mxu0 %vm1043_vm1, %v11678_v21 }
 0x1ae   : > { %9451 = vmatmul.mubr.msk.f32.gmra.mrb[102].mxu0 %vm1043_vm1, %v11683_v22 }
 0x1af   : > { %9453 = vmatprep.mubr.msk.f32.mxu0 %vm1043_vm1, %v11692_v23 }
 0x1b2   : > { %9454 = vmatmul.mubr.msk.f32.gmra.mrb[104].mxu0 %vm1043_vm1, %v11697_v24 }
 0x1b3   : > { %9456 = vmatprep.mubr.msk.f32.mxu0 %vm1043_vm1, %v11706_v25 }
 0x1b6   : > { %9457 = vmatmul.mubr.msk.f32.gmra.mrb[106].mxu0 %vm1043_vm1, %v11711_v26 }
 0x1b7   : > { %9459 = vmatprep.mubr.msk.f32.mxu0 %vm1043_vm1, %v11720_v27 }
 0x1ba   : > { %9460 = vmatmul.mubr.msk.f32.gmra.mrb[108].mxu0 %vm1043_vm1, %v11725_v28 }
 0x1bb   : > { %9462 = vmatprep.mubr.msk.f32.mxu0 %vm1043_vm1, %v11734_v29 }
 0x1be   : > { %9463 = vmatmul.mubr.msk.f32.gmra.mrb[110].mxu0 %vm1043_vm1, %v11739_v30 }
 0x1bf   : > { %9465 = vmatprep.mubr.msk.f32.mxu0 %vm1043_vm1, %v11748_v31 }
 0x1c2   : > { %9466 = vmatmul.mubr.msk.f32.gmra.mrb[112].mxu0 %vm1043_vm1, %v11753_v32 }
 0x1c3   : > { %9468 = vmatprep.mubr.msk.f32.mxu0 %vm1043_vm1, %v11762_v33 }
 0x1c6   : > { %9469 = vmatmul.mubr.msk.f32.gmra.mrb[114].mxu0 %vm1043_vm1, %v11767_v34 }
 0x1c7   : > { %9471 = vmatprep.mubr.msk.f32.mxu0 %vm1043_vm1, %v11776_v35 }
 0x1ca   : > { %9472 = vmatmul.mubr.msk.f32.gmra.mrb[116].mxu0 %vm1043_vm1, %v11781_v36 }
 0x1cb   : > { %9474 = vmatprep.mubr.msk.f32.mxu0 %vm1043_vm1, %v11790_v37 }
 0x1ce   : > { %9475 = vmatmul.mubr.msk.f32.gmra.mrb[118].mxu0 %vm1043_vm1, %v11795_v38 }
 0x1cf   : > { %9477 = vmatprep.mubr.msk.f32.mxu0 %vm1043_vm1, %v11804_v39  ;;  %v15782_v39 = vld [vmem:[#allocation3_spill] sm:$0xff] }
 0x1d2   : > { %9478 = vmatmul.mubr.msk.f32.gmra.mrb[120].mxu0 %vm1043_vm1, %v11809_v40  ;;  %v15783_v40 = vld [vmem:[#allocation4_spill] sm:$0xff] }
 0x1d3   : > { %9480 = vmatprep.mubr.msk.f32.mxu0 %vm1043_vm1, %v11818_v41  ;;  %v15784_v41 = vld [vmem:[#allocation5_spill] sm:$0xff] }
 0x1d6   : > { %9481 = vmatmul.mubr.msk.f32.gmra.mrb[122].mxu0 %vm1043_vm1, %v11823_v42  ;;  %v15785_v42 = vld [vmem:[#allocation6_spill] sm:$0xff] }
 0x1d7   : > { %9483 = vmatprep.mubr.msk.f32.mxu0 %vm1043_vm1, %v11832_v43  ;;  %v15786_v43 = vld [vmem:[#allocation7_spill] sm:$0xff] }
 0x1da   : > { %9484 = vmatmul.mubr.msk.f32.gmra.mrb[124].mxu0 %vm1043_vm1, %v11837_v44  ;;  %v15787_v44 = vld [vmem:[#allocation8_spill] sm:$0xff] }
 0x1db   : > { %9486 = vmatprep.mubr.msk.f32.mxu0 %vm1043_vm1, %v11846_v45  ;;  %v15788_v45 = vld [vmem:[#allocation9_spill] sm:$0xff] }
 0x1de   : > { %9487 = vmatmul.mubr.msk.f32.gmra.mrb[126].mxu0 %vm1043_vm1, %v11851_v46  ;;  %v15789_v46 = vld [vmem:[#allocation10_spill] sm:$0xff] }
 0x1df   : > { %9491 = vmatprep.mubr.msk.f32.mxu0 %vm1043_vm1, %v15782_v39  ;;  %v15790_v39 = vld [vmem:[#allocation11_spill] sm:$0xff] }
 0x1e2   : > { %9492 = vmatmul.mubr.msk.f32.vlgmr.msra.gmra.mrb[0].mxu0 %vm1043_vm1, %v15783_v40  ;;  %v15791_v40 = vld [vmem:[#allocation12_spill] sm:$0xff] }
 0x1e3   : > { %9494 = vmatprep.mubr.msk.f32.mxu0 %vm1043_vm1, %v15784_v41  ;;  %v15792_v41 = vld [vmem:[#allocation13_spill] sm:$0xff] }
 0x1e6   : > { %9495 = vmatmul.mubr.msk.f32.gmra.mrb[2].mxu0 %vm1043_vm1, %v15785_v42  ;;  %v15793_v42 = vld [vmem:[#allocation14_spill] sm:$0xff] }
 0x1e7   : > { %9497 = vmatprep.mubr.msk.f32.mxu0 %vm1043_vm1, %v15786_v43  ;;  %v15794_v43 = vld [vmem:[#allocation15_spill] sm:$0xff] }
 0x1ea   : > { %9498 = vmatmul.mubr.msk.f32.gmra.mrb[4].mxu0 %vm1043_vm1, %v15787_v44  ;;  %v15795_v44 = vld [vmem:[#allocation16_spill] sm:$0xff] }
 0x1eb   : > { %9500 = vmatprep.mubr.msk.f32.mxu0 %vm1043_vm1, %v15788_v45  ;;  %v15796_v45 = vld [vmem:[#allocation17_spill] sm:$0xff] }
 0x1ee   : > { %9501 = vmatmul.mubr.msk.f32.gmra.mrb[6].mxu0 %vm1043_vm1, %v15789_v46  ;;  %v15797_v46 = vld [vmem:[#allocation18_spill] sm:$0xff] }
 0x1ef   : > { %9503 = vmatprep.mubr.msk.f32.mxu0 %vm1043_vm1, %v15790_v39  ;;  %v15798_v39 = vld [vmem:[#allocation19_spill] sm:$0xff] }
 0x1f2   : > { %9504 = vmatmul.mubr.msk.f32.gmra.mrb[8].mxu0 %vm1043_vm1, %v15791_v40  ;;  %v15799_v40 = vld [vmem:[#allocation20_spill] sm:$0xff] }
 0x1f3   : > { %9506 = vmatprep.mubr.msk.f32.mxu0 %vm1043_vm1, %v15792_v41  ;;  %v15800_v41 = vld [vmem:[#allocation21_spill] sm:$0xff] }
 0x1f6   : > { %9507 = vmatmul.mubr.msk.f32.gmra.mrb[10].mxu0 %vm1043_vm1, %v15793_v42  ;;  %v15801_v42 = vld [vmem:[#allocation22_spill] sm:$0xff] }
 0x1f7   : > { %9509 = vmatprep.mubr.msk.f32.mxu0 %vm1043_vm1, %v15794_v43  ;;  %v15802_v43 = vld [vmem:[#allocation23_spill] sm:$0xff] }
 0x1fa   : > { %9510 = vmatmul.mubr.msk.f32.gmra.mrb[12].mxu0 %vm1043_vm1, %v15795_v44  ;;  %v15803_v44 = vld [vmem:[#allocation24_spill] sm:$0xff] }
 0x1fb   : > { %9512 = vmatprep.mubr.msk.f32.mxu0 %vm1043_vm1, %v15796_v45  ;;  %v15804_v45 = vld [vmem:[#allocation25_spill] sm:$0xff] }
 0x1fe   : > { %9513 = vmatmul.mubr.msk.f32.gmra.mrb[14].mxu0 %vm1043_vm1, %v15797_v46  ;;  %v15805_v46 = vld [vmem:[#allocation26_spill] sm:$0xff] }
 0x1ff   : > { %9515 = vmatprep.mubr.msk.f32.mxu0 %vm1043_vm1, %v15798_v39  ;;  %v15806_v39 = vld [vmem:[#allocation27_spill] sm:$0xff] }
 0x202   : > { %9516 = vmatmul.mubr.msk.f32.gmra.mrb[16].mxu0 %vm1043_vm1, %v15799_v40  ;;  %v15807_v40 = vld [vmem:[#allocation28_spill] sm:$0xff] }
 0x203   : > { %9518 = vmatprep.mubr.msk.f32.mxu0 %vm1043_vm1, %v15800_v41  ;;  %v15808_v41 = vld [vmem:[#allocation29_spill] sm:$0xff] }
 0x206   : > { %9519 = vmatmul.mubr.msk.f32.gmra.mrb[18].mxu0 %vm1043_vm1, %v15801_v42  ;;  %v15809_v42 = vld [vmem:[#allocation30_spill] sm:$0xff] }
 0x207   : > { %9521 = vmatprep.mubr.msk.f32.mxu0 %vm1043_vm1, %v15802_v43  ;;  %v12052_v43 = vld [vmem:[%s11174_s19 + $0x380] sm:$0xff] }
 0x208   : > { %9271 = vmatprep.mubr.msk.f32.mxu1 %vm1043_vm1, %v12052_v43 }
 0x20a   : > { %9522 = vmatmul.mubr.msk.f32.gmra.mrb[20].mxu0 %vm1043_vm1, %v15803_v44  ;;  %v12057_v44 = vld [vmem:[%s11174_s19 + $0x388] sm:$0xff] }
 0x20b   : > { %9524 = vmatprep.mubr.msk.f32.mxu0 %vm1043_vm1, %v15804_v45  ;;  %9272 = vmatmul.mubr.msk.f32.gmra.mrb[48].mxu1 %vm1043_vm1, %v12057_v44  ;;  %v12085_v45 = vld [vmem:[%s11174_s19 + $0x3a8] sm:$0xff] }
 0x20e   : > { %9525 = vmatmul.mubr.msk.f32.gmra.mrb[22].mxu0 %vm1043_vm1, %v15805_v46  ;;  %v12094_v46 = vld [vmem:[%s11174_s19 + $0x3b0] sm:$0xff] }
 0x20f   : > { %9527 = vmatprep.mubr.msk.f32.mxu0 %vm1043_vm1, %v15806_v39  ;;  %v12099_v39 = vld [vmem:[%s11174_s19 + $0x3b8] sm:$0xff] }
 0x212   : > { %9528 = vmatmul.mubr.msk.f32.gmra.mrb[24].mxu0 %vm1043_vm1, %v15807_v40  ;;  %v12108_v40 = vld [vmem:[%s11174_s19 + $0x3c0] sm:$0xff] }
 0x213   : > { %9530 = vmatprep.mubr.msk.f32.mxu0 %vm1043_vm1, %v15808_v41  ;;  %v12124_v41 = vld [vmem:[%s11174_s19 + $0x3d0] sm:$0xff] }
 0x216   : > { %9531 = vmatmul.mubr.msk.f32.gmra.mrb[26].mxu0 %vm1043_vm1, %v15809_v42  ;;  %v12127_v42 = vld [vmem:[%s11174_s19 + $0x3d8] sm:$0xff] }
 0x217   : > { %9533 = vmatprep.mubr.msk.f32.mxu0 %vm1043_vm1, %v11404_v47  ;;  %v15810_v47 = vld [vmem:[#allocation31_spill] sm:$0xff] }
 0x21a   : > { %9534 = vmatmul.mubr.msk.f32.gmra.mrb[28].mxu0 %vm1043_vm1, %v11411_v48  ;;  %v12066_v48 = vld [vmem:[%s11174_s19 + $0x390] sm:$0xff] }
 0x21b   : > { %9536 = vmatprep.mubr.msk.f32.mxu0 %vm1043_vm1, %v11414_v49  ;;  %v15811_v49 = vld [vmem:[#allocation32_spill] sm:$0xff]  ;;  %9274 = vmatprep.mubr.msk.f32.mxu1 %vm1043_vm1, %v12066_v48 }
 0x21e   : > { %9537 = vmatmul.mubr.msk.f32.gmra.mrb[30].mxu0 %vm1043_vm1, %v11421_v50  ;;  %v12071_v50 = vld [vmem:[%s11174_s19 + $0x398] sm:$0xff] }
 0x21f   : > { %9539 = vmatprep.mubr.msk.f32.mxu0 %vm1043_vm1, %v11424_v51  ;;  %9275 = vmatmul.mubr.msk.f32.gmra.mrb[50].mxu1 %vm1043_vm1, %v12071_v50  ;;  %v12080_v51 = vld [vmem:[%s11174_s19 + $0x3a0] sm:$0xff] }
 0x220   : > { %9277 = vmatprep.mubr.msk.f32.mxu1 %vm1043_vm1, %v12080_v51 }
 0x222   : > { %9540 = vmatmul.mubr.msk.f32.gmra.mrb[32].mxu0 %vm1043_vm1, %v15810_v47 }
 0x223   : > { %9542 = vmatprep.mubr.msk.f32.mxu0 %vm1043_vm1, %v15811_v49  ;;  %9278 = vmatmul.mubr.msk.f32.gmra.mrb[52].mxu1 %vm1043_vm1, %v12085_v45 }
 0x224   : > { %9280 = vmatprep.mubr.msk.f32.mxu1 %vm1043_vm1, %v12094_v46 }
 0x226   : > { %9543 = vmatmul.mubr.msk.f32.gmra.mrb[34].mxu0 %vm1043_vm1, %v11441_v54  ;;  %v15812_v54 = vld [vmem:[#allocation33_spill] sm:$0xff] }
 0x227   : > { %9545 = vmatprep.mubr.msk.f32.mxu0 %vm1043_vm1, %v11444_v55  ;;  %9281 = vmatmul.mubr.msk.f32.gmra.mrb[54].mxu1 %vm1043_vm1, %v12099_v39  ;;  %v15813_v55 = vld [vmem:[#allocation34_spill] sm:$0xff] }
 0x228   : > { %9283 = vmatprep.mubr.msk.f32.mxu1 %vm1043_vm1, %v12108_v40 }
 0x22a   : > { %9546 = vmatmul.mubr.msk.f32.gmra.mrb[36].mxu0 %vm1043_vm1, %v11451_v56  ;;  %v12113_v56 = vld [vmem:[%s11174_s19 + $0x3c8] sm:$0xff] }
 0x22b   : > { %9548 = vmatprep.mubr.msk.f32.mxu0 %vm1043_vm1, %v15812_v54  ;;  %9284 = vmatmul.mubr.msk.f32.gmra.mrb[56].mxu1 %vm1043_vm1, %v12113_v56 }
 0x22c   : > { %9286 = vmatprep.mubr.msk.f32.mxu1 %vm1043_vm1, %v12124_v41 }
 0x22e   : > { %9549 = vmatmul.mubr.msk.f32.gmra.mrb[38].mxu0 %vm1043_vm1, %v15813_v55 }
 0x22f   : > { %9551 = vmatprep.mubr.msk.f32.mxu0 %vm1043_vm1, %v11464_v59  ;;  %9287 = vmatmul.mubr.msk.f32.gmra.mrb[58].mxu1 %vm1043_vm1, %v12127_v42  ;;  %v12141_v59 = vld [vmem:[%s11174_s19 + $0x3e8] sm:$0xff] }
 0x232   : > { %9552 = vmatmul.mubr.msk.f32.gmra.mrb[40].mxu0 %vm1043_vm1, %v15778_v52  ;;  %v12138_v52 = vld [vmem:[%s11174_s19 + $0x3e0] sm:$0xff] }
 0x233   : > { %9554 = vmatprep.mubr.msk.f32.mxu0 %vm1043_vm1, %v15779_v53  ;;  %9289 = vmatprep.mubr.msk.f32.mxu1 %vm1043_vm1, %v12138_v52  ;;  %v12152_v53 = vld [vmem:[%s11174_s19 + $0x3f0] sm:$0xff] }
 0x234   : > { %9290 = vmatmul.mubr.msk.f32.gmra.mrb[60].mxu1 %vm1043_vm1, %v12141_v59 }
 0x235   : > { %9292 = vmatprep.mubr.msk.f32.mxu1 %vm1043_vm1, %v12152_v53 }
 0x236   : > { %9555 = vmatmul.mubr.msk.f32.gmra.mrb[42].mxu0 %vm1043_vm1, %v11481_v62  ;;  %v12155_v62 = vld [vmem:[%s11174_s19 + $0x3f8] sm:$0xff] }
 0x237   : > { %9557 = vmatprep.mubr.msk.f32.mxu0 %vm1043_vm1, %v11484_v63 }
 0x238   : > { %9293 = vmatmul.mubr.msk.f32.gmra.mrb[62].mxu1 %vm1043_vm1, %v12155_v62 }
 0x23a   : > { %9558 = vmatmul.mubr.msk.f32.gmra.mrb[44].mxu0 %vm1043_vm1, %v11491_v0 }
 0x23b   : > { %9560 = vmatprep.mubr.msk.f32.mxu0 %vm1043_vm1, %v15780_v57 }
 0x23e   : > { %9561 = vmatmul.mubr.msk.f32.gmra.mrb[46].mxu0 %vm1043_vm1, %v15781_v58 }
 0x23f   : > { %9563 = vmatprep.mubr.msk.f32.mxu0 %vm1043_vm1, %v11524_v5 }
 0x242   : > { %9564 = vmatmul.mubr.msk.f32.gmra.mrb[48].mxu0 %vm1043_vm1, %v11529_v61 }
 0x243   : > { %9566 = vmatprep.mubr.msk.f32.mxu0 %vm1043_vm1, %v11538_v1 }
 0x246   : > { %9567 = vmatmul.mubr.msk.f32.gmra.mrb[50].mxu0 %vm1043_vm1, %v11543_v60 }
 0x247   : > { %9569 = vmatprep.mubr.msk.f32.mxu0 %vm1043_vm1, %v11552_v2  ;;  %v15822_v2 = vmov 0.0  }
 0x24a   : > { %9570 = vmatmul.mubr.msk.f32.gmra.mrb[52].mxu0 %vm1043_vm1, %v11557_v3 }
 0x24b   : > { %9572 = vmatprep.mubr.msk.f32.mxu0 %vm1043_vm1, %v11566_v4 }
 0x24e   : > { %9573 = vmatmul.mubr.msk.f32.gmra.mrb[54].mxu0 %vm1043_vm1, %v11571_v6 }
 0x24f   : > { %9575 = vmatprep.mubr.msk.f32.mxu0 %vm1043_vm1, %v11580_v7 }
 0x252   : > { %9576 = vmatmul.mubr.msk.f32.gmra.mrb[56].mxu0 %vm1043_vm1, %v11585_v8 }
 0x253   : > { %9578 = vmatprep.mubr.msk.f32.mxu0 %vm1043_vm1, %v11594_v9 }
 0x256   : > { %9579 = vmatmul.mubr.msk.f32.gmra.mrb[58].mxu0 %vm1043_vm1, %v11599_v10 }
 0x257   : > { %9581 = vmatprep.mubr.msk.f32.mxu0 %vm1043_vm1, %v11608_v11 }
 0x25a   : > { %9582 = vmatmul.mubr.msk.f32.gmra.mrb[60].mxu0 %vm1043_vm1, %v11613_v12 }
 0x25b   : > { %9584 = vmatprep.mubr.msk.f32.mxu0 %vm1043_vm1, %v11622_v13 }
 0x25e   : > { %9585 = vmatmul.mubr.msk.f32.gmra.mrb[62].mxu0 %vm1043_vm1, %v11627_v14 }
 0x25f   : > { %9587 = vmatprep.mubr.msk.f32.mxu0 %vm1043_vm1, %v11636_v15 }
 0x262   : > { %9588 = vmatmul.mubr.msk.f32.gmra.mrb[64].mxu0 %vm1043_vm1, %v11641_v16 }
 0x263   : > { %9590 = vmatprep.mubr.msk.f32.mxu0 %vm1043_vm1, %v11650_v17 }
 0x266   : > { %9591 = vmatmul.mubr.msk.f32.gmra.mrb[66].mxu0 %vm1043_vm1, %v11655_v18 }
 0x267   : > { %9593 = vmatprep.mubr.msk.f32.mxu0 %vm1043_vm1, %v11664_v19  ;;  %v15814_v19 = vld [vmem:[#allocation39_spill] sm:$0xff] }
 0x26a   : > { %9594 = vmatmul.mubr.msk.f32.gmra.mrb[68].mxu0 %vm1043_vm1, %v11669_v20  ;;  %v15815_v20 = vld [vmem:[#allocation40_spill] sm:$0xff] }
 0x26b   : > { %9596 = vmatprep.mubr.msk.f32.mxu0 %vm1043_vm1, %v11678_v21  ;;  %v15816_v21 = vld [vmem:[#allocation41_spill] sm:$0xff] }
 0x26e   : > { %9597 = vmatmul.mubr.msk.f32.gmra.mrb[70].mxu0 %vm1043_vm1, %v11683_v22  ;;  %v15817_v22 = vld [vmem:[#allocation42_spill] sm:$0xff] }
 0x26f   : > { %9599 = vmatprep.mubr.msk.f32.mxu0 %vm1043_vm1, %v11692_v23  ;;  %v15818_v23 = vld [vmem:[#allocation43_spill] sm:$0xff] }
 0x272   : > { %9600 = vmatmul.mubr.msk.f32.gmra.mrb[72].mxu0 %vm1043_vm1, %v11697_v24  ;;  %v15819_v24 = vld [vmem:[#allocation44_spill] sm:$0xff] }
 0x273   : > { %9602 = vmatprep.mubr.msk.f32.mxu0 %vm1043_vm1, %v11706_v25  ;;  %v15820_v25 = vld [vmem:[#allocation45_spill] sm:$0xff] }
 0x276   : > { %9603 = vmatmul.mubr.msk.f32.gmra.mrb[74].mxu0 %vm1043_vm1, %v11711_v26  ;;  %v15821_v26 = vld [vmem:[#allocation46_spill] sm:$0xff] }
 0x277   : > { %9605 = vmatprep.mubr.msk.f32.mxu0 %vm1043_vm1, %v11720_v27  ;;  %v12282_v27 = vld [vmem:[%s15341_s2] ss:$0 sm:$0xff] }
 0x27a   : > { %9606 = vmatmul.mubr.msk.f32.gmra.mrb[76].mxu0 %vm1043_vm1, %v11725_v28  ;;  %v12286_v28 = vpop.f32.mrb[0].mxu1 }
 0x27b   : > { %9608 = vmatprep.mubr.msk.f32.mxu0 %vm1043_vm1, %v11734_v29 }
 0x27e   : > { %9609 = vmatmul.mubr.msk.f32.gmra.mrb[78].mxu0 %vm1043_vm1, %v11739_v30  ;;  %v12288_v30 = vpop.f32.mrb[1].mxu1 }
 0x27f   : > { %9611 = vmatprep.mubr.msk.f32.mxu0 %vm1043_vm1, %v11748_v31 }
 0x282   : > { %9612 = vmatmul.mubr.msk.f32.gmra.mrb[80].mxu0 %vm1043_vm1, %v11753_v32 }
 0x283   : > { %9614 = vmatprep.mubr.msk.f32.mxu0 %vm1043_vm1, %v11762_v33 }
 0x286   : > { %9615 = vmatmul.mubr.msk.f32.gmra.mrb[82].mxu0 %vm1043_vm1, %v11767_v34 }
 0x287   : > { %9617 = vmatprep.mubr.msk.f32.mxu0 %vm1043_vm1, %v11776_v35  ;;  %v12301_v35 = vpop.f32.mrb[2].mxu1 }
 0x28a   : > { %9618 = vmatmul.mubr.msk.f32.gmra.mrb[84].mxu0 %vm1043_vm1, %v11781_v36 }
 0x28b   : > { %9620 = vmatprep.mubr.msk.f32.mxu0 %vm1043_vm1, %v11790_v37 }
 0x28e   : > { %9621 = vmatmul.mubr.msk.f32.gmra.mrb[86].mxu0 %vm1043_vm1, %v11795_v38  ;;  %v12304_v38 = vpop.f32.mrb[3].mxu1 }
 0x28f   : > { %9623 = vmatprep.mubr.msk.f32.mxu0 %vm1043_vm1, %v15814_v19  ;;  %v12320_v61 = vpop.f32.mrb[4].mxu1 }
 0x290   : > { %v12325_v1 = vpop.f32.mrb[5].mxu1 }
 0x291   : > { %v12333_v3 = vpop.f32.mrb[6].mxu1 }
 0x292   : > { %9624 = vmatmul.mubr.msk.f32.gmra.mrb[88].mxu0 %vm1043_vm1, %v15815_v20  ;;  %v12339_v8 = vpop.f32.mrb[7].mxu1 }
 0x293   : > { %9626 = vmatprep.mubr.msk.f32.mxu0 %vm1043_vm1, %v15816_v21  ;;  %v12346_v10 = vpop.f32.mrb[8].mxu1  ;;  %v8168_v21 = vld [vmem:[%s15342_s3 + $0x20] sm:$0xff] }
 0x294   : > { %v12352_v14 = vpop.f32.mrb[9].mxu1 }
 0x295   : > { %v12359_v16 = vpop.f32.mrb[10].mxu1 }
 0x296   : > { %9627 = vmatmul.mubr.msk.f32.gmra.mrb[90].mxu0 %vm1043_vm1, %v15817_v22  ;;  %v8169_v22 = vld [vmem:[%s15342_s3 + $0x28] sm:$0xff] }
 0x297   : > { %9629 = vmatprep.mubr.msk.f32.mxu0 %vm1043_vm1, %v15818_v23  ;;  %v10159_v23 = vpack.c.bf16 %v8169_v22, %v8168_v21 }
 0x299   : > { %10160 = vmatprep.subr.bf16.mxu1 %v10159_v23 }
 0x29a   : > { %9630 = vmatmul.mubr.msk.f32.gmra.mrb[92].mxu0 %vm1043_vm1, %v15819_v24  ;;  %10162 = vmatpush3.bf16.msra.mxu1 %v10159_v23 }
 0x29b   : > { %9632 = vmatprep.mubr.msk.f32.mxu0 %vm1043_vm1, %v15820_v25 }
 0x29e   : > { %9633 = vmatmul.mubr.msk.f32.gmra.mrb[94].mxu0 %vm1043_vm1, %v15821_v26 }
 0x29f   : > { %9635 = vmatprep.mubr.msk.f32.mxu0 %vm1043_vm1, %v12052_v43 }
 0x2a2   : > { %9636 = vmatmul.mubr.msk.f32.gmra.mrb[96].mxu0 %vm1043_vm1, %v12057_v44  ;;  %v12365_v44 = vpop.f32.mrb[11].mxu1 }
 0x2a3   : > { %9638 = vmatprep.mubr.msk.f32.mxu0 %vm1043_vm1, %v12066_v48  ;;  %v12372_v48 = vpop.f32.mrb[12].mxu1 }
 0x2a6   : > { %9639 = vmatmul.mubr.msk.f32.gmra.mrb[98].mxu0 %vm1043_vm1, %v12071_v50 }
 0x2a7   : > { %9641 = vmatprep.mubr.msk.f32.mxu0 %vm1043_vm1, %v12080_v51 }
 0x2aa   : > { %9642 = vmatmul.mubr.msk.f32.gmra.mrb[100].mxu0 %vm1043_vm1, %v12085_v45  ;;  %v12378_v45 = vpop.f32.mrb[13].mxu1 }
 0x2ab   : > { %9644 = vmatprep.mubr.msk.f32.mxu0 %vm1043_vm1, %v12094_v46  ;;  %v12387_v54 = vpop.f32.mrb[14].mxu1 }
 0x2ae   : > { %9645 = vmatmul.mubr.msk.f32.gmra.mrb[102].mxu0 %vm1043_vm1, %v12099_v39 }
 0x2af   : > { %9647 = vmatprep.mubr.msk.f32.mxu0 %vm1043_vm1, %v12108_v40 }
 0x2b2   : > { %9648 = vmatmul.mubr.msk.f32.gmra.mrb[104].mxu0 %vm1043_vm1, %v12113_v56  ;;  %v12395_v56 = vpop.f32.mrb[15].mxu1 }
 0x2b3   : > { %9650 = vmatprep.mubr.msk.f32.mxu0 %vm1043_vm1, %v12124_v41 }
 0x2b5   : > { %v9493_v29 = vpop.f32.mrb[0].mxu0 }
 0x2b6   : > { %v12291_v31 = vadd.f32 %v9493_v29, %v12282_v27  ;;  %v2919_v32 = vpop.f32.mrb[1].mxu0  ;;  %9651 = vmatmul.mubr.msk.f32.gmra.mrb[106].mxu0 %vm1043_vm1, %v12127_v42  ;;  %v12404_v42 = vpop.f32.mrb[16].mxu1 }
 0x2b7   : > { %v12296_v33 = vadd.f32 %v12282_v27, %v2919_v32  ;;  %9653 = vmatprep.mubr.msk.f32.mxu0 %vm1043_vm1, %v12138_v52 }
 0x2b8   : > { %v15412_v34 = vmax.f32 %v12291_v31, 0.0 }
 0x2b9   : > { %v15416_v36 = vmax.f32 %v12296_v33, 0.0  ;;  %v9496_v37 = vpop.f32.mrb[2].mxu0 }
 0x2ba   : > { %v12307_v57 = vadd.f32 %v9496_v37, %v12282_v27  ;;  %9654 = vmatmul.mubr.msk.f32.gmra.mrb[108].mxu0 %vm1043_vm1, %v12141_v59  ;;  %4079 = vrot.lane.b32.xlu1 %v15412_v34, %s10808_s24  ;;  %v2929_v58 = vpop.f32.mrb[3].mxu0 }
 0x2bb   : > { %4077 = vrot.lane.b32.xlu0 %v15416_v36, %s10808_s24  ;;  %9656 = vmatprep.mubr.msk.f32.mxu0 %vm1043_vm1, %v12152_v53  ;;  %v12323_v63 = vadd.f32 %v12282_v27, %v2929_v58 }
 0x2bc   : > { %v15407_v60 = vmax.f32 %v12307_v57, 0.0 }
 0x2bd   : > { %v9499_v0 = vpop.f32.mrb[4].mxu0  ;;  %v15410_v4 = vmax.f32 %v12323_v63, 0.0 }
 0x2be   : > { %v2939_v5 = vpop.f32.mrb[5].mxu0  ;;  %9657 = vmatmul.mubr.msk.f32.gmra.mrb[110].mxu0 %vm1043_vm1, %v12155_v62  ;;  %v12337_v6 = vadd.f32 %v9499_v0, %v12282_v27  ;;  %v12410_v62 = vpop.f32.mrb[17].mxu1 }
 0x2bf   : > { %4083 = vrot.lane.b32.xlu0 %v15407_v60, %s10808_s24  ;;  %9659 = vmatprep.mubr.f32.mxu0 %v15822_v2  ;;  %v12350_v12 = vadd.f32 %v12282_v27, %v2939_v5  ;;  %v12429_v25 = vpop.f32.mrb[18].mxu1 }
 0x2c0   : > { %15823 = vst [vmem:[#allocation35_spill] sm:$0xff] %v12337_v6  ;;  %v15405_v11 = vmax.f32 %v12337_v6, 0.0  ;;  %v12435_v37 = vpop.f32.mrb[19].mxu1 }
 0x2c1   : > { %v9502_v7 = vpop.f32.mrb[6].mxu0  ;;  %v15406_v17 = vmax.f32 %v12350_v12, 0.0 }
 0x2c2   : > { %v2949_v9 = vpop.f32.mrb[7].mxu0  ;;  %9660 = vmatmul.mubr.f32.gmra.mrb[112].mxu0 %v15822_v2  ;;  %v12363_v18 = vadd.f32 %v9502_v7, %v12282_v27 }
 0x2c3   : > { %4081 = vrot.lane.b32.xlu0 %v15410_v4, %s10808_s24  ;;  %9662 = vmatprep.mubr.f32.mxu0 %v15822_v2  ;;  %v12376_v50 = vadd.f32 %v12282_v27, %v2949_v9  ;;  %v12452_v9 = vpop.f32.mrb[20].mxu1 }
 0x2c4   : > { %15824 = vst [vmem:[#allocation36_spill] sm:$0xff] %v12363_v18  ;;  %v15403_v49 = vmax.f32 %v12363_v18, 0.0 }
 0x2c5   : > { %v9505_v13 = vpop.f32.mrb[8].mxu0  ;;  %15825 = vst [vmem:[#allocation37_spill] sm:$0xff] %v12376_v50  ;;  %v15404_v39 = vmax.f32 %v12376_v50, 0.0 }
 0x2c6   : > { %v2959_v15 = vpop.f32.mrb[9].mxu0  ;;  %9663 = vmatmul.mubr.f32.gmra.mrb[114].mxu0 %v15822_v2  ;;  %v12391_v55 = vadd.f32 %v9505_v13, %v12282_v27 }
 0x2c7   : > { %4087 = vrot.lane.b32.xlu0 %v15405_v11, %s10808_s24  ;;  %9665 = vmatprep.mubr.f32.mxu0 %v15822_v2  ;;  %v12408_v59 = vadd.f32 %v12282_v27, %v2959_v15 }
 0x2c8   : > { %15826 = vst [vmem:[#allocation38_spill] sm:$0xff] %v12391_v55  ;;  %v15400_v52 = vmax.f32 %v12391_v55, 0.0 }
 0x2c9   : > { %v9508_v43 = vpop.f32.mrb[10].mxu0  ;;  %15827 = vst [vmem:[#allocation3_spill] sm:$0xff] %v12408_v59  ;;  %v15401_v26 = vmax.f32 %v12408_v59, 0.0 }
 0x2ca   : > { %v2969_v47 = vpop.f32.mrb[11].mxu0  ;;  %9666 = vmatmul.mubr.f32.gmra.mrb[116].mxu0 %v15822_v2  ;;  %v12433_v29 = vadd.f32 %v9508_v43, %v12282_v27 }
 0x2cb   : > { %4085 = vrot.lane.b32.xlu0 %v15406_v17, %s10808_s24  ;;  %9668 = vmatprep.mubr.f32.mxu0 %v15822_v2  ;;  %v12456_v15 = vadd.f32 %v12282_v27, %v2969_v47 }
 0x2cc   : > { %15828 = vst [vmem:[#allocation4_spill] sm:$0xff] %v12433_v29  ;;  %v15402_v13 = vmax.f32 %v12433_v29, 0.0 }
 0x2cd   : > { %v9511_v51 = vpop.f32.mrb[12].mxu0  ;;  %15829 = vst [vmem:[#allocation5_spill] sm:$0xff] %v12456_v15 }
 0x2ce   : > { %v12380_v46 = vpop.f32.mrb[13].mxu0  ;;  %9669 = vmatmul.mubr.f32.gmra.mrb[118].mxu0 %v15822_v2 }
 0x2cf   : > { %4091 = vrot.lane.b32.xlu0 %v15403_v49, %s10808_s24  ;;  %9671 = vmatprep.mubr.f32.mxu0 %v15822_v2  ;;  %v12494_v11 = vadd.f32 %v12282_v27, %v12380_v46  ;;  %v8170_v46 = vld [vmem:[%s15342_s3 + $0x30] sm:$0xff] }
 0x2d1   : > { %v12393_v40 = vpop.f32.mrb[14].mxu0  ;;  %15831 = vst [vmem:[#allocation7_spill] sm:$0xff] %v12494_v11  ;;  %v15421_v34 = vmax.f32 %v12494_v11, 0.0 }
 0x2d2   : > { %v12397_v41 = vpop.f32.mrb[15].mxu0  ;;  %9672 = vmatmul.mubr.f32.gmra.mrb[120].mxu0 %v15822_v2 }
 0x2d3   : > { %4089 = vrot.lane.b32.xlu0 %v15404_v39, %s10808_s24  ;;  %9674 = vmatprep.mubr.f32.mxu0 %v15822_v2 }
 0x2d5   : > { %v9517_v53 = vpop.f32.mrb[16].mxu0 }
 0x2d6   : > { %v12413_v19 = vadd.f32 %v9517_v53, %v12282_v27  ;;  %v12415_v20 = vpop.f32.mrb[17].mxu0  ;;  %9675 = vmatmul.mubr.f32.gmra.mrb[122].mxu0 %v15822_v2  ;;  %v12458_v53 = vpop.f32.mrb[21].mxu1 }
 0x2d7   : > { %4095 = vrot.lane.b32.xlu0 %v15400_v52, %s10808_s24  ;;  %9677 = vmatprep.mubr.f32.mxu0 %v15822_v2  ;;  %v12471_v47 = vpop.f32.mrb[22].mxu1 }
 0x2d8   : > { %v15415_v24 = vmax.f32 %v12413_v19, 0.0 }
 0x2d9   : > { %v9520_v32 = vpop.f32.mrb[18].mxu0 }
 0x2da   : > { %v12438_v58 = vadd.f32 %v9520_v32, %v12282_v27  ;;  %9678 = vmatmul.mubr.f32.gmra.mrb[124].mxu0 %v15822_v2  ;;  %4111 = vrot.lane.b32.xlu1 %v15415_v24, %s10808_s24  ;;  %v3009_v0 = vpop.f32.mrb[19].mxu0  ;;  %v15408_v32 = vmax.f32 %v12456_v15, 0.0  ;;  %v12557_v15 = vadd.f32 %v12282_v27, %v12415_v20 }
 0x2db   : > { %4093 = vrot.lane.b32.xlu0 %v15401_v26, %s10808_s24  ;;  %9680 = vmatprep.mubr.f32.mxu0 %v15822_v2  ;;  %v12450_v7 = vadd.f32 %v12282_v27, %v3009_v0  ;;  %v12475_v0 = vadd.f32 %v9511_v51, %v12282_v27  ;;  %v12477_v26 = vpop.f32.mrb[23].mxu1 }
 0x2dc   : > { %v15409_v5 = vmax.f32 %v12438_v58, 0.0  ;;  %v12489_v39 = vpop.f32.mrb[24].mxu1  ;;  %v15437_v20 = vmax.f32 %v12557_v15, 0.0 }
 0x2dd   : > { %v9523_v43 = vpop.f32.mrb[20].mxu0  ;;  %v15414_v22 = vmax.f32 %v12450_v7, 0.0  ;;  %15830 = vst [vmem:[#allocation6_spill] sm:$0xff] %v12475_v0  ;;  %v15413_v51 = vmax.f32 %v12475_v0, 0.0  ;;  %v12496_v60 = vpop.f32.mrb[25].mxu1 }
 0x2de   : > { %9681 = vmatmul.mubr.f32.gmra.mrb[126].mxu0 %v15822_v2  ;;  %4115 = vrot.lane.b32.xlu1 %v15409_v5, %s10808_s24  ;;  %v3019_v21 = vpop.f32.mrb[21].mxu0  ;;  %v12469_v23 = vadd.f32 %v9523_v43, %v12282_v27  ;;  %v12508_v4 = vpop.f32.mrb[26].mxu1 }
 0x2df   : > { %4099 = vrot.lane.b32.xlu0 %v15402_v13, %s10808_s24  ;;  %v12487_v49 = vadd.f32 %v12282_v27, %v3019_v21  ;;  %v12521_v24 = vpop.f32.mrb[27].mxu1 }
 0x2e0   : > { %v15411_v43 = vmax.f32 %v12469_v23, 0.0 }
 0x2e1   : > { %v9526_v52 = vpop.f32.mrb[22].mxu0  ;;  %v15419_v21 = vmax.f32 %v12487_v49, 0.0 }
 0x2e2   : > { %4113 = vrot.lane.b32.xlu1 %v15414_v22, %s10808_s24  ;;  %v3029_v13 = vpop.f32.mrb[23].mxu0  ;;  %v12506_v5 = vadd.f32 %v9526_v52, %v12282_v27 }
 0x2e3   : > { %4097 = vrot.lane.b32.xlu0 %v15408_v32, %s10808_s24  ;;  %v12531_v0 = vadd.f32 %v12282_v27, %v3029_v13 }
 0x2e4   : > { %15832 = vst [vmem:[#allocation8_spill] sm:$0xff] %v12506_v5  ;;  %v15425_v2 = vmax.f32 %v12506_v5, 0.0 }
 0x2e5   : > { %v9529_v17 = vpop.f32.mrb[24].mxu0  ;;  %15834 = vst [vmem:[#allocation10_spill] sm:$0xff] %v12531_v0  ;;  %v15430_v13 = vmax.f32 %v12531_v0, 0.0 }
 0x2e6   : > { %4119 = vrot.lane.b32.xlu1 %v15411_v43, %s10808_s24  ;;  %v3039_v32 = vpop.f32.mrb[25].mxu0  ;;  %v8171_v43 = vld [vmem:[%s15342_s3 + $0x38] sm:$0xff] }
 0x2e7   : > { %4103 = vrot.lane.b32.xlu0 %v15413_v51, %s10808_s24  ;;  %v12519_v51 = vadd.f32 %v12393_v40, %v12282_v27  ;;  %v10163_v52 = vpack.c.bf16 %v8171_v43, %v8170_v46  ;;  %v12533_v40 = vpop.f32.mrb[28].mxu1  ;;  %v12538_v46 = vadd.f32 %v12282_v27, %v12397_v41 }
 0x2e8   : > { %v12540_v29 = vpop.f32.mrb[29].mxu1 }
 0x2e9   : > { %15833 = vst [vmem:[#allocation9_spill] sm:$0xff] %v12519_v51  ;;  %v9532_v22 = vpop.f32.mrb[26].mxu0  ;;  %10164 = vmatprep.subr.bf16.mxu1 %v10163_v52  ;;  %v15426_v43 = vmax.f32 %v12519_v51, 0.0  ;;  %15835 = vst [vmem:[#allocation11_spill] sm:$0xff] %v12538_v46  ;;  %v12552_v11 = vpop.f32.mrb[30].mxu1  ;;  %v15433_v41 = vmax.f32 %v12538_v46, 0.0  ;;  %v12571_v51 = vadd.f32 %v12282_v27, %v3039_v32 }
 0x2ea   : > { %4117 = vrot.lane.b32.xlu1 %v15419_v21, %s10808_s24  ;;  %v3049_v36 = vpop.f32.mrb[27].mxu0  ;;  %10166 = vmatpush3.bf16.msra.mxu1 %v10163_v52  ;;  %v12550_v52 = vadd.f32 %v9529_v17, %v12282_v27  ;;  %15837 = vst [vmem:[#allocation13_spill] sm:$0xff] %v12552_v11 }
 0x2eb   : > { %4101 = vrot.lane.b32.xlu0 %v15421_v34, %s10808_s24  ;;  %15839 = vst [vmem:[#allocation15_spill] sm:$0xff] %v12571_v51  ;;  %v15439_v32 = vmax.f32 %v12571_v51, 0.0 }
 0x2ec   : > { %15836 = vst [vmem:[#allocation12_spill] sm:$0xff] %v12550_v52  ;;  %v15436_v17 = vmax.f32 %v12550_v52, 0.0 }
 0x2ed   : > { %v9535_v21 = vpop.f32.mrb[28].mxu0 }
 0x2ee   : > { %4123 = vrot.lane.b32.xlu1 %v15425_v2, %s10808_s24  ;;  %v3059_v34 = vpop.f32.mrb[29].mxu0 }
 0x2ef   : > { %4107 = vrot.lane.b32.xlu0 %v15426_v43, %s10808_s24  ;;  %v12564_v43 = vpop.f32.mrb[31].mxu1 }
 0x2f0   : > { %15838 = vst [vmem:[#allocation14_spill] sm:$0xff] %v12564_v43  ;;  %v12574_v18 = vpop.f32.mrb[32].mxu1 }
 0x2f1   : > { %v9538_v55 = vpop.f32.mrb[30].mxu0  ;;  %15840 = vst [vmem:[#allocation16_spill] sm:$0xff] %v12574_v18  ;;  %v12582_v46 = vpop.f32.mrb[33].mxu1 }
 0x2f2   : > { %4121 = vrot.lane.b32.xlu1 %v15430_v13, %s10808_s24  ;;  %v12562_v2 = vpop.f32.mrb[31].mxu0  ;;  %15842 = vst [vmem:[#allocation18_spill] sm:$0xff] %v12582_v46  ;;  %v12595_v52 = vpop.f32.mrb[34].mxu1 }
 0x2f3   : > { %4105 = vrot.lane.b32.xlu0 %v15433_v41, %s10808_s24  ;;  %v12589_v41 = vadd.f32 %v9532_v22, %v12282_v27  ;;  %15845 = vst [vmem:[#allocation21_spill] sm:$0xff] %v12595_v52  ;;  %v12600_v46 = vpop.f32.mrb[35].mxu1 }
 0x2f4   : > { %15846 = vst [vmem:[#allocation22_spill] sm:$0xff] %v12600_v46  ;;  %v12613_v51 = vpop.f32.mrb[36].mxu1 }
 0x2f5   : > { %v9541_v59 = vpop.f32.mrb[32].mxu0  ;;  %15843 = vst [vmem:[#allocation19_spill] sm:$0xff] %v12589_v41  ;;  %v15443_v22 = vmax.f32 %v12589_v41, 0.0  ;;  %15849 = vst [vmem:[#allocation25_spill] sm:$0xff] %v12613_v51 }
 0x2f6   : > { %v12577_v13 = vadd.f32 %v9541_v59, %v12282_v27  ;;  %4127 = vrot.lane.b32.xlu1 %v15436_v17, %s10808_s24  ;;  %v3079_v5 = vpop.f32.mrb[33].mxu0 }
 0x2f7   : > { %4109 = vrot.lane.b32.xlu0 %v15437_v20, %s10808_s24  ;;  %v12593_v59 = vadd.f32 %v12282_v27, %v3079_v5  ;;  %v12607_v20 = vadd.f32 %v12282_v27, %v3049_v36 }
 0x2f8   : > { %15841 = vst [vmem:[#allocation17_spill] sm:$0xff] %v12577_v13  ;;  %v15441_v18 = vmax.f32 %v12577_v13, 0.0  ;;  %v12618_v13 = vpop.f32.mrb[37].mxu1 }
 0x2f9   : > { %15844 = vst [vmem:[#allocation20_spill] sm:$0xff] %v12593_v59  ;;  %v9544_v50 = vpop.f32.mrb[34].mxu0  ;;  %15847 = vst [vmem:[#allocation23_spill] sm:$0xff] %v12607_v20  ;;  %v15445_v5 = vmax.f32 %v12593_v59, 0.0  ;;  %v15447_v36 = vmax.f32 %v12607_v20, 0.0  ;;  %v12631_v41 = vpop.f32.mrb[38].mxu1 }
 0x2fa   : > { %4125 = vrot.lane.b32.xlu1 %v15439_v32, %s10808_s24  ;;  %v3089_v17 = vpop.f32.mrb[35].mxu0  ;;  %v12611_v52 = vadd.f32 %v9544_v50, %v12282_v27  ;;  %15850 = vst [vmem:[#allocation26_spill] sm:$0xff] %v12618_v13  ;;  %15853 = vst [vmem:[#allocation29_spill] sm:$0xff] %v12631_v41  ;;  %v12636_v59 = vpop.f32.mrb[39].mxu1 }
 0x2fb   : > { %4143 = vrot.lane.b32.xlu0 %v15441_v18, %s10808_s24  ;;  %v12625_v18 = vadd.f32 %v9535_v21, %v12282_v27  ;;  %v12629_v51 = vadd.f32 %v12282_v27, %v3089_v17  ;;  %15854 = vst [vmem:[#allocation30_spill] sm:$0xff] %v12636_v59  ;;  %v12649_v20 = vpop.f32.mrb[40].mxu1 }
 0x2fc   : > { %15848 = vst [vmem:[#allocation24_spill] sm:$0xff] %v12611_v52  ;;  %v15449_v50 = vmax.f32 %v12611_v52, 0.0  ;;  %15857 = vst [vmem:[#allocation33_spill] sm:$0xff] %v12649_v20  ;;  %v12654_v52 = vpop.f32.mrb[41].mxu1 }
 0x2fd   : > { %v9547_v43 = vpop.f32.mrb[36].mxu0  ;;  %15851 = vst [vmem:[#allocation27_spill] sm:$0xff] %v12625_v18  ;;  %15852 = vst [vmem:[#allocation28_spill] sm:$0xff] %v12629_v51  ;;  %v15451_v21 = vmax.f32 %v12625_v18, 0.0  ;;  %v15453_v17 = vmax.f32 %v12629_v51, 0.0  ;;  %v12667_v18 = vpop.f32.mrb[42].mxu1 }
 0x2fe   : > { %4131 = vrot.lane.b32.xlu1 %v15443_v22, %s10808_s24  ;;  %v3099_v32 = vpop.f32.mrb[37].mxu0  ;;  %v12647_v41 = vadd.f32 %v9547_v43, %v12282_v27  ;;  %15858 = vst [vmem:[#allocation34_spill] sm:$0xff] %v12654_v52  ;;  %15861 = vst [vmem:[#allocation41_spill] sm:$0xff] %v12667_v18  ;;  %v12672_v51 = vpop.f32.mrb[43].mxu1 }
 0x2ff   : > { %4141 = vrot.lane.b32.xlu0 %v15445_v5, %s10808_s24  ;;  %v12643_v5 = vadd.f32 %v12282_v27, %v3059_v34  ;;  %v12665_v20 = vadd.f32 %v12282_v27, %v3099_v32  ;;  %15862 = vst [vmem:[#allocation42_spill] sm:$0xff] %v12672_v51  ;;  %v12680_v32 = vadd.f32 %v12282_v27, %v12562_v2 }
 0x300   : > { %15856 = vst [vmem:[#allocation32_spill] sm:$0xff] %v12647_v41  ;;  %v15456_v43 = vmax.f32 %v12647_v41, 0.0 }
 0x301   : > { %v9550_v46 = vpop.f32.mrb[38].mxu0  ;;  %15855 = vst [vmem:[#allocation31_spill] sm:$0xff] %v12643_v5  ;;  %v15454_v34 = vmax.f32 %v12643_v5, 0.0  ;;  %15860 = vst [vmem:[#allocation40_spill] sm:$0xff] %v12665_v20  ;;  %v15462_v2 = vmax.f32 %v12680_v32, 0.0 }
 0x302   : > { %4129 = vrot.lane.b32.xlu1 %v15447_v36, %s10808_s24  ;;  %v3109_v22 = vpop.f32.mrb[39].mxu0  ;;  %15863 = vst [vmem:[#allocation43_spill] sm:$0xff] %v12680_v32  ;;  %v12684_v18 = vadd.f32 %v9550_v46, %v12282_v27 }
 0x303   : > { %4147 = vrot.lane.b32.xlu0 %v15449_v50, %s10808_s24  ;;  %v12661_v50 = vadd.f32 %v9538_v55, %v12282_v27  ;;  %v12701_v51 = vadd.f32 %v12282_v27, %v3109_v22 }
 0x304   : > { %15864 = vst [vmem:[#allocation44_spill] sm:$0xff] %v12684_v18  ;;  %v15464_v46 = vmax.f32 %v12684_v18, 0.0 }
 0x305   : > { %v9553_v13 = vpop.f32.mrb[40].mxu0  ;;  %15859 = vst [vmem:[#allocation39_spill] sm:$0xff] %v12661_v50  ;;  %v15458_v55 = vmax.f32 %v12661_v50, 0.0  ;;  %15867 = vst [vmem:[#allocation47_spill] sm:$0xff] %v12701_v51 }
 0x306   : > { %4135 = vrot.lane.b32.xlu1 %v15451_v21, %s10808_s24  ;;  %v3119_v36 = vpop.f32.mrb[41].mxu0  ;;  %v12719_v22 = vadd.f32 %v9553_v13, %v12282_v27 }
 0x307   : > { %4145 = vrot.lane.b32.xlu0 %v15453_v17, %s10808_s24  ;;  %v15459_v17 = vmax.f32 %v12665_v20, 0.0 }
 0x308   : > { %15870 = vst [vmem:[#allocation50_spill] sm:$0xff] %v12719_v22  ;;  %v15471_v13 = vmax.f32 %v12719_v22, 0.0 }
 0x309   : > { %v9556_v59 = vpop.f32.mrb[42].mxu0 }
 0x30a   : > { %4133 = vrot.lane.b32.xlu1 %v15454_v34, %s10808_s24  ;;  %v3129_v21 = vpop.f32.mrb[43].mxu0  ;;  %v12686_v34 = vpop.f32.mrb[44].mxu1  ;;  %v12755_v6 = vadd.f32 %v9556_v59, %v12282_v27 }
 0x30b   : > { %4151 = vrot.lane.b32.xlu0 %v15456_v43, %s10808_s24  ;;  %15865 = vst [vmem:[#allocation45_spill] sm:$0xff] %v12686_v34  ;;  %v12693_v43 = vpop.f32.mrb[45].mxu1 }
 0x30c   : > { %15866 = vst [vmem:[#allocation46_spill] sm:$0xff] %v12693_v43  ;;  %v12705_v5 = vpop.f32.mrb[46].mxu1  ;;  %15879 = vst [vmem:[#allocation59_spill] sm:$0xff] %v12755_v6  ;;  %v15479_v59 = vmax.f32 %v12755_v6, 0.0 }
 0x30d   : > { %v9559_v52 = vpop.f32.mrb[44].mxu0  ;;  %15868 = vst [vmem:[#allocation48_spill] sm:$0xff] %v12705_v5  ;;  %v12712_v43 = vpop.f32.mrb[47].mxu1 }
 0x30e   : > { %4139 = vrot.lane.b32.xlu1 %v15458_v55, %s10808_s24  ;;  %v12691_v41 = vpop.f32.mrb[45].mxu0  ;;  %15869 = vst [vmem:[#allocation49_spill] sm:$0xff] %v12712_v43  ;;  %v12721_v50 = vpop.f32.mrb[48].mxu1  ;;  %v12737_v43 = vadd.f32 %v12282_v27, %v3119_v36 }
 0x30f   : > { %4149 = vrot.lane.b32.xlu0 %v15459_v17, %s10808_s24  ;;  %v15466_v17 = vmax.f32 %v12701_v51, 0.0  ;;  %15871 = vst [vmem:[#allocation51_spill] sm:$0xff] %v12721_v50  ;;  %v12726_v32 = vpop.f32.mrb[49].mxu1 }
 0x310   : > { %15873 = vst [vmem:[#allocation53_spill] sm:$0xff] %v12726_v32  ;;  %15875 = vst [vmem:[#allocation55_spill] sm:$0xff] %v12737_v43  ;;  %v12742_v32 = vpop.f32.mrb[50].mxu1  ;;  %v15475_v36 = vmax.f32 %v12737_v43, 0.0 }
 0x311   : > { %v12703_v34 = vpop.f32.mrb[46].mxu0  ;;  %15876 = vst [vmem:[#allocation56_spill] sm:$0xff] %v12742_v32 }
 0x312   : > { %4137 = vrot.lane.b32.xlu1 %v15462_v2, %s10808_s24  ;;  %v12710_v55 = vpop.f32.mrb[47].mxu0 }
 0x313   : > { %4155 = vrot.lane.b32.xlu0 %v15464_v46, %s10808_s24 }
 0x315   : > { %v9565_v20 = vpop.f32.mrb[48].mxu0 }
 0x316   : > { %v12724_v5 = vadd.f32 %v9565_v20, %v12282_v27  ;;  %v3159_v2 = vpop.f32.mrb[49].mxu0 }
 0x317   : > { %4153 = vrot.lane.b32.xlu0 %v15466_v17, %s10808_s24  ;;  %v12733_v18 = vadd.f32 %v12282_v27, %v3159_v2  ;;  %v12747_v17 = vpop.f32.mrb[51].mxu1 }
 0x318   : > { %15872 = vst [vmem:[#allocation52_spill] sm:$0xff] %v12724_v5  ;;  %v15469_v46 = vmax.f32 %v12724_v5, 0.0  ;;  %15877 = vst [vmem:[#allocation57_spill] sm:$0xff] %v12747_v17  ;;  %v12760_v22 = vpop.f32.mrb[52].mxu1  ;;  %v12773_v5 = vadd.f32 %v12282_v27, %v3129_v21 }
 0x319   : > { %15874 = vst [vmem:[#allocation54_spill] sm:$0xff] %v12733_v18  ;;  %v9568_v50 = vpop.f32.mrb[50].mxu0  ;;  %v15473_v2 = vmax.f32 %v12733_v18, 0.0  ;;  %15880 = vst [vmem:[#allocation60_spill] sm:$0xff] %v12760_v22  ;;  %v12791_v18 = vadd.f32 %v9559_v52, %v12282_v27 }
 0x31a   : > { %4175 = vrot.lane.b32.xlu1 %v15469_v46, %s10808_s24  ;;  %v3169_v20 = vpop.f32.mrb[51].mxu0  ;;  %v12751_v51 = vadd.f32 %v9568_v50, %v12282_v27  ;;  %15883 = vst [vmem:[#allocation63_spill] sm:$0xff] %v12773_v5  ;;  %v15483_v21 = vmax.f32 %v12773_v5, 0.0 }
 0x31b   : > { %4159 = vrot.lane.b32.xlu0 %v15471_v13, %s10808_s24  ;;  %v12765_v13 = vpop.f32.mrb[53].mxu1  ;;  %v12769_v17 = vadd.f32 %v12282_v27, %v3169_v20  ;;  %15887 = vst [vmem:[#allocation67_spill] sm:$0xff] %v12791_v18  ;;  %v15486_v52 = vmax.f32 %v12791_v18, 0.0 }
 0x31c   : > { %15878 = vst [vmem:[#allocation58_spill] sm:$0xff] %v12751_v51  ;;  %15881 = vst [vmem:[#allocation61_spill] sm:$0xff] %v12765_v13  ;;  %v15477_v50 = vmax.f32 %v12751_v51, 0.0  ;;  %v12778_v43 = vpop.f32.mrb[54].mxu1 }
 0x31d   : > { %v9571_v46 = vpop.f32.mrb[52].mxu0  ;;  %15882 = vst [vmem:[#allocation62_spill] sm:$0xff] %v12769_v17  ;;  %15884 = vst [vmem:[#allocation64_spill] sm:$0xff] %v12778_v43  ;;  %v15481_v20 = vmax.f32 %v12769_v17, 0.0  ;;  %v12810_v17 = vadd.f32 %v12282_v27, %v12691_v41 }
 0x31e   : > { %4173 = vrot.lane.b32.xlu1 %v15473_v2, %s10808_s24  ;;  %v3179_v32 = vpop.f32.mrb[53].mxu0  ;;  %v12787_v13 = vadd.f32 %v9571_v46, %v12282_v27 }
 0x31f   : > { %4157 = vrot.lane.b32.xlu0 %v15475_v36, %s10808_s24  ;;  %v12783_v36 = vpop.f32.mrb[55].mxu1  ;;  %15891 = vst [vmem:[#allocation71_spill] sm:$0xff] %v12810_v17  ;;  %v15491_v41 = vmax.f32 %v12810_v17, 0.0 }
 0x320   : > { %15885 = vst [vmem:[#allocation65_spill] sm:$0xff] %v12783_v36  ;;  %15886 = vst [vmem:[#allocation66_spill] sm:$0xff] %v12787_v13  ;;  %v12796_v6 = vpop.f32.mrb[56].mxu1  ;;  %v15485_v46 = vmax.f32 %v12787_v13, 0.0  ;;  %v12805_v36 = vadd.f32 %v12282_v27, %v3179_v32  ;;  %v12829_v13 = vadd.f32 %v12703_v34, %v12282_v27 }
 0x321   : > { %v9574_v2 = vpop.f32.mrb[54].mxu0  ;;  %15888 = vst [vmem:[#allocation68_spill] sm:$0xff] %v12796_v6 }
 0x322   : > { %4179 = vrot.lane.b32.xlu1 %v15477_v50, %s10808_s24  ;;  %v3189_v22 = vpop.f32.mrb[55].mxu0  ;;  %15890 = vst [vmem:[#allocation70_spill] sm:$0xff] %v12805_v36  ;;  %v12824_v6 = vadd.f32 %v9574_v2, %v12282_v27  ;;  %15895 = vst [vmem:[#allocation75_spill] sm:$0xff] %v12829_v13  ;;  %v15497_v51 = vmax.f32 %v12829_v13, 0.0 }
 0x323   : > { %4163 = vrot.lane.b32.xlu0 %v15479_v59, %s10808_s24  ;;  %v12801_v59 = vpop.f32.mrb[57].mxu1 }
 0x324   : > { %15889 = vst [vmem:[#allocation69_spill] sm:$0xff] %v12801_v59  ;;  %v15489_v59 = vmax.f32 %v12805_v36, 0.0  ;;  %15894 = vst [vmem:[#allocation74_spill] sm:$0xff] %v12824_v6  ;;  %v15494_v34 = vmax.f32 %v12824_v6, 0.0 }
 0x325   : > { %v9577_v50 = vpop.f32.mrb[56].mxu0 }
 0x326   : > { %4177 = vrot.lane.b32.xlu1 %v15481_v20, %s10808_s24  ;;  %v3199_v43 = vpop.f32.mrb[57].mxu0 }
 0x327   : > { %4161 = vrot.lane.b32.xlu0 %v15483_v21, %s10808_s24  ;;  %v12815_v21 = vpop.f32.mrb[58].mxu1 }
 0x328   : > { %15892 = vst [vmem:[#allocation72_spill] sm:$0xff] %v12815_v21  ;;  %v12820_v32 = vpop.f32.mrb[59].mxu1 }
 0x329   : > { %v9580_v20 = vpop.f32.mrb[58].mxu0  ;;  %15893 = vst [vmem:[#allocation73_spill] sm:$0xff] %v12820_v32  ;;  %v12838_v18 = vpop.f32.mrb[60].mxu1  ;;  %v12847_v32 = vadd.f32 %v12282_v27, %v3189_v22 }
 0x32a   : > { %4183 = vrot.lane.b32.xlu1 %v15485_v46, %s10808_s24  ;;  %v3209_v5 = vpop.f32.mrb[59].mxu0  ;;  %15896 = vst [vmem:[#allocation76_spill] sm:$0xff] %v12838_v18  ;;  %v12843_v2 = vpop.f32.mrb[61].mxu1 }
 0x32b   : > { %4167 = vrot.lane.b32.xlu0 %v15486_v52, %s10808_s24  ;;  %15897 = vst [vmem:[#allocation77_spill] sm:$0xff] %v12843_v2  ;;  %15898 = vst [vmem:[#allocation78_spill] sm:$0xff] %v12847_v32  ;;  %v12863_v17 = vpop.f32.mrb[62].mxu1  ;;  %v12872_v2 = vadd.f32 %v9577_v50, %v12282_v27 }
 0x32c   : > { %15900 = vst [vmem:[#allocation80_spill] sm:$0xff] %v12863_v17  ;;  %v12868_v22 = vpop.f32.mrb[63].mxu1 }
 0x32d   : > { %v12831_v46 = vpop.permute.xlu0 %4077  ;;  %v9583_v21 = vpop.f32.mrb[60].mxu0  ;;  %15901 = vst [vmem:[#allocation81_spill] sm:$0xff] %v12868_v22  ;;  %v15502_v50 = vmax.f32 %v12872_v2, 0.0  ;;  %v12887_v22 = vadd.f32 %v12282_v27, %v3199_v43 }
 0x32e   : > { %4181 = vrot.lane.b32.xlu1 %v15489_v59, %s10808_s24  ;;  %v12836_v52 = vpop.f32.mrb[61].mxu0  ;;  %v12852_v59 = vadd.f32 %v12282_v27, %v12710_v55  ;;  %v15498_v55 = vmax.f32 %v12847_v32, 0.0 }
 0x32f   : > { %4165 = vrot.lane.b32.xlu0 %v15491_v41, %s10808_s24  ;;  %15902 = vst [vmem:[#allocation82_spill] sm:$0xff] %v12887_v22 }
 0x330   : > { %15899 = vst [vmem:[#allocation79_spill] sm:$0xff] %v12852_v59  ;;  %v15500_v11 = vmax.f32 %v12852_v59, 0.0 }
 0x331   : > { %v12854_v36 = vpop.permute.xlu0 %4083  ;;  %v12856_v18 = vpop.f32.mrb[62].mxu0 }
 0x332   : > { %4187 = vrot.lane.b32.xlu1 %v15494_v34, %s10808_s24  ;;  %v12861_v41 = vpop.f32.mrb[63].mxu0 }
 0x333   : > { %4171 = vrot.lane.b32.xlu0 %v15497_v51, %s10808_s24 }
 0x335   : > { %v12875_v0 = vpop.permute.xlu0 %4081  ;;  %v9589_v34 = vpop.f32.mrb[64].mxu0 }
 0x336   : > { %v10265_v6 = vadd.f32 %v9589_v34, %v12286_v28  ;;  %4185 = vrot.lane.b32.xlu1 %v15498_v55, %s10808_s24  ;;  %v3239_v13 = vpop.f32.mrb[65].mxu0 }
 0x337   : > { %v10266_v51 = vadd.f32 %v3239_v13, %v12288_v30  ;;  %4169 = vrot.lane.b32.xlu0 %v15500_v11, %s10808_s24  ;;  %v12905_v11 = vadd.f32 %v9580_v20, %v12282_v27 }
 0x338   : > { %v12890_v17 = vadd.f32 %v10265_v6, %v12282_v27  ;;  %v15505_v6 = vmax.f32 %v12887_v22, 0.0 }
 0x339   : > { %v12892_v28 = vpop.permute.xlu0 %4087  ;;  %v9592_v34 = vpop.f32.mrb[66].mxu0  ;;  %v12896_v32 = vadd.f32 %v10266_v51, %v12282_v27  ;;  %15905 = vst [vmem:[#allocation85_spill] sm:$0xff] %v12905_v11 }
 0x33a   : > { %15903 = vst [vmem:[#allocation83_spill] sm:$0xff] %v12890_v17  ;;  %v15503_v55 = vmax.f32 %v12890_v17, 0.0  ;;  %v10267_v30 = vadd.f32 %v9592_v34, %v12301_v35  ;;  %4191 = vrot.lane.b32.xlu1 %v15502_v50, %s10808_s24  ;;  %v3249_v13 = vpop.f32.mrb[67].mxu0 }
 0x33b   : > { %15904 = vst [vmem:[#allocation84_spill] sm:$0xff] %v12896_v32  ;;  %v10268_v43 = vadd.f32 %v3249_v13, %v12304_v38  ;;  %v15506_v35 = vmax.f32 %v12896_v32, 0.0  ;;  %v15508_v13 = vmax.f32 %v12905_v11, 0.0 }
 0x33c   : > { %4207 = vrot.lane.b32.xlu0 %v15503_v55, %s10808_s24  ;;  %v12914_v34 = vadd.f32 %v10267_v30, %v12282_v27  ;;  %v12923_v55 = vadd.f32 %v12282_v27, %v3209_v5 }
 0x33d   : > { %v12910_v51 = vpop.permute.xlu0 %4085  ;;  %v9595_v59 = vpop.f32.mrb[68].mxu0 }
 0x33e   : > { %15906 = vst [vmem:[#allocation86_spill] sm:$0xff] %v12914_v34  ;;  %v10269_v50 = vadd.f32 %v9595_v59, %v12320_v61  ;;  %4189 = vrot.lane.b32.xlu1 %v15505_v6, %s10808_s24  ;;  %v3259_v38 = vpop.f32.mrb[69].mxu0  ;;  %15907 = vst [vmem:[#allocation87_spill] sm:$0xff] %v12923_v55  ;;  %v15509_v61 = vmax.f32 %v12914_v34, 0.0  ;;  %v12932_v59 = vadd.f32 %v10268_v43, %v12282_v27 }
 0x33f   : > { %v10270_v20 = vadd.f32 %v3259_v38, %v12325_v1  ;;  %v15511_v38 = vmax.f32 %v12923_v55, 0.0  ;;  %v12962_v34 = vadd.f32 %v12282_v27, %v12836_v52 }
 0x340   : > { %4205 = vrot.lane.b32.xlu0 %v15506_v35, %s10808_s24  ;;  %15908 = vst [vmem:[#allocation88_spill] sm:$0xff] %v12932_v59  ;;  %v12941_v35 = vadd.f32 %v9583_v21, %v12282_v27 }
 0x341   : > { %v12928_v30 = vpop.permute.xlu0 %4091  ;;  %v9598_v17 = vpop.f32.mrb[70].mxu0  ;;  %15911 = vst [vmem:[#allocation91_spill] sm:$0xff] %v12962_v34 }
 0x342   : > { %v10271_v6 = vadd.f32 %v9598_v17, %v12333_v3  ;;  %4195 = vrot.lane.b32.xlu1 %v15508_v13, %s10808_s24  ;;  %v3269_v1 = vpop.f32.mrb[71].mxu0  ;;  %15909 = vst [vmem:[#allocation89_spill] sm:$0xff] %v12941_v35  ;;  %v15512_v3 = vmax.f32 %v12932_v59, 0.0  ;;  %v12950_v17 = vadd.f32 %v10269_v50, %v12282_v27  ;;  %v12983_v59 = vadd.f32 %v12856_v18, %v12282_v27 }
 0x343   : > { %v10272_v5 = vadd.f32 %v3269_v1, %v12339_v8  ;;  %v12957_v1 = vpop.permute.xlu1 %4079 }
 0x344   : > { %4211 = vrot.lane.b32.xlu0 %v15509_v61, %s10808_s24  ;;  %15910 = vst [vmem:[#allocation90_spill] sm:$0xff] %v12950_v17  ;;  %v15514_v61 = vmax.f32 %v12941_v35, 0.0 }
 0x345   : > { %v12946_v43 = vpop.permute.xlu0 %4089  ;;  %v9601_v32 = vpop.f32.mrb[72].mxu0 }
 0x346   : > { %v10273_v13 = vadd.f32 %v9601_v32, %v12346_v10  ;;  %4193 = vrot.lane.b32.xlu1 %v15511_v38, %s10808_s24  ;;  %v3279_v8 = vpop.f32.mrb[73].mxu0  ;;  %v12971_v38 = vadd.f32 %v10270_v20, %v12282_v27  ;;  %v15913_v20 = vmax.f32 %v12950_v17, 0.0  ;;  %v13008_v17 = vadd.f32 %v12282_v27, %v12861_v41 }
 0x347   : > { %v10274_v21 = vadd.f32 %v3279_v8, %v12352_v14 }
 0x348   : > { %4209 = vrot.lane.b32.xlu0 %v15512_v3, %s10808_s24  ;;  %15912 = vst [vmem:[#allocation92_spill] sm:$0xff] %v12971_v38  ;;  %v15517_v3 = vmax.f32 %v12962_v34, 0.0  ;;  %15915 = vst [vmem:[#allocation94_spill] sm:$0xff] %v13008_v17  ;;  %v15524_v11 = vmax.f32 %v13008_v17, 0.0 }
 0x349   : > { %v12967_v10 = vpop.permute.xlu0 %4095  ;;  %v9604_v32 = vpop.f32.mrb[74].mxu0 }
 0x34a   : > { %v10275_v14 = vadd.f32 %v9604_v32, %v12359_v16  ;;  %4199 = vrot.lane.b32.xlu1 %v15514_v61, %s10808_s24  ;;  %v3289_v52 = vpop.f32.mrb[75].mxu0 }
 0x34b   : > { %v12978_v8 = vadd.f32 %v3289_v52, %v12365_v44  ;;  %v12994_v44 = vadd.f32 %v10271_v6, %v12282_v27 }
 0x34c   : > { %v12985_v50 = vpop.permute.xlu1 %4111  ;;  %4215 = vrot.lane.b32.xlu0 %v15913_v20, %s10808_s24 }
 0x34d   : > { %v12990_v16 = vpop.permute.xlu0 %4093  ;;  %v9607_v32 = vpop.f32.mrb[76].mxu0  ;;  %15914 = vst [vmem:[#allocation93_spill] sm:$0xff] %v12994_v44  ;;  %v15523_v41 = vmax.f32 %v12994_v44, 0.0 }
 0x34e   : > { %v12997_v52 = vadd.f32 %v9607_v32, %v12372_v48  ;;  %4197 = vrot.lane.b32.xlu1 %v15517_v3, %s10808_s24  ;;  %v3299_v18 = vpop.f32.mrb[77].mxu0  ;;  %v15916_v48 = vmax.f32 %v12971_v38, 0.0  ;;  %v13025_v3 = vadd.f32 %v10272_v5, %v12282_v27 }
 0x34f   : > { %v13003_v35 = vadd.f32 %v3299_v18, %v12378_v45  ;;  %v4653_v45 = vld [vmem:[%s15342_s3] sm:$0xff]  ;;  %v4654_v18 = vld [vmem:[%s15342_s3 + $0x8] sm:$0xff] }
 0x350   : > { %v13010_v61 = vpop.permute.xlu1 %4115  ;;  %4213 = vrot.lane.b32.xlu0 %v15916_v48, %s10808_s24  ;;  %15917 = vst [vmem:[#allocation95_spill] sm:$0xff] %v13025_v3  ;;  %v15918_v48 = vmax.f32 %v12983_v59, 0.0  ;;  %v13033_v34 = vpack.c.bf16 %v4654_v18, %v4653_v45  ;;  %v13049_v45 = vadd.f32 %v10273_v13, %v12282_v27  ;;  %v13065_v13 = vadd.f32 %v10274_v21, %v12282_v27 }
 0x351   : > { %v13015_v6 = vpop.permute.xlu0 %4099  ;;  %v9610_v32 = vpop.f32.mrb[78].mxu0 }
 0x352   : > { %v13028_v20 = vadd.f32 %v9610_v32, %v12387_v54  ;;  %4203 = vrot.lane.b32.xlu1 %v15918_v48, %s10808_s24  ;;  %v3309_v38 = vpop.f32.mrb[79].mxu0  ;;  %10168 = vmatprep.subr.bf16.mxu1 %v13033_v34  ;;  %v15528_v32 = vmax.f32 %v13025_v3, 0.0  ;;  %15919 = vst [vmem:[#allocation96_spill] sm:$0xff] %v13049_v45  ;;  %15921 = vst [vmem:[#allocation98_spill] sm:$0xff] %v13065_v13  ;;  %v15532_v21 = vmax.f32 %v13065_v13, 0.0 }
 0x353   : > { %v13036_v55 = vadd.f32 %v3309_v38, %v12395_v56 }
 0x354   : > { %v13039_v22 = vpop.permute.xlu1 %4113  ;;  %4219 = vrot.lane.b32.xlu0 %v15523_v41, %s10808_s24 }
 0x355   : > { %v13045_v54 = vpop.permute.xlu0 %4097  ;;  %v9613_v5 = vpop.f32.mrb[80].mxu0 }
 0x356   : > { %v10281_v56 = vadd.f32 %v9613_v5, %v12404_v42  ;;  %4201 = vrot.lane.b32.xlu1 %v15524_v11, %s10808_s24  ;;  %v3319_v38 = vpop.f32.mrb[81].mxu0  ;;  %v15529_v11 = vmax.f32 %v13049_v45, 0.0 }
 0x357   : > { %v10282_v18 = vadd.f32 %v3319_v38, %v12410_v62 }
 0x358   : > { %v13057_v48 = vadd.f32 %v10281_v56, %v12282_v27  ;;  %v13059_v41 = vpop.permute.xlu1 %4119  ;;  %4217 = vrot.lane.b32.xlu0 %v15528_v32, %s10808_s24 }
 0x359   : > { %v13067_v42 = vpop.permute.xlu0 %4103  ;;  %v9616_v5 = vpop.f32.mrb[82].mxu0  ;;  %v13072_v62 = vadd.f32 %v10282_v18, %v12282_v27 }
 0x35a   : > { %15920 = vst [vmem:[#allocation97_spill] sm:$0xff] %v13057_v48  ;;  %v15533_v44 = vmax.f32 %v13057_v48, 0.0  ;;  %v10283_v56 = vadd.f32 %v9616_v5, %v12429_v25  ;;  %v3329_v38 = vpop.f32.mrb[83].mxu0  ;;  %v13088_v25 = vadd.f32 %v10275_v14, %v12282_v27  ;;  %v13106_v14 = vadd.f32 %v12978_v8, %v12282_v27 }
 0x35b   : > { %15922 = vst [vmem:[#allocation99_spill] sm:$0xff] %v13072_v62  ;;  %v10284_v17 = vadd.f32 %v3329_v38, %v12435_v37  ;;  %v15535_v37 = vmax.f32 %v13072_v62, 0.0 }
 0x35c   : > { %v13076_v3 = vpop.permute.xlu1 %4117  ;;  %4223 = vrot.lane.b32.xlu0 %v15529_v11, %s10808_s24  ;;  %4239 = vrot.lane.b32.xlu1 %v15533_v44, %s10808_s24  ;;  %15923 = vst [vmem:[#allocation100_spill] sm:$0xff] %v13088_v25  ;;  %v13092_v5 = vadd.f32 %v10283_v56, %v12282_v27  ;;  %15925 = vst [vmem:[#allocation102_spill] sm:$0xff] %v13106_v14 }
 0x35d   : > { %v13085_v32 = vpop.permute.xlu0 %4101  ;;  %v9619_v18 = vpop.f32.mrb[84].mxu0 }
 0x35e   : > { %15924 = vst [vmem:[#allocation101_spill] sm:$0xff] %v13092_v5  ;;  %v10285_v38 = vadd.f32 %v9619_v18, %v12452_v9  ;;  %v3339_v11 = vpop.f32.mrb[85].mxu0  ;;  %v15536_v18 = vmax.f32 %v13088_v25, 0.0 }
 0x35f   : > { %v10286_v45 = vadd.f32 %v3339_v11, %v12458_v53  ;;  %v15538_v11 = vmax.f32 %v13092_v5, 0.0  ;;  %v13113_v53 = vadd.f32 %v10284_v17, %v12282_v27  ;;  %v13129_v17 = vadd.f32 %v12997_v52, %v12282_v27 }
 0x360   : > { %v13096_v48 = vpop.permute.xlu1 %4123  ;;  %4221 = vrot.lane.b32.xlu0 %v15532_v21, %s10808_s24  ;;  %4237 = vrot.lane.b32.xlu1 %v15535_v37, %s10808_s24  ;;  %v15927_v52 = vmax.f32 %v12296_v33, 0.0  ;;  %v15930_v33 = vmax.f32 %v12557_v15, 0.0 }
 0x361   : > { %v13108_v56 = vpop.permute.xlu0 %4107  ;;  %v9622_v9 = vpop.f32.mrb[86].mxu0  ;;  %15926 = vst [vmem:[#allocation103_spill] sm:$0xff] %v13113_v53 }
 0x362   : > { %v10287_v21 = vadd.f32 %v9622_v9, %v12471_v47  ;;  %v3349_v44 = vpop.f32.mrb[87].mxu0  ;;  %v13136_v9 = vadd.f32 %v10285_v38, %v12282_v27  ;;  %v4461_v38 = vmax.f32 %v15927_v52, %v12831_v46  ;;  %v15931_v52 = vmax.f32 %v12291_v31, 0.0 }
 0x363   : > { %v13117_v13 = vadd.f32 %v3349_v44, %v12477_v26  ;;  %v15541_v26 = vmax.f32 %v13106_v14, 0.0  ;;  %v15543_v44 = vmax.f32 %v13113_v53, 0.0  ;;  %v15929_v53 = vmax.f32 %v12450_v7, 0.0 }
 0x364   : > { %v13119_v37 = vpop.permute.xlu1 %4121  ;;  %4227 = vrot.lane.b32.xlu0 %v15536_v18, %s10808_s24  ;;  %4243 = vrot.lane.b32.xlu1 %v15538_v11, %s10808_s24  ;;  %v15555_v62 = vmax.f32 %v13136_v9, 0.0  ;;  %v15932_v7 = vmax.f32 %v12323_v63, 0.0 }
 0x365   : > { %v13131_v8 = vpop.permute.xlu0 %4105  ;;  %v9625_v47 = vpop.f32.mrb[88].mxu0 }
 0x366   : > { %v13139_v18 = vadd.f32 %v9625_v47, %v12489_v39  ;;  %v3359_v25 = vpop.f32.mrb[89].mxu0  ;;  %v15928_v39 = vmax.f32 %v12413_v19, 0.0  ;;  %v4463_v15 = vmax.f32 %v15932_v7, %v12875_v0 }
 0x367   : > { %v13142_v11 = vadd.f32 %v3359_v25, %v12496_v60  ;;  %v13161_v25 = vadd.f32 %v13003_v35, %v12282_v27  ;;  %v4462_v35 = vmax.f32 %v15931_v52, %v12957_v1  ;;  %v15936_v1 = vmax.f32 %v12438_v58, 0.0 }
 0x368   : > { %v13144_v5 = vpop.permute.xlu1 %4127  ;;  %4225 = vrot.lane.b32.xlu0 %v15541_v26, %s10808_s24  ;;  %4241 = vrot.lane.b32.xlu1 %v15543_v44, %s10808_s24  ;;  %v4478_v47 = vmax.f32 %v15928_v39, %v12985_v50  ;;  %v4479_v44 = vmax.f32 %v15929_v53, %v13039_v22  ;;  %v13176_v39 = vadd.f32 %v10286_v45, %v12282_v27  ;;  %v15939_v58 = vmax.f32 %v12307_v57, 0.0 }
 0x369   : > { %v4110_v14 = vpop.permute.xlu0 %4109  ;;  %v9628_v26 = vpop.f32.mrb[90].mxu0  ;;  %v4480_v63 = vmax.f32 %v15936_v1, %v13010_v61  ;;  %v13202_v53 = vadd.f32 %v13028_v20, %v12282_v27  ;;  %v13221_v20 = vld [vmem:[%s15341_s2] ss:$0 sm:$0xff]  ;;  %v15940_v57 = vmax.f32 %v12350_v12, 0.0 }
 0x36a   : > { %v4477_v46 = vmax.f32 %v15930_v33, %v4110_v14  ;;  %v13170_v19 = vadd.f32 %v9628_v26, %v12508_v4  ;;  %v3369_v50 = vpop.f32.mrb[91].mxu0  ;;  %v15934_v14 = vmax.f32 %v13129_v17, 0.0  ;;  %v13192_v31 = vmax.f32 %v4462_v35, %v4478_v47  ;;  %v15947_v1 = vld [vmem:[#allocation35_spill] sm:$0xff] }
 0x36b   : > { %v13179_v60 = vadd.f32 %v3369_v50, %v12521_v24  ;;  %v15548_v24 = vmax.f32 %v13161_v25, 0.0  ;;  %v13204_v26 = vmax.f32 %v4463_v15, %v4479_v44  ;;  %v4464_v61 = vmax.f32 %v15939_v58, %v12854_v36 }
 0x36c   : > { %v13184_v22 = vmax.f32 %v4461_v38, %v4477_v46  ;;  %v4126_v4 = vpop.permute.xlu1 %4125  ;;  %4231 = vrot.lane.b32.xlu0 %v15934_v14, %s10808_s24  ;;  %4247 = vrot.lane.b32.xlu1 %v15555_v62, %s10808_s24  ;;  %15935 = vst [vmem:[#allocation105_spill] sm:$0xff] %v13192_v31  ;;  %v15938_v38 = vmax.f32 %v12487_v49, 0.0  ;;  %v15552_v27 = vmax.f32 %v13176_v39, 0.0  ;;  %v13224_v49 = vadd.f32 %v13221_v20, %v10287_v21  ;;  %v15946_v14 = vld [vmem:[#allocation13_spill] sm:$0xff] }
 0x36d   : > { %v13198_v0 = vpop.permute.xlu0 %4143  ;;  %v9631_v45 = vpop.f32.mrb[92].mxu0  ;;  %15937 = vst [vmem:[#allocation106_spill] sm:$0xff] %v13204_v26  ;;  %v4465_v36 = vmax.f32 %v15940_v57, %v12910_v51  ;;  %v13241_v21 = vmax.f32 %v4464_v61, %v4480_v63  ;;  %v15942_v44 = vmax.f32 %v12469_v23, 0.0  ;;  %v15545_v52 = vmax.f32 %v13202_v53, 0.0  ;;  %v15953_v57 = vld [vmem:[#allocation8_spill] sm:$0xff] }
 0x36e   : > { %15933 = vst [vmem:[#allocation104_spill] sm:$0xff] %v13184_v22  ;;  %v4481_v47 = vmax.f32 %v15938_v38, %v13076_v3  ;;  %v13210_v33 = vadd.f32 %v9631_v45, %v12533_v40  ;;  %v3379_v46 = vpop.f32.mrb[93].mxu0  ;;  %9691 = vmatprep.mubr.msk.f32.mxu1 %vm4662_vm2, %v13184_v22  ;;  %v15948_v63 = vmax.f32 %v15947_v1, 0.0  ;;  %v15551_v38 = vmax.f32 %v13224_v49, 0.0 }
 0x36f   : > { %v13227_v40 = vadd.f32 %v3379_v46, %v12540_v29  ;;  %9692 = vmatmul.mubr.msk.f32.vlgmr.msra.gmra.mrb[64].mxu1 %vm4662_vm2, %v13192_v31  ;;  %15941 = vst [vmem:[#allocation107_spill] sm:$0xff] %v13241_v21  ;;  %v13245_v29 = vadd.f32 %v13221_v20, %v13036_v55  ;;  %v4482_v12 = vmax.f32 %v15942_v44, %v13059_v41  ;;  %v15944_v55 = vld [vmem:[#allocation10_spill] sm:$0xff] }
 0x370   : > { %9694 = vmatprep.mubr.msk.f32.mxu1 %vm4662_vm2, %v13204_v26  ;;  %v13236_v3 = vpop.permute.xlu1 %4131  ;;  %4229 = vrot.lane.b32.xlu0 %v15548_v24, %s10808_s24  ;;  %v13257_v35 = vmax.f32 %v4465_v36, %v4481_v47  ;;  %v15945_v7 = vmax.f32 %v15944_v55, 0.0  ;;  %v4466_v45 = vmax.f32 %v15948_v63, %v12892_v28  ;;  %v15949_v47 = vld [vmem:[#allocation14_spill] sm:$0xff]  ;;  %v15954_v36 = vmax.f32 %v15953_v57, 0.0  ;;  %v15982_v24 = vld [vmem:[#allocation25_spill] sm:$0xff] }
 0x371   : > { %4245 = vrot.lane.b32.xlu1 %v15552_v27, %s10808_s24  ;;  %v13253_v51 = vpop.permute.xlu0 %4141  ;;  %v9634_v50 = vpop.f32.mrb[94].mxu0  ;;  %10170 = vmatpush3.bf16.msra.mxu1 %v13033_v34  ;;  %v13271_v34 = vadd.f32 %v13221_v20, %v13117_v13  ;;  %v15546_v55 = vmax.f32 %v13245_v29, 0.0  ;;  %v13308_v57 = vadd.f32 %v13221_v20, %v13139_v18  ;;  %v15964_v18 = vld [vmem:[#allocation38_spill] sm:$0xff] }
 0x372   : > { %15943 = vst [vmem:[#allocation108_spill] sm:$0xff] %v13257_v35  ;;  %v4483_v15 = vmax.f32 %v15945_v7, %v13119_v37  ;;  %v13263_v23 = vadd.f32 %v9634_v50, %v15946_v14  ;;  %v3389_v41 = vpop.f32.mrb[95].mxu0  ;;  %v15950_v37 = vld [vmem:[#allocation37_spill] sm:$0xff]  ;;  %v13286_v13 = vmax.f32 %v4466_v45, %v4482_v12  ;;  %v4484_v44 = vmax.f32 %v15954_v36, %v13096_v48  ;;  %v15956_v14 = vld [vmem:[#allocation15_spill] sm:$0xff]  ;;  %v15958_v12 = vld [vmem:[#allocation16_spill] sm:$0xff] }
 0x373   : > { %v13274_v46 = vadd.f32 %v3389_v41, %v15949_v47  ;;  %9695 = vmatmul.mubr.msk.f32.gmra.mrb[66].mxu1 %vm4662_vm2, %v13241_v21  ;;  %v15951_v58 = vmax.f32 %v15950_v37, 0.0  ;;  %v15957_v41 = vmax.f32 %v15956_v14, 0.0  ;;  %v15959_v47 = vld [vmem:[#allocation36_spill] sm:$0xff]  ;;  %v15961_v36 = vld [vmem:[#allocation18_spill] sm:$0xff]  ;;  %v15965_v14 = vmax.f32 %v15964_v18, 0.0 }
 0x374   : > { %9697 = vmatprep.mubr.msk.f32.mxu1 %vm4662_vm2, %v13257_v35  ;;  %v4130_v28 = vpop.permute.xlu1 %4129  ;;  %4235 = vrot.lane.b32.xlu0 %v15545_v52, %s10808_s24  ;;  %15952 = vst [vmem:[#allocation10_spill] sm:$0xff] %v13286_v13  ;;  %v15960_v48 = vmax.f32 %v15959_v47, 0.0 }
 0x375   : > { %v4467_v61 = vmax.f32 %v15951_v58, %v12946_v43  ;;  %4251 = vrot.lane.b32.xlu1 %v15551_v38, %s10808_s24  ;;  %v13294_v50 = vpop.permute.xlu0 %4147  ;;  %v9637_v43 = vpop.f32.mrb[96].mxu0  ;;  %v4485_v1 = vmax.f32 %v15957_v41, %v4126_v4  ;;  %v15550_v58 = vmax.f32 %v13271_v34, 0.0  ;;  %v15962_v4 = vld [vmem:[#allocation3_spill] sm:$0xff]  ;;  %v4470_v41 = vmax.f32 %v15965_v14, %v12967_v10  ;;  %v15973_v14 = vld [vmem:[#allocation5_spill] sm:$0xff]  ;;  %v15985_v38 = vld [vmem:[#allocation26_spill] sm:$0xff] }
 0x376   : > { %v10297_v63 = vadd.f32 %v9637_v43, %v15958_v12  ;;  %v3399_v45 = vpop.f32.mrb[97].mxu0  ;;  %v4468_v37 = vmax.f32 %v15960_v48, %v12928_v30 }
 0x377   : > { %v13297_v7 = vmax.f32 %v4467_v61, %v4483_v15  ;;  %v10298_v52 = vadd.f32 %v3399_v45, %v15961_v36  ;;  %9698 = vmatmul.mubr.msk.f32.gmra.mrb[68].mxu1 %vm4662_vm2, %v13286_v13  ;;  %v15963_v15 = vmax.f32 %v15962_v4, 0.0  ;;  %v15967_v45 = vld [vmem:[#allocation12_spill] sm:$0xff] }
 0x378   : > { %v13317_v43 = vadd.f32 %v13221_v20, %v10297_v63  ;;  %v4136_v30 = vpop.permute.xlu1 %4135  ;;  %4233 = vrot.lane.b32.xlu0 %v15546_v55, %s10808_s24  ;;  %v13327_v12 = vmax.f32 %v4468_v37, %v4484_v44  ;;  %v15969_v63 = vld [vmem:[#allocation23_spill] sm:$0xff]  ;;  %v15972_v37 = vld [vmem:[#allocation21_spill] sm:$0xff] }
 0x379   : > { %15955 = vst [vmem:[#allocation13_spill] sm:$0xff] %v13297_v7  ;;  %v4469_v61 = vmax.f32 %v15963_v15, %v12990_v16  ;;  %9700 = vmatprep.mubr.msk.f32.mxu1 %vm4662_vm2, %v13297_v7  ;;  %v15968_v16 = vmax.f32 %v15967_v45, 0.0  ;;  %v15970_v48 = vmax.f32 %v15969_v63, 0.0  ;;  %4249 = vrot.lane.b32.xlu1 %v15550_v58, %s10808_s24  ;;  %v13337_v4 = vpop.permute.xlu0 %4145  ;;  %v9640_v15 = vpop.f32.mrb[98].mxu0  ;;  %v13343_v44 = vadd.f32 %v13221_v20, %v10298_v52 }
 0x37a   : > { %15966 = vst [vmem:[#allocation35_spill] sm:$0xff] %v13327_v12  ;;  %v15547_v10 = vmax.f32 %v13317_v43, 0.0  ;;  %v10299_v18 = vadd.f32 %v9640_v15, %v15972_v37  ;;  %v13352_v63 = vadd.f32 %v13221_v20, %v13142_v11  ;;  %v13387_v58 = vadd.f32 %v13221_v20, %v13170_v19  ;;  %v15989_v19 = vld [vmem:[#allocation27_spill] sm:$0xff] }
 0x37b   : > { %v4486_v47 = vmax.f32 %v15968_v16, %v13144_v5  ;;  %v4487_v36 = vmax.f32 %v15970_v48, %v4130_v28  ;;  %v13339_v55 = vmax.f32 %v4469_v61, %v4485_v1  ;;  %v3409_v5 = vpop.f32.mrb[99].mxu0  ;;  %v15974_v28 = vmax.f32 %v15973_v14, 0.0  ;;  %v15975_v1 = vld [vmem:[#allocation22_spill] sm:$0xff]  ;;  %9701 = vmatmul.mubr.msk.f32.gmra.mrb[70].mxu1 %vm4662_vm2, %v13327_v12  ;;  %v15977_v48 = vld [vmem:[#allocation19_spill] sm:$0xff] }
 0x37c   : > { %v15549_v16 = vmax.f32 %v13308_v57, 0.0  ;;  %v10300_v61 = vadd.f32 %v3409_v5, %v15975_v1  ;;  %v4134_v52 = vpop.permute.xlu1 %4133  ;;  %4271 = vrot.lane.b32.xlu0 %v15547_v10, %s10808_s24  ;;  %v15978_v15 = vmax.f32 %v15977_v48, 0.0  ;;  %v13376_v1 = vadd.f32 %v13221_v20, %v10299_v18  ;;  %v15986_v18 = vld [vmem:[#allocation7_spill] sm:$0xff]  ;;  %v16022_v12 = vld [vmem:[#allocation54_spill] sm:$0xff] }
 0x37d   : > { %15971 = vst [vmem:[#allocation14_spill] sm:$0xff] %v13339_v55  ;;  %v4471_v45 = vmax.f32 %v15974_v28, %v13045_v54  ;;  %9703 = vmatprep.mubr.msk.f32.mxu1 %vm4662_vm2, %v13339_v55  ;;  %v13362_v54 = vmax.f32 %v4470_v41, %v4486_v47  ;;  %v13372_v5 = vpop.permute.xlu0 %4151  ;;  %v9643_v14 = vpop.f32.mrb[100].mxu0  ;;  %v15553_v28 = vmax.f32 %v13343_v44, 0.0  ;;  %v15980_v41 = vld [vmem:[#allocation31_spill] sm:$0xff]  ;;  %v16023_v7 = vmax.f32 %v16022_v12, 0.0  ;;  %v4655_v12 = vld [vmem:[%s15342_s3 + $0x10] sm:$0xff] }
 0x37e   : > { %v4488_v11 = vmax.f32 %v15978_v15, %v13236_v3  ;;  %4255 = vrot.lane.b32.xlu1 %v15549_v16, %s10808_s24  ;;  %v15981_v47 = vmax.f32 %v15980_v41, 0.0  ;;  %v10301_v48 = vadd.f32 %v9643_v14, %v15982_v24  ;;  %v3419_v3 = vpop.f32.mrb[101].mxu0  ;;  %v15554_v16 = vmax.f32 %v13352_v63, 0.0 }
 0x37f   : > { %15976 = vst [vmem:[#allocation37_spill] sm:$0xff] %v13362_v54  ;;  %v13367_v37 = vmax.f32 %v4471_v45, %v4487_v36  ;;  %v15983_v36 = vld [vmem:[#allocation4_spill] sm:$0xff]  ;;  %v10302_v27 = vadd.f32 %v3419_v3, %v15985_v38  ;;  %9704 = vmatmul.mubr.msk.f32.gmra.mrb[72].mxu1 %vm4662_vm2, %v13362_v54  ;;  %v15990_v41 = vmax.f32 %v15989_v19, 0.0  ;;  %v15558_v3 = vmax.f32 %v13376_v1, 0.0 }
 0x380   : > { %v4489_v10 = vmax.f32 %v15981_v47, %v4134_v52  ;;  %v15984_v45 = vmax.f32 %v15983_v36, 0.0  ;;  %v15987_v52 = vmax.f32 %v15986_v18, 0.0  ;;  %v4140_v14 = vpop.permute.xlu1 %4139  ;;  %4269 = vrot.lane.b32.xlu0 %v15553_v28, %s10808_s24  ;;  %v13411_v36 = vadd.f32 %v13221_v20, %v10300_v61  ;;  %v15992_v18 = vld [vmem:[#allocation29_spill] sm:$0xff] }
 0x381   : > { %15979 = vst [vmem:[#allocation8_spill] sm:$0xff] %v13367_v37  ;;  %9706 = vmatprep.mubr.msk.f32.mxu1 %vm4662_vm2, %v13367_v37  ;;  %v4490_v38 = vmax.f32 %v15990_v41, %v4136_v30  ;;  %v13407_v47 = vpop.permute.xlu0 %4149  ;;  %v15563_v41 = vmax.f32 %v13387_v58, 0.0  ;;  %v13422_v28 = vadd.f32 %v13221_v20, %v13179_v60  ;;  %v15999_v60 = vld [vmem:[#allocation39_spill] sm:$0xff] }
 0x382   : > { %v4472_v15 = vmax.f32 %v15984_v45, %v13015_v6  ;;  %v4473_v24 = vmax.f32 %v15987_v52, %v13085_v32  ;;  %4253 = vrot.lane.b32.xlu1 %v15554_v16, %s10808_s24  ;;  %v9646_v32 = vpop.f32.mrb[102].mxu0  ;;  %v15993_v52 = vld [vmem:[#allocation6_spill] sm:$0xff] }
 0x383   : > { %v15994_v30 = vmax.f32 %v15993_v52, 0.0  ;;  %v15995_v16 = vld [vmem:[#allocation30_spill] sm:$0xff] }
 0x384   : > { %v13400_v6 = vmax.f32 %v4472_v15, %v4488_v11  ;;  %v13413_v45 = vmax.f32 %v4473_v24, %v4489_v10  ;;  %v10303_v11 = vadd.f32 %v9646_v32, %v15992_v18  ;;  %v3429_v15 = vpop.f32.mrb[103].mxu0  ;;  %v4138_v10 = vpop.permute.xlu1 %4137  ;;  %4275 = vrot.lane.b32.xlu0 %v15558_v3, %s10808_s24  ;;  %v16000_v18 = vmax.f32 %v15999_v60, 0.0  ;;  %v16003_v3 = vld [vmem:[#allocation9_spill] sm:$0xff] }
 0x385   : > { %v4474_v19 = vmax.f32 %v15994_v30, %v13067_v42  ;;  %v10304_v62 = vadd.f32 %v3429_v15, %v15995_v16  ;;  %v15996_v42 = vld [vmem:[#allocation11_spill] sm:$0xff]  ;;  %v16004_v37 = vmax.f32 %v16003_v3, 0.0  ;;  %v13457_v60 = vadd.f32 %v13221_v20, %v13210_v33  ;;  %v16010_v3 = vld [vmem:[#allocation41_spill] sm:$0xff] }
 0x386   : > { %15988 = vst [vmem:[#allocation15_spill] sm:$0xff] %v13400_v6  ;;  %15991 = vst [vmem:[#allocation16_spill] sm:$0xff] %v13413_v45  ;;  %9707 = vmatmul.mubr.msk.f32.gmra.mrb[74].mxu1 %vm4662_vm2, %v13400_v6  ;;  %v15997_v61 = vmax.f32 %v15996_v42, 0.0  ;;  %v4492_v16 = vmax.f32 %v16000_v18, %v4140_v14  ;;  %v16001_v15 = vld [vmem:[#allocation43_spill] sm:$0xff]  ;;  %4259 = vrot.lane.b32.xlu1 %v15563_v41, %s10808_s24  ;;  %v9649_v6 = vpop.f32.mrb[104].mxu0  ;;  %v16006_v14 = vld [vmem:[#allocation33_spill] sm:$0xff] }
 0x387   : > { %9709 = vmatprep.mubr.msk.f32.mxu1 %vm4662_vm2, %v13413_v45  ;;  %v13435_v32 = vmax.f32 %v4474_v19, %v4490_v38  ;;  %v16002_v52 = vmax.f32 %v16001_v15, 0.0  ;;  %v13444_v45 = vpop.permute.xlu0 %4155  ;;  %v4476_v42 = vmax.f32 %v16004_v37, %v13108_v56  ;;  %v13451_v38 = vadd.f32 %v13221_v20, %v10301_v48  ;;  %v16008_v15 = vld [vmem:[#allocation34_spill] sm:$0xff] }
 0x388   : > { %v4475_v24 = vmax.f32 %v15997_v61, %v13131_v8  ;;  %v15560_v8 = vmax.f32 %v13411_v36, 0.0  ;;  %v10305_v19 = vadd.f32 %v9649_v6, %v16006_v14  ;;  %v3439_v61 = vpop.f32.mrb[105].mxu0  ;;  %v13480_v6 = vadd.f32 %v13221_v20, %v10302_v27  ;;  %v16011_v14 = vld [vmem:[#allocation42_spill] sm:$0xff] }
 0x389   : > { %15998 = vst [vmem:[#allocation36_spill] sm:$0xff] %v13435_v32  ;;  %v4491_v30 = vmax.f32 %v16002_v52, %v4138_v10  ;;  %16005 = vst [vmem:[#allocation18_spill] sm:$0xff] %v13451_v38  ;;  %v15561_v10 = vmax.f32 %v13422_v28, 0.0  ;;  %v13462_v52 = vadd.f32 %v3439_v61, %v16008_v15  ;;  %v13469_v56 = vmax.f32 %v4476_v42, %v4492_v16  ;;  %v9652_v37 = vpop.f32.mrb[106].mxu0  ;;  %v16014_v41 = vld [vmem:[#allocation46_spill] sm:$0xff] }
 0x38a   : > { %9710 = vmatmul.mubr.msk.f32.gmra.mrb[76].mxu1 %vm4662_vm2, %v13435_v32  ;;  %4273 = vrot.lane.b32.xlu0 %v15560_v8, %s10808_s24  ;;  %v15562_v48 = vmax.f32 %v13451_v38, 0.0  ;;  %v3449_v16 = vpop.f32.mrb[107].mxu0  ;;  %v13488_v42 = vadd.f32 %v13221_v20, %v13227_v40 }
 0x38b   : > { %v13459_v18 = vmax.f32 %v4475_v24, %v4491_v30  ;;  %16009 = vst [vmem:[#allocation38_spill] sm:$0xff] %v13469_v56  ;;  %4257 = vrot.lane.b32.xlu1 %v15561_v10, %s10808_s24  ;;  %v13476_v33 = vpop.permute.xlu0 %4153  ;;  %v13483_v24 = vadd.f32 %v9652_v37, %v16010_v3  ;;  %v15564_v30 = vmax.f32 %v13457_v60, 0.0  ;;  %v13491_v61 = vadd.f32 %v3449_v16, %v16011_v14  ;;  %v16013_v16 = vld [vmem:[#allocation45_spill] sm:$0xff]  ;;  %v16020_v10 = vld [vmem:[#allocation20_spill] sm:$0xff] }
 0x38c   : > { %v4176_v15 = vpop.permute.xlu1 %4175  ;;  %v13505_v3 = vadd.f32 %v13221_v20, %v10303_v11  ;;  %v16017_v11 = vmax.f32 %v13480_v6, 0.0  ;;  %v16021_v55 = vmax.f32 %v16020_v10, 0.0  ;;  %v4656_v10 = vld [vmem:[%s15342_s3 + $0x18] sm:$0xff] }
 0x38d   : > { %16007 = vst [vmem:[#allocation3_spill] sm:$0xff] %v13459_v18  ;;  %9712 = vmatprep.mubr.msk.f32.mxu1 %vm4662_vm2, %v13459_v18  ;;  %v9655_v37 = vpop.f32.mrb[108].mxu0 }
 0x38e   : > { %9713 = vmatmul.mubr.msk.f32.gmra.mrb[78].mxu1 %vm4662_vm2, %v13469_v56  ;;  %4279 = vrot.lane.b32.xlu0 %v15562_v48, %s10808_s24  ;;  %16012 = vst [vmem:[#allocation12_spill] sm:$0xff] %v13505_v3  ;;  %v13508_v14 = vadd.f32 %v9655_v37, %v16013_v16  ;;  %v3459_v8 = vpop.f32.mrb[109].mxu0  ;;  %v13513_v48 = vadd.f32 %v13221_v20, %v13263_v23  ;;  %v16015_v56 = vld [vmem:[#allocation52_spill] sm:$0xff]  ;;  %v16018_v37 = vld [vmem:[#allocation17_spill] sm:$0xff] }
 0x38f   : > { %4263 = vrot.lane.b32.xlu1 %v15564_v30, %s10808_s24  ;;  %v13501_v27 = vpop.permute.xlu0 %4159  ;;  %v13516_v30 = vadd.f32 %v3459_v8, %v16014_v41  ;;  %v16016_v18 = vmax.f32 %v16015_v56, 0.0  ;;  %v16019_v16 = vmax.f32 %v16018_v37, 0.0  ;;  %v4493_v23 = vmax.f32 %v16021_v55, %v13253_v51  ;;  %v16026_v51 = vld [vmem:[#allocation48_spill] sm:$0xff]  ;;  %v16028_v37 = vld [vmem:[#allocation49_spill] sm:$0xff] }
 0x390   : > { %v4174_v40 = vpop.permute.xlu1 %4173  ;;  %v16024_v8 = vmax.f32 %v13488_v42, 0.0 }
 0x391   : > { %v4510_v32 = vmax.f32 %v16016_v18, %v4176_v15  ;;  %v4494_v54 = vmax.f32 %v16019_v16, %v13198_v0  ;;  %v4509_v41 = vmax.f32 %v16023_v7, %v4174_v40  ;;  %v9658_v56 = vpop.f32.mrb[110].mxu0  ;;  %v13538_v15 = vadd.f32 %v13221_v20, %v13274_v46 }
 0x392   : > { %4277 = vrot.lane.b32.xlu0 %v16017_v11, %s10808_s24  ;;  %v15573_v0 = vmax.f32 %v13505_v3, 0.0  ;;  %v13542_v11 = vadd.f32 %v13221_v20, %v10304_v62  ;;  %v13545_v55 = vadd.f32 %v9658_v56, %v16026_v51  ;;  %v3469_v7 = vpop.f32.mrb[111].mxu0  ;;  %v15574_v46 = vmax.f32 %v13513_v48, 0.0 }
 0x393   : > { %4261 = vrot.lane.b32.xlu1 %v16024_v8, %s10808_s24  ;;  %v13534_v18 = vpop.permute.xlu0 %4157  ;;  %v13554_v40 = vmax.f32 %v4493_v23, %v4509_v41  ;;  %v13557_v16 = vadd.f32 %v3469_v7, %v16028_v37  ;;  %v10171_v62 = vpack.c.bf16 %v4656_v10, %v4655_v12  ;;  %v13559_v8 = vmax.f32 %v4494_v54, %v4510_v32  ;;  %v16031_v32 = vld [vmem:[#allocation51_spill] sm:$0xff]  ;;  %v16032_v10 = vld [vmem:[#allocation53_spill] sm:$0xff]  ;;  %v16038_v12 = vld [vmem:[#allocation28_spill] sm:$0xff] }
 0x394   : > { %16025 = vst [vmem:[#allocation23_spill] sm:$0xff] %v13542_v11  ;;  %v4180_v56 = vpop.permute.xlu1 %4179  ;;  %v13573_v54 = vadd.f32 %v13221_v20, %v10305_v19  ;;  %v16039_v21 = vmax.f32 %v16038_v12, 0.0 }
 0x395   : > { %16027 = vst [vmem:[#allocation21_spill] sm:$0xff] %v13554_v40  ;;  %16029 = vst [vmem:[#allocation5_spill] sm:$0xff] %v13559_v8  ;;  %v9661_v13 = vpop.f32.mrb[112].mxu0  ;;  %9715 = vmatprep.mubr.msk.f32.mxu1 %vm4662_vm2, %v13554_v40  ;;  %10172 = vmatprep.subr.bf16.mxu1 %v10171_v62 }
 0x396   : > { %4283 = vrot.lane.b32.xlu0 %v15573_v0, %s10808_s24  ;;  %16030 = vst [vmem:[#allocation22_spill] sm:$0xff] %v13573_v54  ;;  %v10313_v41 = vadd.f32 %v9661_v13, %v16031_v32  ;;  %v3479_v7 = vpop.f32.mrb[113].mxu0  ;;  %9716 = vmatmul.mubr.msk.f32.gmra.mrb[80].mxu1 %vm4662_vm2, %v13559_v8  ;;  %v16033_v0 = vld [vmem:[#allocation58_spill] sm:$0xff]  ;;  %v16035_v13 = vmax.f32 %v13542_v11, 0.0  ;;  %v16036_v32 = vld [vmem:[#allocation24_spill] sm:$0xff] }
 0x397   : > { %4267 = vrot.lane.b32.xlu1 %v15574_v46, %s10808_s24  ;;  %v13567_v51 = vpop.permute.xlu0 %4163  ;;  %v10314_v37 = vadd.f32 %v3479_v7, %v16032_v10  ;;  %10174 = vmatpush3.bf16.msra.mxu1 %v10171_v62  ;;  %v16034_v46 = vmax.f32 %v16033_v0, 0.0  ;;  %v16037_v8 = vmax.f32 %v16036_v32, 0.0  ;;  %v4495_v7 = vmax.f32 %v16039_v21, %v13337_v4  ;;  %v16040_v62 = vld [vmem:[#allocation62_spill] sm:$0xff] }
 0x398   : > { %v13583_v23 = vadd.f32 %v13221_v20, %v10313_v41  ;;  %v4178_v19 = vpop.permute.xlu1 %4177  ;;  %v16041_v10 = vmax.f32 %v16040_v62, 0.0  ;;  %v13604_v32 = vadd.f32 %v13221_v20, %v13462_v52  ;;  %v16046_v62 = vld [vmem:[#allocation57_spill] sm:$0xff] }
 0x399   : > { %v4512_v40 = vmax.f32 %v16034_v46, %v4180_v56  ;;  %v4496_v35 = vmax.f32 %v16037_v8, %v13294_v50  ;;  %v16042_v46 = vmax.f32 %v13538_v15, 0.0  ;;  %v9664_v41 = vpop.f32.mrb[114].mxu0  ;;  %v16044_v8 = vld [vmem:[#allocation56_spill] sm:$0xff]  ;;  %v13609_v12 = vadd.f32 %v13221_v20, %v10314_v37 }
 0x39a   : > { %4281 = vrot.lane.b32.xlu0 %v16035_v13, %s10808_s24  ;;  %v4511_v0 = vmax.f32 %v16041_v10, %v4178_v19  ;;  %v15582_v13 = vmax.f32 %v13573_v54, 0.0  ;;  %16043 = vst [vmem:[#allocation19_spill] sm:$0xff] %v13604_v32  ;;  %v15583_v50 = vmax.f32 %v13583_v23, 0.0  ;;  %v10315_v21 = vadd.f32 %v9664_v41, %v16044_v8  ;;  %v3489_v4 = vpop.f32.mrb[115].mxu0 }
 0x39b   : > { %4265 = vrot.lane.b32.xlu1 %v16042_v46, %s10808_s24  ;;  %v13599_v56 = vpop.permute.xlu0 %4161  ;;  %v10316_v10 = vadd.f32 %v3489_v4, %v16046_v62  ;;  %v13614_v46 = vmax.f32 %v4496_v35, %v4512_v40  ;;  %v13629_v35 = vadd.f32 %v13221_v20, %v13483_v24  ;;  %v16049_v40 = vld [vmem:[#allocation60_spill] sm:$0xff]  ;;  %v16050_v62 = vld [vmem:[#allocation61_spill] sm:$0xff]  ;;  %v16053_v24 = vmax.f32 %v13604_v32, 0.0 }
 0x39c   : > { %v13611_v19 = vmax.f32 %v4495_v7, %v4511_v0  ;;  %v4184_v26 = vpop.permute.xlu1 %4183  ;;  %v13636_v4 = vadd.f32 %v13221_v20, %v10315_v21  ;;  %v16058_v21 = vmax.f32 %v13609_v12, 0.0  ;;  %v16064_v32 = vld [vmem:[#allocation65_spill] sm:$0xff] }
 0x39d   : > { %16047 = vst [vmem:[#allocation25_spill] sm:$0xff] %v13614_v46  ;;  %v9667_v41 = vpop.f32.mrb[116].mxu0  ;;  %16048 = vst [vmem:[#allocation4_spill] sm:$0xff] %v13629_v35 }
 0x39e   : > { %16045 = vst [vmem:[#allocation31_spill] sm:$0xff] %v13611_v19  ;;  %4287 = vrot.lane.b32.xlu0 %v15582_v13, %s10808_s24  ;;  %9718 = vmatprep.mubr.msk.f32.mxu1 %vm4662_vm2, %v13611_v19  ;;  %v10317_v7 = vadd.f32 %v9667_v41, %v16049_v40  ;;  %v3499_v0 = vpop.f32.mrb[117].mxu0  ;;  %v16054_v41 = vld [vmem:[#allocation40_spill] sm:$0xff] }
 0x39f   : > { %4303 = vrot.lane.b32.xlu1 %v15583_v50, %s10808_s24  ;;  %v13622_v52 = vpop.permute.xlu0 %4167  ;;  %9719 = vmatmul.mubr.msk.f32.gmra.mrb[82].mxu1 %vm4662_vm2, %v13614_v46  ;;  %v10318_v13 = vadd.f32 %v3499_v0, %v16050_v62  ;;  %v16051_v50 = vld [vmem:[#allocation66_spill] sm:$0xff]  ;;  %v16055_v40 = vmax.f32 %v16054_v41, 0.0  ;;  %v13660_v41 = vadd.f32 %v13221_v20, %v13491_v61 }
 0x3a0   : > { %v16052_v19 = vmax.f32 %v16051_v50, 0.0  ;;  %v4182_v31 = vpop.permute.xlu1 %4181  ;;  %v16056_v46 = vld [vmem:[#allocation70_spill] sm:$0xff] }
 0x3a1   : > { %v4497_v22 = vmax.f32 %v16055_v40, %v13407_v47  ;;  %v16057_v54 = vmax.f32 %v16056_v46, 0.0  ;;  %v9670_v50 = vpop.f32.mrb[118].mxu0  ;;  %16061 = vst [vmem:[#allocation26_spill] sm:$0xff] %v13660_v41  ;;  %v16062_v47 = vld [vmem:[#allocation64_spill] sm:$0xff]  ;;  %v13665_v40 = vadd.f32 %v13221_v20, %v10316_v10 }
 0x3a2   : > { %v4514_v37 = vmax.f32 %v16052_v19, %v4184_v26  ;;  %4285 = vrot.lane.b32.xlu0 %v16053_v24, %s10808_s24  ;;  %v16059_v26 = vld [vmem:[#allocation32_spill] sm:$0xff]  ;;  %v15593_v24 = vmax.f32 %v13629_v35, 0.0  ;;  %v10319_v46 = vadd.f32 %v9670_v50, %v16062_v47  ;;  %v16068_v47 = vld [vmem:[#allocation69_spill] sm:$0xff]  ;;  %v16074_v35 = vld [vmem:[#allocation78_spill] sm:$0xff] }
 0x3a3   : > { %v4513_v8 = vmax.f32 %v16057_v54, %v4182_v31  ;;  %4301 = vrot.lane.b32.xlu1 %v16058_v21, %s10808_s24  ;;  %v13652_v0 = vpop.permute.xlu0 %4165  ;;  %v16060_v19 = vmax.f32 %v16059_v26, 0.0  ;;  %v3509_v31 = vpop.f32.mrb[119].mxu0  ;;  %v15594_v54 = vmax.f32 %v13636_v4, 0.0  ;;  %v16067_v10 = vld [vmem:[#allocation68_spill] sm:$0xff] }
 0x3a4   : > { %v10320_v3 = vadd.f32 %v3509_v31, %v16064_v32  ;;  %v13685_v32 = vadd.f32 %v13221_v20, %v13508_v14 }
 0x3a5   : > { %v4498_v62 = vmax.f32 %v16060_v19, %v13372_v5  ;;  %v13667_v21 = vmax.f32 %v4497_v22, %v4513_v8  ;;  %v4188_v5 = vpop.permute.xlu1 %4187  ;;  %v9673_v50 = vpop.f32.mrb[120].mxu0  ;;  %v16075_v19 = vmax.f32 %v16074_v35, 0.0 }
 0x3a6   : > { %4291 = vrot.lane.b32.xlu0 %v15593_v24, %s10808_s24  ;;  %16066 = vst [vmem:[#allocation29_spill] sm:$0xff] %v13685_v32  ;;  %v3519_v8 = vpop.f32.mrb[121].mxu0  ;;  %v16069_v24 = vld [vmem:[#allocation74_spill] sm:$0xff] }
 0x3a7   : > { %16063 = vst [vmem:[#allocation7_spill] sm:$0xff] %v13667_v21  ;;  %v13670_v26 = vmax.f32 %v4498_v62, %v4514_v37  ;;  %4307 = vrot.lane.b32.xlu1 %v15594_v54, %s10808_s24  ;;  %v13678_v61 = vpop.permute.xlu0 %4171  ;;  %9721 = vmatprep.mubr.msk.f32.mxu1 %vm4662_vm2, %v13667_v21  ;;  %v13688_v37 = vadd.f32 %v9673_v50, %v16067_v10  ;;  %v16070_v54 = vmax.f32 %v16069_v24, 0.0  ;;  %v16071_v50 = vmax.f32 %v13660_v41, 0.0  ;;  %v16072_v10 = vld [vmem:[#allocation47_spill] sm:$0xff]  ;;  %v16082_v41 = vld [vmem:[#allocation73_spill] sm:$0xff] }
 0x3a8   : > { %v13694_v62 = vadd.f32 %v13221_v20, %v10317_v7  ;;  %v13697_v31 = vadd.f32 %v3519_v8, %v16068_v47  ;;  %v16073_v21 = vmax.f32 %v16072_v10, 0.0  ;;  %v16076_v7 = vmax.f32 %v13665_v40, 0.0 }
 0x3a9   : > { %16065 = vst [vmem:[#allocation27_spill] sm:$0xff] %v13670_v26  ;;  %9722 = vmatmul.mubr.msk.f32.gmra.mrb[84].mxu1 %vm4662_vm2, %v13670_v26  ;;  %v4516_v22 = vmax.f32 %v16070_v54, %v4188_v5  ;;  %v4186_v14 = vpop.permute.xlu1 %4185  ;;  %v9676_v24 = vpop.f32.mrb[122].mxu0  ;;  %v16077_v54 = vld [vmem:[#allocation44_spill] sm:$0xff]  ;;  %v13720_v10 = vadd.f32 %v13221_v20, %v13516_v30 }
 0x3aa   : > { %4289 = vrot.lane.b32.xlu0 %v16071_v50, %s10808_s24  ;;  %v4499_v26 = vmax.f32 %v16073_v21, %v13476_v33  ;;  %v4515_v11 = vmax.f32 %v16075_v19, %v4186_v14  ;;  %v16078_v5 = vmax.f32 %v16077_v54, 0.0  ;;  %v15602_v50 = vmax.f32 %v13685_v32, 0.0  ;;  %v16080_v33 = vld [vmem:[#allocation72_spill] sm:$0xff]  ;;  %v3529_v21 = vpop.f32.mrb[123].mxu0  ;;  %v16091_v32 = vld [vmem:[#allocation82_spill] sm:$0xff] }
 0x3ab   : > { %4305 = vrot.lane.b32.xlu1 %v16076_v7, %s10808_s24  ;;  %v13712_v8 = vpop.permute.xlu0 %4169  ;;  %16079 = vst [vmem:[#allocation6_spill] sm:$0xff] %v13720_v10  ;;  %v13723_v35 = vadd.f32 %v9676_v24, %v16080_v33  ;;  %v15603_v19 = vmax.f32 %v13694_v62, 0.0  ;;  %v13727_v14 = vadd.f32 %v13221_v20, %v10318_v13  ;;  %v13732_v54 = vadd.f32 %v3529_v21, %v16082_v41  ;;  %v16085_v41 = vld [vmem:[#allocation76_spill] sm:$0xff]  ;;  %v16086_v21 = vld [vmem:[#allocation77_spill] sm:$0xff] }
 0x3ac   : > { %v4500_v47 = vmax.f32 %v16078_v5, %v13444_v45  ;;  %v13729_v7 = vmax.f32 %v4499_v26, %v4515_v11  ;;  %v13747_v13 = vadd.f32 %v13221_v20, %v13557_v16  ;;  %v13758_v33 = vadd.f32 %v13221_v20, %v10319_v46 }
 0x3ad   : > { %v4192_v5 = vpop.permute.xlu1 %4191  ;;  %v9679_v30 = vpop.f32.mrb[124].mxu0  ;;  %v16087_v16 = vmax.f32 %v12872_v2, 0.0  ;;  %v16093_v46 = vmax.f32 %v13727_v14, 0.0  ;;  %v16094_v2 = vld [vmem:[#allocation50_spill] sm:$0xff] }
 0x3ae   : > { %16081 = vst [vmem:[#allocation30_spill] sm:$0xff] %v13729_v7  ;;  %v13734_v45 = vmax.f32 %v4500_v47, %v4516_v22  ;;  %4295 = vrot.lane.b32.xlu0 %v15602_v50, %s10808_s24  ;;  %9724 = vmatprep.mubr.msk.f32.mxu1 %vm4662_vm2, %v13729_v7  ;;  %16084 = vst [vmem:[#allocation39_spill] sm:$0xff] %v13747_v13  ;;  %v13750_v26 = vadd.f32 %v9679_v30, %v16085_v41  ;;  %v3539_v24 = vpop.f32.mrb[125].mxu0  ;;  %v16088_v30 = vmax.f32 %v13720_v10, 0.0  ;;  %v16089_v41 = vld [vmem:[#allocation55_spill] sm:$0xff] }
 0x3af   : > { %4311 = vrot.lane.b32.xlu1 %v15603_v19, %s10808_s24  ;;  %v13754_v22 = vpop.permute.xlu0 %4207  ;;  %v13761_v50 = vadd.f32 %v3539_v24, %v16086_v21  ;;  %v4518_v19 = vmax.f32 %v16087_v16, %v4192_v5  ;;  %v16092_v47 = vmax.f32 %v16091_v32, 0.0  ;;  %v16095_v5 = vmax.f32 %v16094_v2, 0.0 }
 0x3b0   : > { %16083 = vst [vmem:[#allocation11_spill] sm:$0xff] %v13734_v45  ;;  %9725 = vmatmul.mubr.msk.f32.gmra.mrb[86].mxu1 %vm4662_vm2, %v13734_v45  ;;  %v16090_v45 = vmax.f32 %v16089_v41, 0.0  ;;  %v13781_v16 = vadd.f32 %v13221_v20, %v13545_v55  ;;  %v16097_v41 = vld [vmem:[#allocation80_spill] sm:$0xff] }
 0x3b1   : > { %v4190_v11 = vpop.permute.xlu1 %4189  ;;  %v9682_v24 = vpop.f32.mrb[126].mxu0  ;;  %v4502_v21 = vmax.f32 %v16095_v5, %v13501_v27  ;;  %v16099_v27 = vld [vmem:[#allocation81_spill] sm:$0xff] }
 0x3b2   : > { %4293 = vrot.lane.b32.xlu0 %v16088_v30, %s10808_s24  ;;  %v4501_v7 = vmax.f32 %v16090_v45, %v13534_v18  ;;  %v4517_v38 = vmax.f32 %v16092_v47, %v4190_v11  ;;  %16096 = vst [vmem:[#allocation43_spill] sm:$0xff] %v13781_v16  ;;  %v15610_v30 = vmax.f32 %v13747_v13, 0.0  ;;  %v13785_v18 = vadd.f32 %v9682_v24, %v16097_v41  ;;  %v3549_v45 = vpop.f32.mrb[127].mxu0  ;;  %v16101_v24 = vld [vmem:[#allocation85_spill] sm:$0xff] }
 0x3b3   : > { %4309 = vrot.lane.b32.xlu1 %v16093_v46, %s10808_s24  ;;  %v13787_v32 = vpop.permute.xlu0 %4205  ;;  %v15611_v11 = vmax.f32 %v13758_v33, 0.0  ;;  %v13791_v47 = vadd.f32 %v13221_v20, %v10320_v3  ;;  %v13796_v2 = vadd.f32 %v3549_v45, %v16099_v27  ;;  %v13798_v55 = vmax.f32 %v4502_v21, %v4518_v19  ;;  %v16103_v27 = vld [vmem:[#allocation63_spill] sm:$0xff] }
 0x3b4   : > { %v13793_v46 = vmax.f32 %v4501_v7, %v4517_v38  ;;  %v15618_v38 = vmax.f32 %v13781_v16, 0.0  ;;  %v13816_v7 = vadd.f32 %v13221_v20, %v13688_v37  ;;  %v16102_v21 = vmax.f32 %v16101_v24, 0.0  ;;  %v16107_v37 = vld [vmem:[#allocation59_spill] sm:$0xff] }
 0x3b5   : > { %16100 = vst [vmem:[#allocation33_spill] sm:$0xff] %v13798_v55  ;;  %v4196_v5 = vpop.permute.xlu1 %4195  ;;  %v15620_v19 = vmax.f32 %v13791_v47, 0.0  ;;  %v16108_v24 = vmax.f32 %v16107_v37, 0.0 }
 0x3b6   : > { %16098 = vst [vmem:[#allocation9_spill] sm:$0xff] %v13793_v46  ;;  %4297 = vrot.lane.b32.xlu0 %v15610_v30, %s10808_s24  ;;  %9727 = vmatprep.mubr.msk.f32.mxu1 %vm4662_vm2, %v13793_v46  ;;  %v4520_v41 = vmax.f32 %v16102_v21, %v4196_v5  ;;  %v16104_v30 = vmax.f32 %v16103_v27, 0.0  ;;  %v15619_v16 = vmax.f32 %v13816_v7, 0.0  ;;  %v16113_v27 = vld [vmem:[#allocation71_spill] sm:$0xff] }
 0x3b7   : > { %4315 = vrot.lane.b32.xlu1 %v15611_v11, %s10808_s24  ;;  %9728 = vmatmul.mubr.msk.f32.gmra.mrb[88].mxu1 %vm4662_vm2, %v13798_v55  ;;  %v13811_v3 = vpop.permute.xlu0 %4211  ;;  %v16105_v55 = vld [vmem:[#allocation87_spill] sm:$0xff]  ;;  %v4504_v5 = vmax.f32 %v16108_v24, %v13567_v51  ;;  %v16114_v37 = vmax.f32 %v16113_v27, 0.0 }
 0x3b8   : > { %v4503_v11 = vmax.f32 %v16104_v30, %v13599_v56  ;;  %v16106_v46 = vmax.f32 %v16105_v55, 0.0 }
 0x3b9   : > { %v4194_v45 = vpop.permute.xlu1 %4193  ;;  %v13843_v30 = vmax.f32 %v4504_v5, %v4520_v41  ;;  %v4505_v24 = vmax.f32 %v16114_v37, %v13652_v0  ;;  %v16115_v5 = vld [vmem:[#allocation91_spill] sm:$0xff] }
 0x3ba   : > { %4299 = vrot.lane.b32.xlu0 %v15618_v38, %s10808_s24  ;;  %v4519_v13 = vmax.f32 %v16106_v46, %v4194_v45  ;;  %v13839_v38 = vadd.f32 %v13221_v20, %v13697_v31 }
 0x3bb   : > { %4313 = vrot.lane.b32.xlu1 %v15620_v19, %s10808_s24  ;;  %v13834_v21 = vpop.permute.xlu0 %4209  ;;  %16110 = vst [vmem:[#allocation41_spill] sm:$0xff] %v13843_v30 }
 0x3bc   : > { %v13841_v56 = vmax.f32 %v4503_v11, %v4519_v13  ;;  %v15627_v31 = vmax.f32 %v13839_v38, 0.0  ;;  %v13857_v13 = vadd.f32 %v13221_v20, %v13723_v35  ;;  %v16111_v11 = vld [vmem:[#allocation89_spill] sm:$0xff] }
 0x3bd   : > { %v4200_v46 = vpop.permute.xlu1 %4199  ;;  %v16112_v55 = vmax.f32 %v16111_v11, 0.0  ;;  %v13877_v11 = vadd.f32 %v13221_v20, %v13732_v54 }
 0x3be   : > { %16109 = vst [vmem:[#allocation34_spill] sm:$0xff] %v13841_v56  ;;  %9730 = vmatprep.mubr.msk.f32.mxu1 %vm4662_vm2, %v13841_v56 }
 0x3bf   : > { %4319 = vrot.lane.b32.xlu1 %v15619_v16, %s10808_s24  ;;  %9731 = vmatmul.mubr.msk.f32.gmra.mrb[90].mxu1 %vm4662_vm2, %v13843_v30  ;;  %v13852_v51 = vpop.permute.xlu0 %4215  ;;  %v4522_v41 = vmax.f32 %v16112_v55, %v4200_v46  ;;  %v16116_v16 = vmax.f32 %v16115_v5, 0.0  ;;  %v16117_v30 = vld [vmem:[#allocation67_spill] sm:$0xff]  ;;  %v15626_v46 = vmax.f32 %v13857_v13, 0.0  ;;  %v15632_v54 = vmax.f32 %v13877_v11, 0.0 }
 0x3c0   : > { %v16118_v56 = vmax.f32 %v16117_v30, 0.0 }
 0x3c1   : > { %v4198_v45 = vpop.permute.xlu1 %4197 }
 0x3c2   : > { %v4521_v19 = vmax.f32 %v16116_v16, %v4198_v45  ;;  %v4506_v35 = vmax.f32 %v16118_v56, %v13622_v52  ;;  %v16121_v56 = vmax.f32 %v12983_v59, 0.0  ;;  %v16122_v45 = vld [vmem:[#allocation79_spill] sm:$0xff] }
 0x3c3   : > { %4317 = vrot.lane.b32.xlu1 %v15627_v31, %s10808_s24  ;;  %v13872_v10 = vpop.permute.xlu0 %4213  ;;  %v16123_v27 = vmax.f32 %v16122_v45, 0.0  ;;  %v16130_v45 = vld [vmem:[#allocation97_spill] sm:$0xff] }
 0x3c4   : > { %v13879_v0 = vmax.f32 %v4505_v24, %v4521_v19  ;;  %v13881_v55 = vmax.f32 %v4506_v35, %v4522_v41  ;;  %v13895_v19 = vadd.f32 %v13221_v20, %v13750_v26  ;;  %v16124_v24 = vld [vmem:[#allocation94_spill] sm:$0xff] }
 0x3c5   : > { %v4204_v16 = vpop.permute.xlu1 %4203  ;;  %v4507_v37 = vmax.f32 %v16123_v27, %v13712_v8  ;;  %v16125_v5 = vmax.f32 %v16124_v24, 0.0  ;;  %v16131_v27 = vmax.f32 %v16130_v45, 0.0  ;;  %v16137_v45 = vld [vmem:[#allocation83_spill] sm:$0xff] }
 0x3c6   : > { %16119 = vst [vmem:[#allocation42_spill] sm:$0xff] %v13879_v0  ;;  %16120 = vst [vmem:[#allocation45_spill] sm:$0xff] %v13881_v55  ;;  %9733 = vmatprep.mubr.msk.f32.mxu1 %vm4662_vm2, %v13879_v0  ;;  %v4524_v30 = vmax.f32 %v16121_v56, %v4204_v16  ;;  %v15631_v59 = vmax.f32 %v13895_v19, 0.0  ;;  %v13913_v16 = vadd.f32 %v13221_v20, %v13761_v50 }
 0x3c7   : > { %4323 = vrot.lane.b32.xlu1 %v15626_v46, %s10808_s24  ;;  %9734 = vmatmul.mubr.msk.f32.gmra.mrb[92].mxu1 %vm4662_vm2, %v13881_v55  ;;  %v13890_v52 = vpop.permute.xlu0 %4219  ;;  %v16126_v46 = vld [vmem:[#allocation75_spill] sm:$0xff] }
 0x3c8   : > { %v16127_v31 = vmax.f32 %v16126_v46, 0.0  ;;  %v15630_v50 = vmax.f32 %v13913_v16, 0.0  ;;  %v13931_v46 = vadd.f32 %v13221_v20, %v13796_v2  ;;  %v13948_v2 = vadd.f32 %v13221_v20, %v13785_v18 }
 0x3c9   : > { %v4202_v41 = vpop.permute.xlu1 %4201 }
 0x3ca   : > { %v4523_v35 = vmax.f32 %v16125_v5, %v4202_v41  ;;  %v4508_v26 = vmax.f32 %v16127_v31, %v13678_v61  ;;  %v8285_v41 = vld [vmem:[%s15342_s3 + $0x48] sm:$0xff] }
 0x3cb   : > { %4321 = vrot.lane.b32.xlu1 %v15632_v54, %s10808_s24  ;;  %v4218_v55 = vpop.permute.xlu0 %4217  ;;  %v15639_v54 = vmax.f32 %v13931_v46, 0.0 }
 0x3cc   : > { %v13915_v56 = vmax.f32 %v4507_v37, %v4523_v35  ;;  %v13917_v8 = vmax.f32 %v4508_v26, %v4524_v30  ;;  %v8284_v30 = vld [vmem:[%s15342_s3 + $0x40] sm:$0xff]  ;;  %v16133_v26 = vld [vmem:[#allocation84_spill] sm:$0xff] }
 0x3cd   : > { %v13944_v35 = vpack.c.bf16 %v8285_v41, %v8284_v30  ;;  %v16143_v41 = vld [vmem:[#allocation88_spill] sm:$0xff] }
 0x3ce   : > { %16128 = vst [vmem:[#allocation46_spill] sm:$0xff] %v13915_v56  ;;  %16129 = vst [vmem:[#allocation52_spill] sm:$0xff] %v13917_v8  ;;  %9736 = vmatprep.mubr.msk.f32.mxu1 %vm4662_vm2, %v13915_v56  ;;  %v4240_v31 = vpop.permute.xlu1 %4239 }
 0x3cf   : > { %4327 = vrot.lane.b32.xlu1 %v15631_v59, %s10808_s24  ;;  %9737 = vmatmul.mubr.msk.f32.gmra.mrb[94].mxu1 %vm4662_vm2, %v13917_v8  ;;  %v13926_v61 = vpop.permute.xlu0 %4223  ;;  %v4542_v37 = vmax.f32 %v16131_v27, %v4240_v31  ;;  %16132 = vst [vmem:[#allocation17_spill] sm:$0xff] %v13944_v35  ;;  %v16135_v8 = vld [vmem:[#allocation99_spill] sm:$0xff]  ;;  %v16138_v31 = vmax.f32 %v16137_v45, 0.0 }
 0x3d0   : > { %v16136_v56 = vmax.f32 %v16135_v8, 0.0  ;;  %10176 = vmatprep.subr.bf16.mxu1 %v13944_v35 }
 0x3d1   : > { %v4526_v27 = vmax.f32 %v16138_v31, %v13754_v22  ;;  %v16141_v22 = vld [vmem:[#allocation101_spill] sm:$0xff] }
 0x3d2   : > { %v4238_v5 = vpop.permute.xlu1 %4237 }
 0x3d3   : > { %4325 = vrot.lane.b32.xlu1 %v15630_v50, %s10808_s24  ;;  %v4222_v24 = vpop.permute.xlu0 %4221  ;;  %v16134_v50 = vmax.f32 %v16133_v26, 0.0  ;;  %v4541_v0 = vmax.f32 %v16136_v56, %v4238_v5  ;;  %v13965_v20 = vmax.f32 %v4526_v27, %v4542_v37  ;;  %v16144_v37 = vmax.f32 %v16143_v41, 0.0  ;;  %v16145_v26 = vld [vmem:[#allocation103_spill] sm:$0xff]  ;;  %v16147_v27 = vld [vmem:[#allocation86_spill] sm:$0xff]  ;;  %v16151_v41 = vld [vmem:[#allocation92_spill] sm:$0xff] }
 0x3d4   : > { %v16146_v45 = vmax.f32 %v16145_v26, 0.0 }
 0x3d5   : > { %v4525_v59 = vmax.f32 %v16134_v50, %v13787_v32  ;;  %16140 = vst [vmem:[#allocation54_spill] sm:$0xff] %v13965_v20  ;;  %v15645_v50 = vmax.f32 %v13948_v2, 0.0  ;;  %v4527_v5 = vmax.f32 %v16144_v37, %v13834_v21  ;;  %v16154_v37 = vld [vmem:[#allocation90_spill] sm:$0xff] }
 0x3d6   : > { %v4244_v32 = vpop.permute.xlu1 %4243 }
 0x3d7   : > { %v13960_v30 = vmax.f32 %v4525_v59, %v4541_v0  ;;  %4329 = vrot.lane.b32.xlu1 %v15639_v54, %s10808_s24  ;;  %v4228_v18 = vpop.permute.xlu0 %4227  ;;  %v16142_v0 = vmax.f32 %v16141_v22, 0.0  ;;  %v16148_v54 = vmax.f32 %v16147_v27, 0.0 }
 0x3d9   : > { %16139 = vst [vmem:[#allocation20_spill] sm:$0xff] %v13960_v30  ;;  %9739 = vmatprep.mubr.msk.f32.mxu1 %vm4662_vm2, %v13960_v30  ;;  %v4544_v59 = vmax.f32 %v16142_v0, %v4244_v32  ;;  %v16150_v32 = vmax.f32 %v13136_v9, 0.0 }
 0x3da   : > { %9740 = vmatmul.mubr.msk.f32.gmra.mrb[96].mxu1 %vm4662_vm2, %v13965_v20  ;;  %v4242_v8 = vpop.permute.xlu1 %4241  ;;  %v4528_v20 = vmax.f32 %v16148_v54, %v13811_v3  ;;  %v16152_v3 = vmax.f32 %v16151_v41, 0.0  ;;  %v16159_v41 = vmax.f32 %v13271_v34, 0.0 }
 0x3db   : > { %4331 = vrot.lane.b32.xlu1 %v15645_v50, %s10808_s24  ;;  %v4226_v56 = vpop.permute.xlu0 %4225  ;;  %v4543_v31 = vmax.f32 %v16146_v45, %v4242_v8 }
 0x3dc   : > { %v13987_v35 = vmax.f32 %v4528_v20, %v4544_v59  ;;  %v4529_v54 = vmax.f32 %v16152_v3, %v13872_v10  ;;  %v16153_v20 = vmax.f32 %v13176_v39, 0.0  ;;  %v16156_v39 = vmax.f32 %v13224_v49, 0.0 }
 0x3dd   : > { %v13985_v30 = vmax.f32 %v4527_v5, %v4543_v31  ;;  %v16155_v5 = vmax.f32 %v16154_v37, 0.0  ;;  %v16162_v49 = vmax.f32 %v13308_v57, 0.0  ;;  %v16168_v57 = vmax.f32 %v13387_v58, 0.0 }
 0x3de   : > { %16149 = vst [vmem:[#allocation48_spill] sm:$0xff] %v13987_v35  ;;  %v4248_v22 = vpop.permute.xlu1 %4247 }
 0x3df   : > { %v4232_v50 = vpop.permute.xlu0 %4231  ;;  %9742 = vmatprep.mubr.msk.f32.mxu1 %vm4662_vm2, %v13985_v30  ;;  %v4546_v0 = vmax.f32 %v16150_v32, %v4248_v22  ;;  %v4530_v26 = vmax.f32 %v16155_v5, %v13852_v51  ;;  %v16157_v32 = vld [vmem:[#allocation95_spill] sm:$0xff] }
 0x3e0   : > { %9743 = vmatmul.mubr.msk.f32.gmra.mrb[98].mxu1 %vm4662_vm2, %v13987_v35 }
 0x3e1   : > { %v14005_v27 = vmax.f32 %v4530_v26, %v4546_v0  ;;  %v16160_v0 = vld [vmem:[#allocation93_spill] sm:$0xff] }
 0x3e3   : > { %v4230_v21 = vpop.permute.xlu0 %4229  ;;  %v4246_v8 = vpop.permute.xlu1 %4245 }
 0x3e4   : > { %v4545_v59 = vmax.f32 %v16153_v20, %v4246_v8  ;;  %v16158_v8 = vmax.f32 %v16157_v32, 0.0 }
 0x3e6   : > { %v14003_v45 = vmax.f32 %v4529_v54, %v4545_v59  ;;  %v4531_v51 = vmax.f32 %v16158_v8, %v4218_v55  ;;  %v16161_v54 = vmax.f32 %v16160_v0, 0.0 }
 0x3e7   : > { %v4236_v31 = vpop.permute.xlu0 %4235  ;;  %v4252_v35 = vpop.permute.xlu1 %4251 }
 0x3e8   : > { %9745 = vmatprep.mubr.msk.f32.mxu1 %vm4662_vm2, %v14003_v45  ;;  %v4548_v10 = vmax.f32 %v16156_v39, %v4252_v35  ;;  %v4532_v20 = vmax.f32 %v16161_v54, %v13890_v52  ;;  %v16163_v35 = vld [vmem:[#allocation98_spill] sm:$0xff]  ;;  %v16165_v52 = vmax.f32 %v13352_v63, 0.0 }
 0x3e9   : > { %9746 = vmatmul.mubr.msk.f32.gmra.mrb[100].mxu1 %vm4662_vm2, %v14005_v27  ;;  %v16164_v39 = vmax.f32 %v16163_v35, 0.0 }
 0x3ea   : > { %v14022_v37 = vmax.f32 %v4532_v20, %v4548_v10  ;;  %v16166_v10 = vld [vmem:[#allocation96_spill] sm:$0xff] }
 0x3eb   : > { %v4234_v9 = vpop.permute.xlu0 %4233  ;;  %v4250_v22 = vpop.permute.xlu1 %4249  ;;  %v16167_v8 = vmax.f32 %v16166_v10, 0.0 }
 0x3ec   : > { %v4547_v3 = vmax.f32 %v16159_v41, %v4250_v22  ;;  %v4533_v22 = vmax.f32 %v16164_v39, %v4222_v24 }
 0x3ee   : > { %v14020_v59 = vmax.f32 %v4531_v51, %v4547_v3  ;;  %v4534_v51 = vmax.f32 %v16167_v8, %v13926_v61 }
 0x3ef   : > { %v4272_v26 = vpop.permute.xlu0 %4271 }
 0x3f0   : > { %v4256_v5 = vpop.permute.xlu1 %4255  ;;  %9748 = vmatprep.mubr.msk.f32.mxu1 %vm4662_vm2, %v14020_v59 }
 0x3f1   : > { %9749 = vmatmul.mubr.msk.f32.gmra.mrb[102].mxu1 %vm4662_vm2, %v14022_v37  ;;  %v4550_v34 = vmax.f32 %v16162_v49, %v4256_v5  ;;  %v16169_v5 = vld [vmem:[#allocation102_spill] sm:$0xff] }
 0x3f2   : > { %v16170_v49 = vmax.f32 %v16169_v5, 0.0 }
 0x3f3   : > { %v4270_v41 = vpop.permute.xlu0 %4269  ;;  %v14039_v0 = vmax.f32 %v4534_v51, %v4550_v34  ;;  %v16172_v34 = vld [vmem:[#allocation100_spill] sm:$0xff]  ;;  %v16175_v51 = vmax.f32 %v13161_v25, 0.0  ;;  %v16178_v25 = vmax.f32 %v13513_v48, 0.0  ;;  %v16182_v48 = vmax.f32 %v13583_v23, 0.0 }
 0x3f4   : > { %v4254_v55 = vpop.permute.xlu1 %4253  ;;  %v4535_v61 = vmax.f32 %v16170_v49, %v4226_v56  ;;  %v16173_v39 = vmax.f32 %v16172_v34, 0.0  ;;  %v16174_v56 = vmax.f32 %v13457_v60, 0.0  ;;  %v16181_v34 = vmax.f32 %v13202_v53, 0.0 }
 0x3f5   : > { %v4549_v32 = vmax.f32 %v16165_v52, %v4254_v55  ;;  %v16171_v55 = vmax.f32 %v13422_v28, 0.0  ;;  %v16183_v53 = vmax.f32 %v13343_v44, 0.0  ;;  %v16186_v44 = vmax.f32 %v13636_v4, 0.0 }
 0x3f7   : > { %v14037_v3 = vmax.f32 %v4533_v22, %v4549_v32  ;;  %v4276_v24 = vpop.permute.xlu0 %4275  ;;  %v4536_v22 = vmax.f32 %v16173_v39, %v4228_v18  ;;  %v16176_v18 = vmax.f32 %v13488_v42, 0.0  ;;  %v4540_v39 = vmax.f32 %v16181_v34, %v4236_v31 }
 0x3f8   : > { %v4260_v54 = vpop.permute.xlu1 %4259  ;;  %v4557_v31 = vmax.f32 %v16183_v53, %v4270_v41 }
 0x3f9   : > { %9751 = vmatprep.mubr.msk.f32.mxu1 %vm4662_vm2, %v14037_v3  ;;  %v4552_v63 = vmax.f32 %v16168_v57, %v4260_v54  ;;  %v4537_v54 = vmax.f32 %v16175_v51, %v4230_v21  ;;  %v16179_v21 = vmax.f32 %v13245_v29, 0.0 }
 0x3fa   : > { %9752 = vmatmul.mubr.msk.f32.gmra.mrb[104].mxu1 %vm4662_vm2, %v14039_v0 }
 0x3fb   : > { %v14055_v32 = vmax.f32 %v4536_v22, %v4552_v63  ;;  %v16177_v63 = vmax.f32 %v13129_v17, 0.0  ;;  %v4539_v17 = vmax.f32 %v16179_v21, %v4234_v9 }
 0x3fc   : > { %v4274_v58 = vpop.permute.xlu0 %4273 }
 0x3fd   : > { %v4258_v20 = vpop.permute.xlu1 %4257 }
 0x3fe   : > { %v4551_v35 = vmax.f32 %v16171_v55, %v4258_v20  ;;  %v4538_v20 = vmax.f32 %v16177_v63, %v4232_v50  ;;  %v16180_v50 = vmax.f32 %v13538_v15, 0.0 }
 0x400   : > { %v14053_v52 = vmax.f32 %v4535_v61, %v4551_v35  ;;  %v4280_v61 = vpop.permute.xlu0 %4279 }
 0x401   : > { %v4264_v10 = vpop.permute.xlu1 %4263 }
 0x402   : > { %9754 = vmatprep.mubr.msk.f32.mxu1 %vm4662_vm2, %v14053_v52  ;;  %v4554_v8 = vmax.f32 %v16174_v56, %v4264_v10 }
 0x403   : > { %9755 = vmatmul.mubr.msk.f32.gmra.mrb[106].mxu1 %vm4662_vm2, %v14055_v32 }
 0x404   : > { %v14071_v49 = vmax.f32 %v4538_v20, %v4554_v8  ;;  %v4278_v22 = vpop.permute.xlu0 %4277 }
 0x405   : > { %v4262_v28 = vpop.permute.xlu1 %4261 }
 0x406   : > { %v4553_v57 = vmax.f32 %v16176_v18, %v4262_v28  ;;  %v16184_v28 = vmax.f32 %v13609_v12, 0.0 }
 0x408   : > { %v14069_v5 = vmax.f32 %v4537_v54, %v4553_v57  ;;  %v4284_v29 = vpop.permute.xlu0 %4283  ;;  %v16185_v54 = vmax.f32 %v13317_v43, 0.0 }
 0x409   : > { %v4268_v55 = vpop.permute.xlu1 %4267 }
 0x40a   : > { %9757 = vmatprep.mubr.msk.f32.mxu1 %vm4662_vm2, %v14069_v5  ;;  %v4556_v60 = vmax.f32 %v16178_v25, %v4268_v55  ;;  %v4558_v18 = vmax.f32 %v16185_v54, %v4272_v26  ;;  %v16187_v55 = vmax.f32 %v13411_v36, 0.0  ;;  %v16188_v26 = vmax.f32 %v13665_v40, 0.0 }
 0x40b   : > { %9758 = vmatmul.mubr.msk.f32.gmra.mrb[108].mxu1 %vm4662_vm2, %v14071_v49  ;;  %v16190_v36 = vmax.f32 %v13694_v62, 0.0  ;;  %v16195_v62 = vmax.f32 %v13758_v33, 0.0  ;;  %v16198_v54 = vmax.f32 %v13791_v47, 0.0 }
 0x40c   : > { %v14087_v56 = vmax.f32 %v4540_v39, %v4556_v60  ;;  %v4282_v23 = vpop.permute.xlu0 %4281  ;;  %v4559_v43 = vmax.f32 %v16187_v55, %v4274_v58  ;;  %v16189_v60 = vmax.f32 %v13376_v1, 0.0  ;;  %v16191_v58 = vmax.f32 %v13480_v6, 0.0  ;;  %v16193_v39 = vld [vmem:[#allocation18_spill] sm:$0xff] }
 0x40d   : > { %v4266_v42 = vpop.permute.xlu1 %4265 }
 0x40e   : > { %v4555_v35 = vmax.f32 %v16180_v50, %v4266_v42  ;;  %v4560_v42 = vmax.f32 %v16189_v60, %v4276_v24  ;;  %v4561_v1 = vmax.f32 %v16191_v58, %v4278_v22  ;;  %v16192_v24 = vmax.f32 %v13727_v14, 0.0 }
 0x410   : > { %v14085_v10 = vmax.f32 %v4539_v17, %v4555_v35  ;;  %v4288_v17 = vpop.permute.xlu0 %4287 }
 0x411   : > { %v4304_v8 = vpop.permute.xlu1 %4303 }
 0x412   : > { %9760 = vmatprep.mubr.msk.f32.mxu1 %vm4662_vm2, %v14085_v10  ;;  %v4574_v15 = vmax.f32 %v16182_v48, %v4304_v8  ;;  %v16194_v8 = vmax.f32 %v16193_v39, 0.0 }
 0x413   : > { %9761 = vmatmul.mubr.msk.f32.gmra.mrb[110].mxu1 %vm4662_vm2, %v14087_v56 }
 0x414   : > { %v14103_v63 = vmax.f32 %v4558_v18, %v4574_v15  ;;  %v4562_v48 = vmax.f32 %v16194_v8, %v4280_v61  ;;  %v4286_v15 = vpop.permute.xlu0 %4285  ;;  %v16208_v8 = vld [vmem:[#allocation26_spill] sm:$0xff] }
 0x415   : > { %v4302_v9 = vpop.permute.xlu1 %4301 }
 0x416   : > { %v4573_v51 = vmax.f32 %v16184_v28, %v4302_v9  ;;  %v16196_v28 = vld [vmem:[#allocation23_spill] sm:$0xff] }
 0x418   : > { %v14101_v57 = vmax.f32 %v4557_v31, %v4573_v51  ;;  %v4292_v6 = vpop.permute.xlu0 %4291  ;;  %v16197_v51 = vmax.f32 %v16196_v28, 0.0 }
 0x419   : > { %v4308_v20 = vpop.permute.xlu1 %4307 }
 0x41a   : > { %9763 = vmatprep.mubr.msk.f32.mxu1 %vm4662_vm2, %v14101_v57  ;;  %v4576_v41 = vmax.f32 %v16186_v44, %v4308_v20  ;;  %v4563_v61 = vmax.f32 %v16197_v51, %v4282_v23  ;;  %v16199_v20 = vld [vmem:[#allocation12_spill] sm:$0xff]  ;;  %v16201_v23 = vmax.f32 %v13816_v7, 0.0  ;;  %v16207_v7 = vmax.f32 %v13857_v13, 0.0 }
 0x41b   : > { %9764 = vmatmul.mubr.msk.f32.gmra.mrb[112].mxu1 %vm4662_vm2, %v14103_v63  ;;  %v16200_v44 = vmax.f32 %v16199_v20, 0.0 }
 0x41c   : > { %v14119_v50 = vmax.f32 %v4560_v42, %v4576_v41  ;;  %v4290_v33 = vpop.permute.xlu0 %4289 }
 0x41d   : > { %v4306_v12 = vpop.permute.xlu1 %4305  ;;  %v4564_v41 = vmax.f32 %v16200_v44, %v4284_v29  ;;  %v16204_v29 = vmax.f32 %v13839_v38, 0.0  ;;  %v16214_v44 = vld [vmem:[#allocation6_spill] sm:$0xff] }
 0x41e   : > { %v4575_v25 = vmax.f32 %v16188_v26, %v4306_v12 }
 0x420   : > { %v14117_v21 = vmax.f32 %v4559_v43, %v4575_v25  ;;  %v16202_v25 = vld [vmem:[#allocation19_spill] sm:$0xff] }
 0x421   : > { %v4312_v35 = vpop.permute.xlu1 %4311  ;;  %v16203_v60 = vmax.f32 %v16202_v25, 0.0 }
 0x422   : > { %9766 = vmatprep.mubr.msk.f32.mxu1 %vm4662_vm2, %v14117_v21  ;;  %v4578_v4 = vmax.f32 %v16190_v36, %v4312_v35  ;;  %v16205_v36 = vld [vmem:[#allocation22_spill] sm:$0xff] }
 0x423   : > { %9767 = vmatmul.mubr.msk.f32.gmra.mrb[114].mxu1 %vm4662_vm2, %v14119_v50  ;;  %v4565_v42 = vmax.f32 %v16203_v60, %v4286_v15 }
 0x424   : > { %v14135_v53 = vmax.f32 %v4562_v48, %v4578_v4  ;;  %v16206_v4 = vmax.f32 %v16205_v36, 0.0  ;;  %v16209_v48 = vmax.f32 %v16208_v8, 0.0 }
 0x425   : > { %v4310_v40 = vpop.permute.xlu1 %4309 }
 0x426   : > { %v4577_v34 = vmax.f32 %v16192_v24, %v4310_v40  ;;  %v4566_v40 = vmax.f32 %v16206_v4, %v4288_v17  ;;  %v4567_v15 = vmax.f32 %v16209_v48, %v4290_v33  ;;  %v16210_v17 = vmax.f32 %v13877_v11, 0.0  ;;  %v8286_v48 = vld [vmem:[%s15342_s3 + $0x50] sm:$0xff] }
 0x428   : > { %v14133_v9 = vmax.f32 %v4561_v1, %v4577_v34  ;;  %v4296_v1 = vpop.permute.xlu0 %4295 }
 0x429   : > { %v4316_v31 = vpop.permute.xlu1 %4315 }
 0x42a   : > { %9769 = vmatprep.mubr.msk.f32.mxu1 %vm4662_vm2, %v14133_v9  ;;  %v4580_v14 = vmax.f32 %v16195_v62, %v4316_v31  ;;  %v16211_v62 = vld [vmem:[#allocation4_spill] sm:$0xff] }
 0x42b   : > { %9770 = vmatmul.mubr.msk.f32.gmra.mrb[116].mxu1 %vm4662_vm2, %v14135_v53 }
 0x42c   : > { %v14151_v55 = vmax.f32 %v4564_v41, %v4580_v14  ;;  %v16212_v14 = vmax.f32 %v16211_v62, 0.0  ;;  %v4294_v28 = vpop.permute.xlu0 %4293  ;;  %v16215_v41 = vmax.f32 %v16214_v44, 0.0  ;;  %v16227_v62 = vld [vmem:[#allocation104_spill] sm:$0xff]  ;;  %v16236_v44 = vld [vmem:[#allocation37_spill] sm:$0xff] }
 0x42d   : > { %v4314_v22 = vpop.permute.xlu1 %4313 }
 0x42e   : > { %v4579_v18 = vmax.f32 %v16198_v54, %v4314_v22  ;;  %v4568_v22 = vmax.f32 %v16212_v14, %v4292_v6  ;;  %v4569_v6 = vmax.f32 %v16215_v41, %v4294_v28  ;;  %v16228_v14 = vld [vmem:[#allocation105_spill] sm:$0xff]  ;;  %v16230_v28 = vld [vmem:[#allocation107_spill] sm:$0xff]  ;;  %v16237_v41 = vld [vmem:[#allocation8_spill] sm:$0xff] }
 0x430   : > { %v14149_v12 = vmax.f32 %v4563_v61, %v4579_v18  ;;  %v4298_v13 = vpop.permute.xlu0 %4297  ;;  %v16213_v18 = vmax.f32 %v13895_v19, 0.0  ;;  %v16221_v19 = vmax.f32 %v13931_v46, 0.0 }
 0x431   : > { %v4320_v43 = vpop.permute.xlu1 %4319 }
 0x432   : > { %9772 = vmatprep.mubr.msk.f32.mxu1 %vm4662_vm2, %v14149_v12  ;;  %v4582_v26 = vmax.f32 %v16201_v23, %v4320_v43  ;;  %v16216_v43 = vmax.f32 %v13913_v16, 0.0  ;;  %v16217_v23 = vld [vmem:[#allocation29_spill] sm:$0xff] }
 0x433   : > { %9773 = vmatmul.mubr.msk.f32.gmra.mrb[118].mxu1 %vm4662_vm2, %v14151_v55 }
 0x434   : > { %v14167_v24 = vmax.f32 %v4566_v40, %v4582_v26  ;;  %v16218_v26 = vmax.f32 %v16217_v23, 0.0  ;;  %v4300_v40 = vpop.permute.xlu0 %4299  ;;  %v16241_v23 = vld [vmem:[#allocation3_spill] sm:$0xff] }
 0x435   : > { %v4318_v47 = vpop.permute.xlu1 %4317 }
 0x436   : > { %v4581_v35 = vmax.f32 %v16204_v29, %v4318_v47  ;;  %v4570_v47 = vmax.f32 %v16218_v26, %v4296_v1  ;;  %v16219_v29 = vld [vmem:[#allocation39_spill] sm:$0xff]  ;;  %v16242_v26 = vld [vmem:[#allocation38_spill] sm:$0xff] }
 0x438   : > { %v14165_v58 = vmax.f32 %v4565_v42, %v4581_v35  ;;  %v16220_v35 = vmax.f32 %v16219_v29, 0.0  ;;  %v16245_v29 = vld [vmem:[#allocation31_spill] sm:$0xff] }
 0x439   : > { %v4324_v34 = vpop.permute.xlu1 %4323 }
 0x43a   : > { %9775 = vmatprep.mubr.msk.f32.mxu1 %vm4662_vm2, %v14165_v58  ;;  %v4584_v39 = vmax.f32 %v16207_v7, %v4324_v34  ;;  %v4571_v36 = vmax.f32 %v16220_v35, %v4298_v13  ;;  %v16222_v34 = vld [vmem:[#allocation43_spill] sm:$0xff]  ;;  %v16232_v13 = vld [vmem:[#allocation10_spill] sm:$0xff]  ;;  %v16246_v35 = vld [vmem:[#allocation25_spill] sm:$0xff] }
 0x43b   : > { %9776 = vmatmul.mubr.msk.f32.gmra.mrb[120].mxu1 %vm4662_vm2, %v14167_v24  ;;  %v16223_v7 = vmax.f32 %v16222_v34, 0.0  ;;  %v16252_v34 = vld [vmem:[#allocation33_spill] sm:$0xff] }
 0x43c   : > { %v14183_v61 = vmax.f32 %v4568_v22, %v4584_v39  ;;  %v16229_v22 = vld [vmem:[#allocation106_spill] sm:$0xff] }
 0x43d   : > { %v4322_v38 = vpop.permute.xlu1 %4321  ;;  %v4572_v39 = vmax.f32 %v16223_v7, %v4300_v40  ;;  %v16250_v40 = vld [vmem:[#allocation11_spill] sm:$0xff]  ;;  %v16253_v7 = vld [vmem:[#allocation34_spill] sm:$0xff] }
 0x43e   : > { %v4583_v31 = vmax.f32 %v16210_v17, %v4322_v38  ;;  %v16224_v38 = vmax.f32 %v13948_v2, 0.0  ;;  %v16225_v17 = vmov 0.0  }
 0x440   : > { %v14181_v51 = vmax.f32 %v4567_v15, %v4583_v31  ;;  %v8287_v15 = vld [vmem:[%s15342_s3 + $0x58] sm:$0xff]  ;;  %v16226_v31 = vld [vmem:[#allocation17_spill] sm:$0xff] }
 0x441   : > { %v4328_v54 = vpop.permute.xlu1 %4327  ;;  %v10179_v2 = vpack.c.bf16 %v8287_v15, %v8286_v48  ;;  %v16257_v48 = vld [vmem:[#allocation46_spill] sm:$0xff]  ;;  %v16258_v15 = vld [vmem:[#allocation52_spill] sm:$0xff] }
 0x442   : > { %9778 = vmatprep.mubr.msk.f32.mxu1 %vm4662_vm2, %v14181_v51  ;;  %v4586_v11 = vmax.f32 %v16213_v18, %v4328_v54  ;;  %v16231_v54 = vld [vmem:[#allocation108_spill] sm:$0xff]  ;;  %v16233_v18 = vld [vmem:[#allocation13_spill] sm:$0xff] }
 0x443   : > { %9779 = vmatmul.mubr.msk.f32.gmra.mrb[122].mxu1 %vm4662_vm2, %v14183_v61 }
 0x444   : > { %v14199_v60 = vmax.f32 %v4570_v47, %v4586_v11  ;;  %v16234_v11 = vld [vmem:[#allocation35_spill] sm:$0xff]  ;;  %v16243_v47 = vld [vmem:[#allocation21_spill] sm:$0xff] }
 0x445   : > { %v4326_v20 = vpop.permute.xlu1 %4325 }
 0x446   : > { %v4585_v33 = vmax.f32 %v16216_v43, %v4326_v20  ;;  %v16235_v20 = vld [vmem:[#allocation14_spill] sm:$0xff]  ;;  %v16239_v43 = vld [vmem:[#allocation16_spill] sm:$0xff] }
 0x448   : > { %v14197_v25 = vmax.f32 %v4569_v6, %v4585_v33  ;;  %v16238_v6 = vld [vmem:[#allocation15_spill] sm:$0xff]  ;;  %v16240_v33 = vld [vmem:[#allocation36_spill] sm:$0xff] }
 0x449   : > { %v4330_v42 = vpop.permute.xlu1 %4329 }
 0x44a   : > { %v4587_v4 = vmax.f32 %v16221_v19, %v4330_v42  ;;  %9781 = vmatprep.mubr.msk.f32.mxu1 %vm4662_vm2, %v14197_v25  ;;  %v16244_v42 = vld [vmem:[#allocation5_spill] sm:$0xff]  ;;  %v16248_v19 = vld [vmem:[#allocation27_spill] sm:$0xff] }
 0x44b   : > { %9782 = vmatmul.mubr.msk.f32.gmra.mrb[124].mxu1 %vm4662_vm2, %v14199_v60 }
 0x44c   : > { %v14209_v16 = vmax.f32 %v4571_v36, %v4587_v4  ;;  %v16247_v36 = vld [vmem:[#allocation7_spill] sm:$0xff]  ;;  %v16249_v4 = vld [vmem:[#allocation30_spill] sm:$0xff] }
 0x44d   : > { %v4332_v1 = vpop.permute.xlu1 %4331 }
 0x44e   : > { %v4588_v8 = vmax.f32 %v16224_v38, %v4332_v1  ;;  %9784 = vmatprep.mubr.msk.f32.mxu1 %vm4662_vm2, %v14209_v16  ;;  %v16251_v1 = vld [vmem:[#allocation9_spill] sm:$0xff]  ;;  %v16255_v38 = vld [vmem:[#allocation42_spill] sm:$0xff] }
 0x450   : > { %v14217_v46 = vmax.f32 %v4572_v39, %v4588_v8  ;;  %v16254_v39 = vld [vmem:[#allocation41_spill] sm:$0xff] }
 0x451   : > { %v16256_v8 = vld [vmem:[#allocation45_spill] sm:$0xff] }
 0x452   : > { %9785 = vmatmul.mubr.msk.f32.gmra.mrb[126].mxu1 %vm4662_vm2, %v14217_v46 }
 0x453   : > { %9795 = vmatprep.mubr.f32.mxu1 %v16225_v17 }
 0x456   : > { %9796 = vmatmul.mubr.f32.vlgmr.msra.gmra.mrb[64].mxu1 %v16225_v17 }
 0x457   : > { %10178 = vmatpush3.bf16.msra.mxu1 %v16226_v31  ;;  %9798 = vmatprep.mubr.f32.mxu1 %v16225_v17  ;;  %v16260_v31 = vld [vmem:[#allocation54_spill] sm:$0xff] }
 0x458   : > { %10180 = vmatprep.subr.bf16.mxu1 %v10179_v2 }
 0x45a   : > { %9799 = vmatmul.mubr.f32.gmra.mrb[66].mxu1 %v16225_v17 }
 0x45b   : > { %9801 = vmatprep.mubr.f32.mxu1 %v16225_v17  ;;  %10182 = vmatpush3.bf16.msra.mxu1 %v10179_v2  ;;  %v16259_v2 = vld [vmem:[#allocation20_spill] sm:$0xff] }
 0x45e   : > { %9802 = vmatmul.mubr.f32.gmra.mrb[68].mxu1 %v16225_v17 }
 0x45f   : > { %9804 = vmatprep.mubr.f32.mxu1 %v16225_v17 }
 0x462   : > { %9805 = vmatmul.mubr.f32.gmra.mrb[70].mxu1 %v16225_v17 }
 0x463   : > { %9807 = vmatprep.mubr.f32.mxu1 %v16225_v17 }
 0x466   : > { %9808 = vmatmul.mubr.f32.gmra.mrb[72].mxu1 %v16225_v17 }
 0x467   : > { %9810 = vmatprep.mubr.f32.mxu1 %v16225_v17 }
 0x46a   : > { %9811 = vmatmul.mubr.f32.gmra.mrb[74].mxu1 %v16225_v17 }
 0x46b   : > { %9813 = vmatprep.mubr.f32.mxu1 %v16225_v17 }
 0x46e   : > { %9814 = vmatmul.mubr.f32.gmra.mrb[76].mxu1 %v16225_v17 }
 0x46f   : > { %9816 = vmatprep.mubr.f32.mxu1 %v16225_v17 }
 0x472   : > { %9817 = vmatmul.mubr.f32.gmra.mrb[78].mxu1 %v16225_v17 }
 0x473   : > { %9819 = vmatprep.mubr.msk.f32.mxu1 %vm4662_vm2, %v16227_v62  ;;  %v16261_v62 = vld [vmem:[#allocation48_spill] sm:$0xff] }
 0x476   : > { %9820 = vmatmul.mubr.msk.f32.gmra.mrb[80].mxu1 %vm4662_vm2, %v16228_v14 }
 0x477   : > { %9822 = vmatprep.mubr.msk.f32.mxu1 %vm4662_vm2, %v16229_v22  ;;  %v6573_v22 = vld [vmem:[%s15344_s5 + $0x20] sm:$0xff] }
 0x47a   : > { %9823 = vmatmul.mubr.msk.f32.gmra.mrb[82].mxu1 %vm4662_vm2, %v16230_v28  ;;  %v6574_v28 = vld [vmem:[%s15344_s5 + $0x28] sm:$0xff] }
 0x47b   : > { %9825 = vmatprep.mubr.msk.f32.mxu1 %vm4662_vm2, %v16231_v54 }
 0x47e   : > { %9826 = vmatmul.mubr.msk.f32.gmra.mrb[84].mxu1 %vm4662_vm2, %v16232_v13 }
 0x47f   : > { %9828 = vmatprep.mubr.msk.f32.mxu1 %vm4662_vm2, %v16233_v18  ;;  %v10191_v18 = vpack.c.bf16 %v6574_v28, %v6573_v22 }
 0x482   : > { %9829 = vmatmul.mubr.msk.f32.gmra.mrb[86].mxu1 %vm4662_vm2, %v16234_v11 }
 0x483   : > { %9831 = vmatprep.mubr.msk.f32.mxu1 %vm4662_vm2, %v16235_v20 }
 0x486   : > { %9832 = vmatmul.mubr.msk.f32.gmra.mrb[88].mxu1 %vm4662_vm2, %v16236_v44  ;;  %v6575_v44 = vld [vmem:[%s15344_s5 + $0x30] sm:$0xff] }
 0x487   : > { %9834 = vmatprep.mubr.msk.f32.mxu1 %vm4662_vm2, %v16237_v41  ;;  %v6576_v41 = vld [vmem:[%s15344_s5 + $0x38] sm:$0xff] }
 0x48a   : > { %9835 = vmatmul.mubr.msk.f32.gmra.mrb[90].mxu1 %vm4662_vm2, %v16238_v6 }
 0x48b   : > { %9837 = vmatprep.mubr.msk.f32.mxu1 %vm4662_vm2, %v16239_v43 }
 0x48e   : > { %9838 = vmatmul.mubr.msk.f32.gmra.mrb[92].mxu1 %vm4662_vm2, %v16240_v33  ;;  %v10195_v33 = vpack.c.bf16 %v6576_v41, %v6575_v44 }
 0x48f   : > { %9840 = vmatprep.mubr.msk.f32.mxu1 %vm4662_vm2, %v16241_v23 }
 0x492   : > { %9841 = vmatmul.mubr.msk.f32.gmra.mrb[94].mxu1 %vm4662_vm2, %v16242_v26 }
 0x493   : > { %9843 = vmatprep.mubr.msk.f32.mxu1 %vm4662_vm2, %v16243_v47 }
 0x496   : > { %9844 = vmatmul.mubr.msk.f32.gmra.mrb[96].mxu1 %vm4662_vm2, %v16244_v42 }
 0x497   : > { %9846 = vmatprep.mubr.msk.f32.mxu1 %vm4662_vm2, %v16245_v29 }
 0x49a   : > { %9847 = vmatmul.mubr.msk.f32.gmra.mrb[98].mxu1 %vm4662_vm2, %v16246_v35 }
 0x49b   : > { %9849 = vmatprep.mubr.msk.f32.mxu1 %vm4662_vm2, %v16247_v36 }
 0x49e   : > { %9850 = vmatmul.mubr.msk.f32.gmra.mrb[100].mxu1 %vm4662_vm2, %v16248_v19 }
 0x49f   : > { %9852 = vmatprep.mubr.msk.f32.mxu1 %vm4662_vm2, %v16249_v4 }
 0x4a2   : > { %9853 = vmatmul.mubr.msk.f32.gmra.mrb[102].mxu1 %vm4662_vm2, %v16250_v40 }
 0x4a3   : > { %9855 = vmatprep.mubr.msk.f32.mxu1 %vm4662_vm2, %v16251_v1 }
 0x4a6   : > { %9856 = vmatmul.mubr.msk.f32.gmra.mrb[104].mxu1 %vm4662_vm2, %v16252_v34 }
 0x4a7   : > { %9858 = vmatprep.mubr.msk.f32.mxu1 %vm4662_vm2, %v16253_v7 }
 0x4aa   : > { %9859 = vmatmul.mubr.msk.f32.gmra.mrb[106].mxu1 %vm4662_vm2, %v16254_v39 }
 0x4ab   : > { %9861 = vmatprep.mubr.msk.f32.mxu1 %vm4662_vm2, %v16255_v38 }
 0x4ae   : > { %9862 = vmatmul.mubr.msk.f32.gmra.mrb[108].mxu1 %vm4662_vm2, %v16256_v8 }
 0x4af   : > { %9864 = vmatprep.mubr.msk.f32.mxu1 %vm4662_vm2, %v16257_v48 }
 0x4b2   : > { %9865 = vmatmul.mubr.msk.f32.gmra.mrb[110].mxu1 %vm4662_vm2, %v16258_v15 }
 0x4b3   : > { %9867 = vmatprep.mubr.msk.f32.mxu1 %vm4662_vm2, %v16259_v2 }
 0x4b6   : > { %9868 = vmatmul.mubr.msk.f32.gmra.mrb[112].mxu1 %vm4662_vm2, %v16260_v31 }
 0x4b7   : > { %9870 = vmatprep.mubr.msk.f32.mxu1 %vm4662_vm2, %v13985_v30 }
 0x4ba   : > { %9871 = vmatmul.mubr.msk.f32.gmra.mrb[114].mxu1 %vm4662_vm2, %v16261_v62 }
 0x4bb   : > { %9873 = vmatprep.mubr.msk.f32.mxu1 %vm4662_vm2, %v14003_v45 }
 0x4be   : > { %9874 = vmatmul.mubr.msk.f32.gmra.mrb[116].mxu1 %vm4662_vm2, %v14005_v27 }
 0x4bf   : > { %9876 = vmatprep.mubr.msk.f32.mxu1 %vm4662_vm2, %v14020_v59 }
 0x4c2   : > { %9877 = vmatmul.mubr.msk.f32.gmra.mrb[118].mxu1 %vm4662_vm2, %v14022_v37 }
 0x4c3   : > { %9879 = vmatprep.mubr.msk.f32.mxu1 %vm4662_vm2, %v14037_v3 }
 0x4c6   : > { %9880 = vmatmul.mubr.msk.f32.gmra.mrb[120].mxu1 %vm4662_vm2, %v14039_v0 }
 0x4c7   : > { %9882 = vmatprep.mubr.msk.f32.mxu1 %vm4662_vm2, %v14053_v52 }
 0x4ca   : > { %9883 = vmatmul.mubr.msk.f32.gmra.mrb[122].mxu1 %vm4662_vm2, %v14055_v32 }
 0x4cb   : > { %9885 = vmatprep.mubr.msk.f32.mxu1 %vm4662_vm2, %v14069_v5 }
 0x4ce   : > { %9886 = vmatmul.mubr.msk.f32.gmra.mrb[124].mxu1 %vm4662_vm2, %v14071_v49 }
 0x4cf   : > { %9888 = vmatprep.mubr.msk.f32.mxu1 %vm4662_vm2, %v14085_v10 }
 0x4d2   : > { %9889 = vmatmul.mubr.msk.f32.gmra.mrb[126].mxu1 %vm4662_vm2, %v14087_v56 }
 0x4d3   : > { %9899 = vmatprep.mubr.msk.f32.mxu1 %vm4662_vm2, %v16243_v47 }
 0x4d6   : > { %9900 = vmatmul.mubr.msk.f32.vlgmr.msra.gmra.mrb[64].mxu1 %vm4662_vm2, %v16244_v42 }
 0x4d7   : > { %9902 = vmatprep.mubr.msk.f32.mxu1 %vm4662_vm2, %v16245_v29 }
 0x4da   : > { %9903 = vmatmul.mubr.msk.f32.gmra.mrb[66].mxu1 %vm4662_vm2, %v16246_v35 }
 0x4db   : > { %9905 = vmatprep.mubr.msk.f32.mxu1 %vm4662_vm2, %v16247_v36 }
 0x4de   : > { %9906 = vmatmul.mubr.msk.f32.gmra.mrb[68].mxu1 %vm4662_vm2, %v16248_v19 }
 0x4df   : > { %9908 = vmatprep.mubr.msk.f32.mxu1 %vm4662_vm2, %v16249_v4 }
 0x4e2   : > { %9909 = vmatmul.mubr.msk.f32.gmra.mrb[70].mxu1 %vm4662_vm2, %v16250_v40 }
 0x4e3   : > { %9911 = vmatprep.mubr.msk.f32.mxu1 %vm4662_vm2, %v16251_v1 }
 0x4e6   : > { %9912 = vmatmul.mubr.msk.f32.gmra.mrb[72].mxu1 %vm4662_vm2, %v16252_v34 }
 0x4e7   : > { %9914 = vmatprep.mubr.msk.f32.mxu1 %vm4662_vm2, %v16253_v7 }
 0x4ea   : > { %9915 = vmatmul.mubr.msk.f32.gmra.mrb[74].mxu1 %vm4662_vm2, %v16254_v39 }
 0x4eb   : > { %9917 = vmatprep.mubr.msk.f32.mxu1 %vm4662_vm2, %v16255_v38 }
 0x4ee   : > { %9918 = vmatmul.mubr.msk.f32.gmra.mrb[76].mxu1 %vm4662_vm2, %v16256_v8 }
 0x4ef   : > { %9920 = vmatprep.mubr.msk.f32.mxu1 %vm4662_vm2, %v16257_v48 }
 0x4f2   : > { %9921 = vmatmul.mubr.msk.f32.gmra.mrb[78].mxu1 %vm4662_vm2, %v16258_v15 }
 0x4f3   : > { %9923 = vmatprep.mubr.msk.f32.mxu1 %vm4662_vm2, %v16259_v2 }
 0x4f6   : > { %9924 = vmatmul.mubr.msk.f32.gmra.mrb[80].mxu1 %vm4662_vm2, %v16260_v31 }
 0x4f7   : > { %9926 = vmatprep.mubr.msk.f32.mxu1 %vm4662_vm2, %v13985_v30  ;;  %v6569_v30 = vld [vmem:[%s15344_s5] sm:$0xff] }
 0x4fa   : > { %9927 = vmatmul.mubr.msk.f32.gmra.mrb[82].mxu1 %vm4662_vm2, %v16261_v62 }
 0x4fb   : > { %9929 = vmatprep.mubr.msk.f32.mxu1 %vm4662_vm2, %v14003_v45  ;;  %v6570_v45 = vld [vmem:[%s15344_s5 + $0x8] sm:$0xff] }
 0x4fe   : > { %9930 = vmatmul.mubr.msk.f32.gmra.mrb[84].mxu1 %vm4662_vm2, %v14005_v27  ;;  %v10183_v27 = vpack.c.bf16 %v6570_v45, %v6569_v30 }
 0x4ff   : > { %9932 = vmatprep.mubr.msk.f32.mxu1 %vm4662_vm2, %v14020_v59  ;;  %v6571_v59 = vld [vmem:[%s15344_s5 + $0x10] sm:$0xff] }
 0x500   : > { %10184 = vmatprep.subr.bf16.mxu1 %v10183_v27 }
 0x501   : > { %10186 = vmatpush3.bf16.msra.mxu1 %v10183_v27 }
 0x502   : > { %9933 = vmatmul.mubr.msk.f32.gmra.mrb[86].mxu1 %vm4662_vm2, %v14022_v37  ;;  %v6572_v37 = vld [vmem:[%s15344_s5 + $0x18] sm:$0xff] }
 0x503   : > { %9935 = vmatprep.mubr.msk.f32.mxu1 %vm4662_vm2, %v14037_v3  ;;  %v10187_v3 = vpack.c.bf16 %v6572_v37, %v6571_v59 }
 0x505   : > { %10188 = vmatprep.subr.bf16.mxu1 %v10187_v3 }
 0x506   : > { %9936 = vmatmul.mubr.msk.f32.gmra.mrb[88].mxu1 %vm4662_vm2, %v14039_v0  ;;  %v14467_v0 = vld [vmem:[%s15343_s4] ss:$0 sm:$0xff] }
 0x507   : > { %9938 = vmatprep.mubr.msk.f32.mxu1 %vm4662_vm2, %v14053_v52  ;;  %10190 = vmatpush3.bf16.msra.mxu1 %v10187_v3 }
 0x508   : > { %10192 = vmatprep.subr.bf16.mxu1 %v10191_v18 }
 0x50a   : > { %9939 = vmatmul.mubr.msk.f32.gmra.mrb[90].mxu1 %vm4662_vm2, %v14055_v32 }
 0x50b   : > { %9941 = vmatprep.mubr.msk.f32.mxu1 %vm4662_vm2, %v14069_v5  ;;  %10194 = vmatpush3.bf16.msra.mxu1 %v10191_v18 }
 0x50c   : > { %10196 = vmatprep.subr.bf16.mxu1 %v10195_v33 }
 0x50e   : > { %9942 = vmatmul.mubr.msk.f32.gmra.mrb[92].mxu1 %vm4662_vm2, %v14071_v49 }
 0x50f   : > { %9944 = vmatprep.mubr.msk.f32.mxu1 %vm4662_vm2, %v14085_v10  ;;  %10198 = vmatpush3.bf16.msra.mxu1 %v10195_v33 }
 0x512   : > { %9945 = vmatmul.mubr.msk.f32.gmra.mrb[94].mxu1 %vm4662_vm2, %v14087_v56 }
 0x513   : > { %9947 = vmatprep.mubr.msk.f32.mxu1 %vm4662_vm2, %v14101_v57 }
 0x516   : > { %9948 = vmatmul.mubr.msk.f32.gmra.mrb[96].mxu1 %vm4662_vm2, %v14103_v63 }
 0x517   : > { %9950 = vmatprep.mubr.msk.f32.mxu1 %vm4662_vm2, %v14117_v21 }
 0x51a   : > { %9951 = vmatmul.mubr.msk.f32.gmra.mrb[98].mxu1 %vm4662_vm2, %v14119_v50 }
 0x51b   : > { %9953 = vmatprep.mubr.msk.f32.mxu1 %vm4662_vm2, %v14133_v9 }
 0x51e   : > { %9954 = vmatmul.mubr.msk.f32.gmra.mrb[100].mxu1 %vm4662_vm2, %v14135_v53 }
 0x51f   : > { %9956 = vmatprep.mubr.msk.f32.mxu1 %vm4662_vm2, %v14149_v12 }
 0x522   : > { %9957 = vmatmul.mubr.msk.f32.gmra.mrb[102].mxu1 %vm4662_vm2, %v14151_v55 }
 0x523   : > { %9959 = vmatprep.mubr.msk.f32.mxu1 %vm4662_vm2, %v14165_v58 }
 0x526   : > { %9960 = vmatmul.mubr.msk.f32.gmra.mrb[104].mxu1 %vm4662_vm2, %v14167_v24 }
 0x527   : > { %9962 = vmatprep.mubr.msk.f32.mxu1 %vm4662_vm2, %v14181_v51 }
 0x52a   : > { %9963 = vmatmul.mubr.msk.f32.gmra.mrb[106].mxu1 %vm4662_vm2, %v14183_v61 }
 0x52b   : > { %9965 = vmatprep.mubr.msk.f32.mxu1 %vm4662_vm2, %v14197_v25 }
 0x52e   : > { %9966 = vmatmul.mubr.msk.f32.gmra.mrb[108].mxu1 %vm4662_vm2, %v14199_v60 }
 0x52f   : > { %9968 = vmatprep.mubr.msk.f32.mxu1 %vm4662_vm2, %v14209_v16 }
 0x532   : > { %9969 = vmatmul.mubr.msk.f32.gmra.mrb[110].mxu1 %vm4662_vm2, %v14217_v46 }
 0x533   : > { %9971 = vmatprep.mubr.f32.mxu1 %v16225_v17 }
 0x536   : > { %9972 = vmatmul.mubr.f32.gmra.mrb[112].mxu1 %v16225_v17 }
 0x537   : > { %9974 = vmatprep.mubr.f32.mxu1 %v16225_v17 }
 0x53a   : > { %9975 = vmatmul.mubr.f32.gmra.mrb[114].mxu1 %v16225_v17 }
 0x53b   : > { %9977 = vmatprep.mubr.f32.mxu1 %v16225_v17 }
 0x53e   : > { %9978 = vmatmul.mubr.f32.gmra.mrb[116].mxu1 %v16225_v17 }
 0x53f   : > { %9980 = vmatprep.mubr.f32.mxu1 %v16225_v17 }
 0x542   : > { %9981 = vmatmul.mubr.f32.gmra.mrb[118].mxu1 %v16225_v17 }
 0x543   : > { %9983 = vmatprep.mubr.f32.mxu1 %v16225_v17 }
 0x546   : > { %9984 = vmatmul.mubr.f32.gmra.mrb[120].mxu1 %v16225_v17 }
 0x547   : > { %9986 = vmatprep.mubr.f32.mxu1 %v16225_v17 }
 0x54a   : > { %9987 = vmatmul.mubr.f32.gmra.mrb[122].mxu1 %v16225_v17 }
 0x54b   : > { %9989 = vmatprep.mubr.f32.mxu1 %v16225_v17 }
 0x54e   : > { %9990 = vmatmul.mubr.f32.gmra.mrb[124].mxu1 %v16225_v17 }
 0x54f   : > { %9992 = vmatprep.mubr.f32.mxu1 %v16225_v17 }
 0x552   : > { %9993 = vmatmul.mubr.f32.gmra.mrb[126].mxu1 %v16225_v17 }
 0x5a9   : > { %v9901_v52 = vpop.f32.mrb[64].mxu1 }
 0x5aa   : > { %v14470_v32 = vadd.f32 %v9901_v52, %v14467_v0  ;;  %v5698_v5 = vpop.f32.mrb[65].mxu1 }
 0x5ab   : > { %v14474_v10 = vadd.f32 %v14467_v0, %v5698_v5 }
 0x5ac   : > { %v15684_v49 = vmax.f32 %v14470_v32, 0.0 }
 0x5ad   : > { %v9904_v56 = vpop.f32.mrb[66].mxu1  ;;  %v15688_v63 = vmax.f32 %v14474_v10, 0.0 }
 0x5ae   : > { %6282 = vrot.lane.b32.xlu0 %v15684_v49, %s10809_s12  ;;  %v5708_v57 = vpop.f32.mrb[67].mxu1  ;;  %v14481_v21 = vadd.f32 %v9904_v56, %v14467_v0 }
 0x5af   : > { %v14488_v12 = vadd.f32 %v14467_v0, %v5708_v57 }
 0x5b0   : > { %v15676_v53 = vmax.f32 %v14481_v21, 0.0 }
 0x5b1   : > { %v9907_v50 = vpop.f32.mrb[68].mxu1  ;;  %v15680_v24 = vmax.f32 %v14488_v12, 0.0 }
 0x5b2   : > { %6280 = vrot.lane.b32.xlu0 %v15688_v63, %s10809_s12  ;;  %v5718_v9 = vpop.f32.mrb[69].mxu1  ;;  %v14495_v51 = vadd.f32 %v9907_v50, %v14467_v0 }
 0x5b3   : > { %v14502_v16 = vadd.f32 %v14467_v0, %v5718_v9 }
 0x5b4   : > { %v15668_v60 = vmax.f32 %v14495_v51, 0.0 }
 0x5b5   : > { %v9910_v55 = vpop.f32.mrb[70].mxu1  ;;  %v15672_v54 = vmax.f32 %v14502_v16, 0.0 }
 0x5b6   : > { %6286 = vrot.lane.b32.xlu0 %v15676_v53, %s10809_s12  ;;  %v5728_v58 = vpop.f32.mrb[71].mxu1  ;;  %v14515_v13 = vadd.f32 %v9910_v55, %v14467_v0 }
 0x5b7   : > { %v14528_v43 = vadd.f32 %v14467_v0, %v5728_v58 }
 0x5b8   : > { %v15661_v6 = vmax.f32 %v14515_v13, 0.0 }
 0x5b9   : > { %v9913_v61 = vpop.f32.mrb[72].mxu1  ;;  %v15664_v47 = vmax.f32 %v14528_v43, 0.0 }
 0x5ba   : > { %6284 = vrot.lane.b32.xlu0 %v15680_v24, %s10809_s12  ;;  %v5738_v25 = vpop.f32.mrb[73].mxu1  ;;  %v14535_v42 = vadd.f32 %v9913_v61, %v14467_v0 }
 0x5bb   : > { %v14545_v4 = vadd.f32 %v14467_v0, %v5738_v25 }
 0x5bc   : > { %v15655_v19 = vmax.f32 %v14535_v42, 0.0 }
 0x5bd   : > { %v9916_v46 = vpop.f32.mrb[74].mxu1  ;;  %v15656_v39 = vmax.f32 %v14545_v4, 0.0 }
 0x5be   : > { %6290 = vrot.lane.b32.xlu0 %v15668_v60, %s10809_s12  ;;  %v5748_v14 = vpop.f32.mrb[75].mxu1  ;;  %v14559_v38 = vadd.f32 %v9916_v46, %v14467_v0 }
 0x5bf   : > { %v14573_v62 = vadd.f32 %v14467_v0, %v5748_v14 }
 0x5c0   : > { %v15652_v31 = vmax.f32 %v14559_v38, 0.0 }
 0x5c1   : > { %v9919_v11 = vpop.f32.mrb[76].mxu1  ;;  %v15654_v37 = vmax.f32 %v14573_v62, 0.0 }
 0x5c2   : > { %6288 = vrot.lane.b32.xlu0 %v15672_v54, %s10809_s12  ;;  %v5758_v20 = vpop.f32.mrb[77].mxu1  ;;  %v14587_v3 = vadd.f32 %v9919_v11, %v14467_v0 }
 0x5c3   : > { %v14601_v9 = vadd.f32 %v14467_v0, %v5758_v20 }
 0x5c4   : > { %v15650_v50 = vmax.f32 %v14587_v3, 0.0 }
 0x5c5   : > { %v9922_v23 = vpop.f32.mrb[78].mxu1  ;;  %v15651_v46 = vmax.f32 %v14601_v9, 0.0 }
 0x5c6   : > { %6294 = vrot.lane.b32.xlu0 %v15661_v6, %s10809_s12  ;;  %v5768_v26 = vpop.f32.mrb[79].mxu1  ;;  %v14615_v14 = vadd.f32 %v9922_v23, %v14467_v0 }
 0x5c7   : > { %v14629_v44 = vadd.f32 %v14467_v0, %v5768_v26 }
 0x5c8   : > { %v15648_v20 = vmax.f32 %v14615_v14, 0.0 }
 0x5c9   : > { %v9925_v29 = vpop.f32.mrb[80].mxu1 }
 0x5ca   : > { %v14538_v35 = vadd.f32 %v9925_v29, %v14467_v0  ;;  %6292 = vrot.lane.b32.xlu0 %v15664_v47, %s10809_s12  ;;  %v5778_v36 = vpop.f32.mrb[81].mxu1 }
 0x5cb   : > { %v14549_v1 = vadd.f32 %v14467_v0, %v5778_v36  ;;  %v15649_v36 = vmax.f32 %v14629_v44, 0.0 }
 0x5cc   : > { %v15689_v40 = vmax.f32 %v14538_v35, 0.0 }
 0x5cd   : > { %v9928_v34 = vpop.f32.mrb[82].mxu1  ;;  %v15685_v8 = vmax.f32 %v14549_v1, 0.0 }
 0x5ce   : > { %6298 = vrot.lane.b32.xlu0 %v15655_v19, %s10809_s12  ;;  %6314 = vrot.lane.b32.xlu1 %v15689_v40, %s10809_s12  ;;  %v5788_v7 = vpop.f32.mrb[83].mxu1  ;;  %v14563_v48 = vadd.f32 %v9928_v34, %v14467_v0 }
 0x5cf   : > { %v14577_v45 = vadd.f32 %v14467_v0, %v5788_v7 }
 0x5d0   : > { %v15681_v30 = vmax.f32 %v14563_v48, 0.0 }
 0x5d1   : > { %v9931_v15 = vpop.f32.mrb[84].mxu1  ;;  %v15677_v52 = vmax.f32 %v14577_v45, 0.0 }
 0x5d2   : > { %6296 = vrot.lane.b32.xlu0 %v15656_v39, %s10809_s12  ;;  %6312 = vrot.lane.b32.xlu1 %v15685_v8, %s10809_s12  ;;  %v5798_v2 = vpop.f32.mrb[85].mxu1  ;;  %v14591_v5 = vadd.f32 %v9931_v15, %v14467_v0 }
 0x5d3   : > { %v14605_v58 = vadd.f32 %v14467_v0, %v5798_v2 }
 0x5d4   : > { %v15673_v55 = vmax.f32 %v14591_v5, 0.0 }
 0x5d5   : > { %v9934_v27 = vpop.f32.mrb[86].mxu1  ;;  %v15669_v22 = vmax.f32 %v14605_v58, 0.0 }
 0x5d6   : > { %6302 = vrot.lane.b32.xlu0 %v15652_v31, %s10809_s12  ;;  %6318 = vrot.lane.b32.xlu1 %v15681_v30, %s10809_s12  ;;  %v5808_v59 = vpop.f32.mrb[87].mxu1  ;;  %v14619_v28 = vadd.f32 %v9934_v27, %v14467_v0 }
 0x5d7   : > { %v14633_v33 = vadd.f32 %v14467_v0, %v5808_v59 }
 0x5d8   : > { %v15665_v41 = vmax.f32 %v14619_v28, 0.0 }
 0x5d9   : > { %v9937_v56 = vpop.f32.mrb[88].mxu1  ;;  %v15663_v26 = vmax.f32 %v14633_v33, 0.0 }
 0x5da   : > { %6300 = vrot.lane.b32.xlu0 %v15654_v37, %s10809_s12  ;;  %6316 = vrot.lane.b32.xlu1 %v15677_v52, %s10809_s12  ;;  %v5818_v57 = vpop.f32.mrb[89].mxu1  ;;  %v14644_v34 = vadd.f32 %v9937_v56, %v14467_v0 }
 0x5db   : > { %v14657_v59 = vadd.f32 %v14467_v0, %v5818_v57 }
 0x5dc   : > { %v15659_v27 = vmax.f32 %v14644_v34, 0.0 }
 0x5dd   : > { %v9940_v61 = vpop.f32.mrb[90].mxu1 }
 0x5de   : > { %6306 = vrot.lane.b32.xlu0 %v15650_v50, %s10809_s12  ;;  %6322 = vrot.lane.b32.xlu1 %v15673_v55, %s10809_s12  ;;  %v5828_v25 = vpop.f32.mrb[91].mxu1  ;;  %v15658_v50 = vmax.f32 %v14657_v59, 0.0  ;;  %v14671_v57 = vadd.f32 %v9940_v61, %v14467_v0 }
 0x5df   : > { %v14684_v37 = vadd.f32 %v14467_v0, %v5828_v25 }
 0x5e0   : > { %v15660_v61 = vmax.f32 %v14671_v57, 0.0 }
 0x5e1   : > { %v9943_v18 = vpop.f32.mrb[92].mxu1  ;;  %v15667_v25 = vmax.f32 %v14684_v37, 0.0 }
 0x5e2   : > { %6304 = vrot.lane.b32.xlu0 %v15651_v46, %s10809_s12  ;;  %6320 = vrot.lane.b32.xlu1 %v15669_v22, %s10809_s12  ;;  %v5838_v11 = vpop.f32.mrb[93].mxu1 }
 0x5e5   : > { %v9946_v23 = vpop.f32.mrb[94].mxu1 }
 0x5e6   : > { %6310 = vrot.lane.b32.xlu0 %v15648_v20, %s10809_s12  ;;  %6326 = vrot.lane.b32.xlu1 %v15665_v41, %s10809_s12  ;;  %v5848_v29 = vpop.f32.mrb[95].mxu1  ;;  %v14722_v41 = vadd.f32 %v14467_v0, %v5838_v11  ;;  %v14736_v11 = vadd.f32 %v9946_v23, %v14467_v0 }
 0x5e7   : > { %v14750_v23 = vadd.f32 %v14467_v0, %v5848_v29 }
 0x5e9   : > { %v9949_v7 = vpop.f32.mrb[96].mxu1 }
 0x5ea   : > { %v14647_v15 = vadd.f32 %v9949_v7, %v14467_v0  ;;  %6308 = vrot.lane.b32.xlu0 %v15649_v36, %s10809_s12  ;;  %6324 = vrot.lane.b32.xlu1 %v15663_v26, %s10809_s12  ;;  %v5858_v2 = vpop.f32.mrb[97].mxu1 }
 0x5eb   : > { %v14661_v20 = vadd.f32 %v14467_v0, %v5858_v2 }
 0x5ec   : > { %v15653_v56 = vmax.f32 %v14647_v15, 0.0 }
 0x5ed   : > { %v9952_v7 = vpop.f32.mrb[98].mxu1  ;;  %v15657_v46 = vmax.f32 %v14661_v20, 0.0 }
 0x5ee   : > { %6330 = vrot.lane.b32.xlu1 %v15659_v27, %s10809_s12  ;;  %6346 = vrot.lane.b32.xlu0 %v15653_v56, %s10809_s12  ;;  %v5868_v36 = vpop.f32.mrb[99].mxu1  ;;  %v14675_v2 = vadd.f32 %v9952_v7, %v14467_v0  ;;  %v14705_v27 = vadd.f32 %v9943_v18, %v14467_v0 }
 0x5ef   : > { %v14689_v7 = vadd.f32 %v14467_v0, %v5868_v36  ;;  %v8355_v36 = vld [vmem:[%s15344_s5 + $0x48] sm:$0xff] }
 0x5f0   : > { %16262 = vst [vmem:[#allocation49_spill] sm:$0xff] %v14675_v2  ;;  %v15662_v19 = vmax.f32 %v14675_v2, 0.0  ;;  %v15671_v18 = vmax.f32 %v14705_v27, 0.0  ;;  %v16287_v2 = vmax.f32 %v14549_v1, 0.0 }
 0x5f1   : > { %v9955_v31 = vpop.f32.mrb[100].mxu1 }
 0x5f2   : > { %6328 = vrot.lane.b32.xlu1 %v15658_v50, %s10809_s12  ;;  %6344 = vrot.lane.b32.xlu0 %v15657_v46, %s10809_s12  ;;  %v5878_v56 = vpop.f32.mrb[101].mxu1  ;;  %v8354_v50 = vld [vmem:[%s15344_s5 + $0x40] sm:$0xff]  ;;  %v14709_v6 = vadd.f32 %v9955_v31, %v14467_v0 }
 0x5f4   : > { %16263 = vst [vmem:[#allocation51_spill] sm:$0xff] %v14709_v6  ;;  %v15670_v31 = vmax.f32 %v14709_v6, 0.0 }
 0x5f5   : > { %v9958_v39 = vpop.f32.mrb[102].mxu1 }
 0x5f6   : > { %6334 = vrot.lane.b32.xlu1 %v15660_v61, %s10809_s12  ;;  %6350 = vrot.lane.b32.xlu0 %v15662_v19, %s10809_s12  ;;  %v5888_v46 = vpop.f32.mrb[103].mxu1  ;;  %v15666_v61 = vmax.f32 %v14689_v7, 0.0  ;;  %v14711_v19 = vpack.c.bf16 %v8355_v36, %v8354_v50  ;;  %v14726_v50 = vadd.f32 %v14467_v0, %v5878_v56  ;;  %v14740_v56 = vadd.f32 %v9958_v39, %v14467_v0 }
 0x5f7   : > { %v14754_v39 = vadd.f32 %v14467_v0, %v5888_v46 }
 0x5f8   : > { %10200 = vmatprep.subr.bf16.mxu1 %v14711_v19  ;;  %16264 = vst [vmem:[#allocation53_spill] sm:$0xff] %v14726_v50  ;;  %v15674_v60 = vmax.f32 %v14726_v50, 0.0  ;;  %16265 = vst [vmem:[#allocation58_spill] sm:$0xff] %v14740_v56  ;;  %v15678_v54 = vmax.f32 %v14740_v56, 0.0 }
 0x5f9   : > { %v9961_v26 = vpop.f32.mrb[104].mxu1  ;;  %16266 = vst [vmem:[#allocation24_spill] sm:$0xff] %v14754_v39  ;;  %v15682_v29 = vmax.f32 %v14754_v39, 0.0 }
 0x5fa   : > { %6332 = vrot.lane.b32.xlu1 %v15667_v25, %s10809_s12  ;;  %6348 = vrot.lane.b32.xlu0 %v15666_v61, %s10809_s12  ;;  %v5898_v47 = vpop.f32.mrb[105].mxu1  ;;  %v15675_v25 = vmax.f32 %v14722_v41, 0.0  ;;  %v14765_v53 = vadd.f32 %v9961_v26, %v14467_v0 }
 0x5fb   : > { %v14778_v24 = vadd.f32 %v14467_v0, %v5898_v47 }
 0x5fc   : > { %16267 = vst [vmem:[#allocation28_spill] sm:$0xff] %v14765_v53 }
 0x5fd   : > { %v9964_v36 = vpop.f32.mrb[106].mxu1  ;;  %16268 = vst [vmem:[#allocation62_spill] sm:$0xff] %v14778_v24 }
 0x5fe   : > { %6338 = vrot.lane.b32.xlu1 %v15671_v18, %s10809_s12  ;;  %6354 = vrot.lane.b32.xlu0 %v15670_v31, %s10809_s12  ;;  %v5908_v61 = vpop.f32.mrb[107].mxu1  ;;  %v15679_v18 = vmax.f32 %v14736_v11, 0.0  ;;  %v14792_v47 = vadd.f32 %v9964_v36, %v14467_v0 }
 0x5ff   : > { %v14806_v36 = vadd.f32 %v14467_v0, %v5908_v61 }
 0x600   : > { %16269 = vst [vmem:[#allocation56_spill] sm:$0xff] %v14792_v47 }
 0x601   : > { %v9967_v22 = vpop.f32.mrb[108].mxu1  ;;  %16270 = vst [vmem:[#allocation57_spill] sm:$0xff] %v14806_v36 }
 0x602   : > { %6336 = vrot.lane.b32.xlu1 %v15675_v25, %s10809_s12  ;;  %6352 = vrot.lane.b32.xlu0 %v15674_v60, %s10809_s12  ;;  %v5918_v31 = vpop.f32.mrb[109].mxu1  ;;  %v15683_v25 = vmax.f32 %v14750_v23, 0.0  ;;  %v14820_v61 = vadd.f32 %v9967_v22, %v14467_v0 }
 0x603   : > { %v14834_v22 = vadd.f32 %v14467_v0, %v5918_v31 }
 0x604   : > { %16272 = vst [vmem:[#allocation61_spill] sm:$0xff] %v14820_v61 }
 0x605   : > { %v9970_v55 = vpop.f32.mrb[110].mxu1  ;;  %16274 = vst [vmem:[#allocation40_spill] sm:$0xff] %v14834_v22 }
 0x606   : > { %6342 = vrot.lane.b32.xlu1 %v15679_v18, %s10809_s12  ;;  %6358 = vrot.lane.b32.xlu0 %v15678_v54, %s10809_s12  ;;  %v5928_v60 = vpop.f32.mrb[111].mxu1  ;;  %v15686_v18 = vmax.f32 %v14765_v53, 0.0 }
 0x607   : > { %v14848_v31 = vadd.f32 %v14467_v0, %v5928_v60 }
 0x609   : > { %v9973_v52 = vpop.f32.mrb[112].mxu1  ;;  %16276 = vst [vmem:[#allocation32_spill] sm:$0xff] %v14848_v31  ;;  %v15711_v60 = vmax.f32 %v14848_v31, 0.0 }
 0x60a   : > { %v14768_v46 = vadd.f32 %v9973_v52, %v14467_v0  ;;  %6340 = vrot.lane.b32.xlu1 %v15683_v25, %s10809_s12  ;;  %6356 = vrot.lane.b32.xlu0 %v15682_v29, %s10809_s12  ;;  %v5938_v54 = vpop.f32.mrb[113].mxu1  ;;  %v15690_v25 = vmax.f32 %v14778_v24, 0.0 }
 0x60b   : > { %v14782_v30 = vadd.f32 %v14467_v0, %v5938_v54 }
 0x60c   : > { %v15687_v26 = vmax.f32 %v14768_v46, 0.0 }
 0x60d   : > { %v9976_v52 = vpop.f32.mrb[114].mxu1  ;;  %v15691_v49 = vmax.f32 %v14782_v30, 0.0 }
 0x60e   : > { %6362 = vrot.lane.b32.xlu0 %v15686_v18, %s10809_s12  ;;  %6378 = vrot.lane.b32.xlu1 %v15687_v26, %s10809_s12  ;;  %v5948_v29 = vpop.f32.mrb[115].mxu1  ;;  %v14796_v54 = vadd.f32 %v9976_v52, %v14467_v0  ;;  %v15694_v26 = vmax.f32 %v14792_v47, 0.0 }
 0x60f   : > { %v14810_v52 = vadd.f32 %v14467_v0, %v5948_v29 }
 0x610   : > { %v15695_v63 = vmax.f32 %v14796_v54, 0.0 }
 0x611   : > { %v9979_v8 = vpop.f32.mrb[116].mxu1  ;;  %16271 = vst [vmem:[#allocation60_spill] sm:$0xff] %v14810_v52  ;;  %v15699_v17 = vmax.f32 %v14810_v52, 0.0 }
 0x612   : > { %6360 = vrot.lane.b32.xlu0 %v15690_v25, %s10809_s12  ;;  %6376 = vrot.lane.b32.xlu1 %v15691_v49, %s10809_s12  ;;  %v5958_v18 = vpop.f32.mrb[117].mxu1  ;;  %v15698_v49 = vmax.f32 %v14806_v36, 0.0  ;;  %v14824_v29 = vadd.f32 %v9979_v8, %v14467_v0 }
 0x613   : > { %v14838_v8 = vadd.f32 %v14467_v0, %v5958_v18 }
 0x614   : > { %16273 = vst [vmem:[#allocation66_spill] sm:$0xff] %v14824_v29  ;;  %v15704_v47 = vmax.f32 %v14824_v29, 0.0 }
 0x615   : > { %v9982_v40 = vpop.f32.mrb[118].mxu1  ;;  %16275 = vst [vmem:[#allocation70_spill] sm:$0xff] %v14838_v8  ;;  %v15709_v36 = vmax.f32 %v14838_v8, 0.0 }
 0x616   : > { %6366 = vrot.lane.b32.xlu0 %v15694_v26, %s10809_s12  ;;  %6382 = vrot.lane.b32.xlu1 %v15695_v63, %s10809_s12  ;;  %v5968_v25 = vpop.f32.mrb[119].mxu1  ;;  %v15703_v63 = vmax.f32 %v14820_v61, 0.0  ;;  %v14852_v18 = vadd.f32 %v9982_v40, %v14467_v0 }
 0x617   : > { %v14866_v40 = vadd.f32 %v14467_v0, %v5968_v25 }
 0x618   : > { %16277 = vst [vmem:[#allocation64_spill] sm:$0xff] %v14852_v18  ;;  %v15712_v61 = vmax.f32 %v14852_v18, 0.0 }
 0x619   : > { %v9985_v53 = vpop.f32.mrb[120].mxu1  ;;  %16279 = vst [vmem:[#allocation68_spill] sm:$0xff] %v14866_v40 }
 0x61a   : > { %6364 = vrot.lane.b32.xlu0 %v15698_v49, %s10809_s12  ;;  %6380 = vrot.lane.b32.xlu1 %v15699_v17, %s10809_s12  ;;  %v5978_v26 = vpop.f32.mrb[121].mxu1  ;;  %v15708_v17 = vmax.f32 %v14834_v22, 0.0  ;;  %v14877_v22 = vadd.f32 %v9985_v53, %v14467_v0 }
 0x61c   : > { %16280 = vst [vmem:[#allocation69_spill] sm:$0xff] %v14877_v22 }
 0x61d   : > { %v9988_v24 = vpop.f32.mrb[122].mxu1 }
 0x61e   : > { %6370 = vrot.lane.b32.xlu0 %v15703_v63, %s10809_s12  ;;  %6386 = vrot.lane.b32.xlu1 %v15704_v47, %s10809_s12  ;;  %v5988_v49 = vpop.f32.mrb[123].mxu1  ;;  %v14861_v47 = vadd.f32 %v9970_v55, %v14467_v0  ;;  %v14894_v18 = vadd.f32 %v9988_v24, %v14467_v0 }
 0x620   : > { %v6283_v56 = vpop.permute.xlu0 %6282  ;;  %16278 = vst [vmem:[#allocation65_spill] sm:$0xff] %v14861_v47  ;;  %v15715_v55 = vmax.f32 %v14861_v47, 0.0  ;;  %16282 = vst [vmem:[#allocation47_spill] sm:$0xff] %v14894_v18 }
 0x621   : > { %v9991_v39 = vpop.f32.mrb[124].mxu1 }
 0x622   : > { %6368 = vrot.lane.b32.xlu0 %v15708_v17, %s10809_s12  ;;  %6384 = vrot.lane.b32.xlu1 %v15709_v36, %s10809_s12  ;;  %v5998_v63 = vpop.f32.mrb[125].mxu1  ;;  %v15716_v36 = vmax.f32 %v14866_v40, 0.0 }
 0x624   : > { %v6281_v6 = vpop.permute.xlu0 %6280 }
 0x625   : > { %v9994_v50 = vpop.f32.mrb[126].mxu1 }
 0x626   : > { %6372 = vrot.lane.b32.xlu0 %v15711_v60, %s10809_s12  ;;  %6390 = vrot.lane.b32.xlu1 %v15712_v61, %s10809_s12  ;;  %v6008_v17 = vpop.f32.mrb[127].mxu1  ;;  %v15718_v60 = vmax.f32 %v14877_v22, 0.0  ;;  %v14887_v61 = vadd.f32 %v14467_v0, %v5978_v26  ;;  %v14903_v26 = vadd.f32 %v14467_v0, %v5988_v49 }
 0x628   : > { %v6287_v25 = vpop.permute.xlu0 %6286  ;;  %16281 = vst [vmem:[#allocation74_spill] sm:$0xff] %v14887_v61  ;;  %v15720_v53 = vmax.f32 %v14887_v61, 0.0  ;;  %16283 = vst [vmem:[#allocation78_spill] sm:$0xff] %v14903_v26  ;;  %v15725_v24 = vmax.f32 %v14903_v26, 0.0 }
 0x62a   : > { %6374 = vrot.lane.b32.xlu0 %v15715_v55, %s10809_s12  ;;  %6388 = vrot.lane.b32.xlu1 %v15716_v36, %s10809_s12  ;;  %v15722_v36 = vmax.f32 %v14894_v18, 0.0 }
 0x62c   : > { %v6285_v31 = vpop.permute.xlu0 %6284 }
 0x62e   : > { %6394 = vrot.lane.b32.xlu1 %v15718_v60, %s10809_s12  ;;  %v14912_v60 = vadd.f32 %v9991_v39, %v14467_v0 }
 0x630   : > { %v14896_v55 = vpop.permute.xlu0 %6290  ;;  %16284 = vst [vmem:[#allocation44_spill] sm:$0xff] %v14912_v60  ;;  %v15727_v49 = vmax.f32 %v14912_v60, 0.0  ;;  %v16285_v60 = vmax.f32 %v14538_v35, 0.0  ;;  %v16288_v35 = vmax.f32 %v14470_v32, 0.0  ;;  %v8358_v32 = vld [vmem:[%s15344_s5 + $0x60] sm:$0xff] }
 0x632   : > { %6392 = vrot.lane.b32.xlu1 %v15720_v53, %s10809_s12  ;;  %v14921_v53 = vadd.f32 %v14467_v0, %v5998_v63  ;;  %v14938_v63 = vadd.f32 %v9994_v50, %v14467_v0  ;;  %v6473_v50 = vmax.f32 %v16288_v35, %v6283_v56  ;;  %v8359_v56 = vld [vmem:[%s15344_s5 + $0x68] sm:$0xff]  ;;  %v16291_v35 = vmax.f32 %v14577_v45, 0.0 }
 0x634   : > { %v14905_v47 = vpop.permute.xlu0 %6288  ;;  %v15733_v39 = vmax.f32 %v14921_v53, 0.0 }
 0x636   : > { %6398 = vrot.lane.b32.xlu1 %v15722_v36, %s10809_s12  ;;  %v14930_v36 = vadd.f32 %v14467_v0, %v6008_v17  ;;  %v16286_v17 = vmax.f32 %v14474_v10, 0.0  ;;  %v8357_v0 = vld [vmem:[%s15344_s5 + $0x58] sm:$0xff] }
 0x638   : > { %v14914_v22 = vpop.permute.xlu0 %6294  ;;  %v6472_v29 = vmax.f32 %v16286_v17, %v6281_v6  ;;  %v6215_v6 = vmax.f32 %v14938_v63, 0.0  ;;  %v16290_v17 = vmax.f32 %v14488_v12, 0.0  ;;  %v7011_v63 = vlaneseq }
 0x63a   : > { %6396 = vrot.lane.b32.xlu1 %v15725_v24, %s10809_s12  ;;  %v6214_v24 = vmax.f32 %v14930_v36, 0.0  ;;  %v16370_v36 = vmov 0.0  }
 0x63c   : > { %v14923_v61 = vpop.permute.xlu0 %6292 }
 0x63e   : > { %6402 = vrot.lane.b32.xlu1 %v15727_v49, %s10809_s12 }
 0x640   : > { %v14932_v18 = vpop.permute.xlu0 %6298  ;;  %v6315_v26 = vpop.permute.xlu1 %6314 }
 0x641   : > { %v6489_v49 = vmax.f32 %v16285_v60, %v6315_v26 }
 0x642   : > { %6400 = vrot.lane.b32.xlu1 %v15733_v39, %s10809_s12  ;;  %v8356_v39 = vld [vmem:[%s15344_s5 + $0x50] sm:$0xff] }
 0x643   : > { %v6537_v1 = vmax.f32 %v6473_v50, %v6489_v49  ;;  %v10203_v60 = vpack.c.bf16 %v8357_v0, %v8356_v39  ;;  %v10207_v39 = vpack.c.bf16 %v8359_v56, %v8358_v32  ;;  %v6474_v0 = vmax.f32 %v16290_v17, %v6285_v31  ;;  %v7054_v31 = vld [vmem:[%s15345_s6] sm:$0xff] }
 0x644   : > { %v14943_v40 = vpop.permute.xlu0 %6296  ;;  %v6313_v8 = vpop.permute.xlu1 %6312  ;;  %v16294_v17 = vmax.f32 %v14502_v16, 0.0  ;;  %v16297_v16 = vmax.f32 %v14619_v28, 0.0  ;;  %v16301_v28 = vmax.f32 %v14644_v34, 0.0  ;;  %v16305_v34 = vmax.f32 %v14671_v57, 0.0 }
 0x645   : > { %v6488_v52 = vmax.f32 %v16287_v2, %v6313_v8 }
 0x646   : > { %6404 = vrot.lane.b32.xlu1 %v6214_v24, %s10809_s12 }
 0x647   : > { %v6536_v10 = vmax.f32 %v6472_v29, %v6488_v52  ;;  %v16289_v52 = vmax.f32 %v14563_v48, 0.0  ;;  %v16292_v48 = vmax.f32 %v14481_v21, 0.0  ;;  %v16293_v21 = vmax.f32 %v14591_v5, 0.0 }
 0x648   : > { %v14961_v2 = vpop.permute.xlu0 %6302  ;;  %v6319_v8 = vpop.permute.xlu1 %6318 }
 0x649   : > { %10011 = vmatprep.mubr.msk.f32.mxu1 %vm6577_vm3, %v6536_v10  ;;  %v6491_v29 = vmax.f32 %v16289_v52, %v6319_v8  ;;  %v8360_v10 = vld [vmem:[%s15344_s5 + $0x70] sm:$0xff]  ;;  %v7055_v52 = vld [vmem:[%s15345_s6 + $0x8] sm:$0xff] }
 0x64a   : > { %10012 = vmatmul.mubr.msk.f32.vlgmr.msra.gmra.mrb[128].mxu1 %vm6577_vm3, %v6537_v1  ;;  %6406 = vrot.lane.b32.xlu1 %v6215_v6, %s10809_s12  ;;  %v6475_v1 = vmax.f32 %v16292_v48, %v6287_v25 }
 0x64b   : > { %10202 = vmatpush3.bf16.msra.mxu1 %v14711_v19  ;;  %v8361_v19 = vld [vmem:[%s15344_s5 + $0x78] sm:$0xff] }
 0x64c   : > { %v14977_v26 = vpop.permute.xlu0 %6300  ;;  %v6317_v49 = vpop.permute.xlu1 %6316  ;;  %10204 = vmatprep.subr.bf16.mxu1 %v10203_v60  ;;  %v6539_v32 = vmax.f32 %v6475_v1, %v6491_v29  ;;  %v10211_v45 = vpack.c.bf16 %v8361_v19, %v8360_v10  ;;  %v16296_v10 = vmax.f32 %v14495_v51, 0.0  ;;  %v16298_v51 = vmax.f32 %v14528_v43, 0.0 }
 0x64d   : > { %v6490_v50 = vmax.f32 %v16291_v35, %v6317_v49  ;;  %v15003_v49 = vpack.c.bf16 %v7055_v52, %v7054_v31  ;;  %v16295_v35 = vmax.f32 %v14605_v58, 0.0 }
 0x64e   : > { %v6477_v19 = vmax.f32 %v16296_v10, %v14896_v55  ;;  %v6478_v55 = vmax.f32 %v16298_v51, %v14923_v61 }
 0x64f   : > { %v6538_v8 = vmax.f32 %v6474_v0, %v6490_v50  ;;  %10206 = vmatpush3.bf16.msra.mxu1 %v10203_v60  ;;  %v6476_v0 = vmax.f32 %v16294_v17, %v14905_v47 }
 0x650   : > { %v14991_v56 = vpop.permute.xlu0 %6306  ;;  %v6323_v12 = vpop.permute.xlu1 %6322  ;;  %10208 = vmatprep.subr.bf16.mxu1 %v10207_v39 }
 0x651   : > { %10014 = vmatprep.mubr.msk.f32.mxu1 %vm6577_vm3, %v6538_v8  ;;  %v6493_v25 = vmax.f32 %v16293_v21, %v6323_v12 }
 0x652   : > { %10015 = vmatmul.mubr.msk.f32.gmra.mrb[130].mxu1 %vm6577_vm3, %v6539_v32  ;;  %v16299_v32 = vmax.f32 %v14633_v33, 0.0  ;;  %v16302_v33 = vmax.f32 %v14545_v4, 0.0 }
 0x653   : > { %10210 = vmatpush3.bf16.msra.mxu1 %v10207_v39  ;;  %v6541_v5 = vmax.f32 %v6477_v19, %v6493_v25 }
 0x654   : > { %v6305_v60 = vpop.permute.xlu0 %6304  ;;  %v6321_v29 = vpop.permute.xlu1 %6320  ;;  %10212 = vmatprep.subr.bf16.mxu1 %v10211_v45  ;;  %v6480_v61 = vmax.f32 %v16302_v33, %v14943_v40 }
 0x655   : > { %v6492_v50 = vmax.f32 %v16295_v35, %v6321_v29 }
 0x657   : > { %v6540_v39 = vmax.f32 %v6476_v0, %v6492_v50  ;;  %10214 = vmatpush3.bf16.msra.mxu1 %v10211_v45  ;;  %v16300_v45 = vmax.f32 %v14515_v13, 0.0  ;;  %v16303_v0 = vmax.f32 %v14657_v59, 0.0  ;;  %v16306_v59 = vmax.f32 %v14573_v62, 0.0 }
 0x658   : > { %v6311_v48 = vpop.permute.xlu0 %6310  ;;  %v6327_v1 = vpop.permute.xlu1 %6326  ;;  %10216 = vmatprep.subr.bf16.mxu1 %v15003_v49 }
 0x659   : > { %10017 = vmatprep.mubr.msk.f32.mxu1 %vm6577_vm3, %v6540_v39  ;;  %v6495_v47 = vmax.f32 %v16297_v16, %v6327_v1  ;;  %v6479_v31 = vmax.f32 %v16300_v45, %v14914_v22  ;;  %v16304_v22 = vmax.f32 %v14535_v42, 0.0  ;;  %v6482_v1 = vmax.f32 %v16306_v59, %v14977_v26 }
 0x65a   : > { %10018 = vmatmul.mubr.msk.f32.gmra.mrb[132].mxu1 %vm6577_vm3, %v6541_v5  ;;  %v16307_v42 = vmax.f32 %v14684_v37, 0.0  ;;  %v16308_v16 = vmax.f32 %v14559_v38, 0.0  ;;  %v16310_v26 = vmax.f32 %v14601_v9, 0.0  ;;  %v16311_v45 = vmax.f32 %v14722_v41, 0.0 }
 0x65b   : > { %v6543_v21 = vmax.f32 %v6479_v31, %v6495_v47  ;;  %v6481_v35 = vmax.f32 %v16304_v22, %v14932_v18  ;;  %v16312_v38 = vmax.f32 %v14587_v3, 0.0  ;;  %v16316_v3 = vmax.f32 %v14615_v14, 0.0 }
 0x65c   : > { %v6309_v58 = vpop.permute.xlu0 %6308  ;;  %v6325_v8 = vpop.permute.xlu1 %6324  ;;  %v6483_v47 = vmax.f32 %v16308_v16, %v14961_v2  ;;  %v6484_v37 = vmax.f32 %v16310_v26, %v6305_v60  ;;  %v16314_v60 = vmax.f32 %v14629_v44, 0.0 }
 0x65d   : > { %v6494_v12 = vmax.f32 %v16299_v32, %v6325_v8  ;;  %v16309_v32 = vmax.f32 %v14705_v27, 0.0  ;;  %v6485_v2 = vmax.f32 %v16312_v38, %v14991_v56  ;;  %v16313_v27 = vmax.f32 %v14736_v11, 0.0  ;;  %v16333_v38 = vld [vmem:[#allocation51_spill] sm:$0xff] }
 0x65e   : > { %v6486_v41 = vmax.f32 %v16314_v60, %v6309_v58  ;;  %v6487_v56 = vmax.f32 %v16316_v3, %v6311_v48  ;;  %v16318_v58 = vmax.f32 %v14661_v20, 0.0  ;;  %v16320_v48 = vmax.f32 %v14647_v15, 0.0 }
 0x65f   : > { %v6542_v52 = vmax.f32 %v6478_v55, %v6494_v12 }
 0x660   : > { %v6331_v25 = vpop.permute.xlu1 %6330  ;;  %v6347_v29 = vpop.permute.xlu0 %6346 }
 0x661   : > { %10020 = vmatprep.mubr.msk.f32.mxu1 %vm6577_vm3, %v6542_v52  ;;  %v6497_v17 = vmax.f32 %v16301_v28, %v6331_v25 }
 0x662   : > { %10021 = vmatmul.mubr.msk.f32.gmra.mrb[134].mxu1 %vm6577_vm3, %v6543_v21 }
 0x663   : > { %v6545_v19 = vmax.f32 %v6481_v35, %v6497_v17  ;;  %v16317_v35 = vmax.f32 %v14768_v46, 0.0  ;;  %v16321_v46 = vmax.f32 %v14796_v54, 0.0  ;;  %v16327_v54 = vld [vmem:[#allocation66_spill] sm:$0xff] }
 0x664   : > { %v6329_v43 = vpop.permute.xlu1 %6328  ;;  %v6345_v50 = vpop.permute.xlu0 %6344 }
 0x665   : > { %v6496_v13 = vmax.f32 %v16303_v0, %v6329_v43  ;;  %v16315_v43 = vmax.f32 %v14750_v23, 0.0  ;;  %v6504_v23 = vmax.f32 %v16318_v58, %v6345_v50 }
 0x667   : > { %v6544_v10 = vmax.f32 %v6480_v61, %v6496_v13 }
 0x668   : > { %v6335_v39 = vpop.permute.xlu1 %6334  ;;  %v6351_v4 = vpop.permute.xlu0 %6350 }
 0x669   : > { %10023 = vmatprep.mubr.msk.f32.mxu1 %vm6577_vm3, %v6544_v10  ;;  %v6499_v5 = vmax.f32 %v16305_v34, %v6335_v39  ;;  %v6505_v39 = vmax.f32 %v16320_v48, %v6347_v29 }
 0x66a   : > { %10024 = vmatmul.mubr.msk.f32.gmra.mrb[136].mxu1 %vm6577_vm3, %v6545_v19  ;;  %v16319_v19 = vmax.f32 %v14782_v30, 0.0  ;;  %v16322_v30 = vmax.f32 %v14689_v7, 0.0  ;;  %v16329_v7 = vld [vmem:[#allocation53_spill] sm:$0xff] }
 0x66b   : > { %v6547_v51 = vmax.f32 %v6483_v47, %v6499_v5 }
 0x66c   : > { %v6333_v40 = vpop.permute.xlu1 %6332  ;;  %v6349_v57 = vpop.permute.xlu0 %6348 }
 0x66d   : > { %v6498_v18 = vmax.f32 %v16307_v42, %v6333_v40  ;;  %v16323_v42 = vld [vmem:[#allocation60_spill] sm:$0xff] }
 0x66e   : > { %v16324_v15 = vmax.f32 %v16323_v42, 0.0 }
 0x66f   : > { %v6546_v8 = vmax.f32 %v6482_v1, %v6498_v18  ;;  %v6506_v1 = vmax.f32 %v16322_v30, %v6349_v57  ;;  %v16325_v18 = vld [vmem:[#allocation49_spill] sm:$0xff]  ;;  %v16330_v57 = vmax.f32 %v16329_v7, 0.0  ;;  %v16357_v7 = vld [vmem:[#allocation56_spill] sm:$0xff] }
 0x670   : > { %v6339_v55 = vpop.permute.xlu1 %6338  ;;  %v6355_v25 = vpop.permute.xlu0 %6354  ;;  %v16326_v16 = vmax.f32 %v16325_v18, 0.0  ;;  %v16351_v18 = vld [vmem:[#allocation47_spill] sm:$0xff] }
 0x671   : > { %10026 = vmatprep.mubr.msk.f32.mxu1 %vm6577_vm3, %v6546_v8  ;;  %v6501_v12 = vmax.f32 %v16309_v32, %v6339_v55 }
 0x672   : > { %10027 = vmatmul.mubr.msk.f32.gmra.mrb[138].mxu1 %vm6577_vm3, %v6547_v51  ;;  %v6507_v47 = vmax.f32 %v16326_v16, %v6351_v4  ;;  %v16334_v4 = vmax.f32 %v16333_v38, 0.0  ;;  %v16352_v16 = vmax.f32 %v16351_v18, 0.0 }
 0x673   : > { %v6549_v21 = vmax.f32 %v6485_v2, %v6501_v12 }
 0x674   : > { %v6337_v62 = vpop.permute.xlu1 %6336  ;;  %v6353_v61 = vpop.permute.xlu0 %6352  ;;  %v6509_v2 = vmax.f32 %v16334_v4, %v6355_v25  ;;  %v16341_v25 = vld [vmem:[#allocation58_spill] sm:$0xff]  ;;  %v16359_v4 = vld [vmem:[#allocation44_spill] sm:$0xff] }
 0x675   : > { %v6500_v31 = vmax.f32 %v16311_v45, %v6337_v62  ;;  %v6508_v26 = vmax.f32 %v16330_v57, %v6353_v61  ;;  %v16339_v61 = vld [vmem:[#allocation68_spill] sm:$0xff] }
 0x677   : > { %v6548_v52 = vmax.f32 %v6484_v37, %v6500_v31  ;;  %v16331_v37 = vld [vmem:[#allocation70_spill] sm:$0xff] }
 0x678   : > { %v6343_v28 = vpop.permute.xlu1 %6342  ;;  %v6359_v11 = vpop.permute.xlu0 %6358  ;;  %v16332_v45 = vmax.f32 %v16331_v37, 0.0 }
 0x679   : > { %10029 = vmatprep.mubr.msk.f32.mxu1 %vm6577_vm3, %v6548_v52  ;;  %v6503_v17 = vmax.f32 %v16313_v27, %v6343_v28 }
 0x67a   : > { %10030 = vmatmul.mubr.msk.f32.gmra.mrb[140].mxu1 %vm6577_vm3, %v6549_v21 }
 0x67b   : > { %v6551_v13 = vmax.f32 %v6487_v56, %v6503_v17 }
 0x67c   : > { %v6341_v9 = vpop.permute.xlu1 %6340  ;;  %v6357_v59 = vpop.permute.xlu0 %6356 }
 0x67d   : > { %v6502_v33 = vmax.f32 %v16315_v43, %v6341_v9  ;;  %v16335_v9 = vld [vmem:[#allocation64_spill] sm:$0xff] }
 0x67e   : > { %v16336_v60 = vmax.f32 %v16335_v9, 0.0 }
 0x67f   : > { %v6550_v0 = vmax.f32 %v6486_v41, %v6502_v33  ;;  %v16337_v33 = vld [vmem:[#allocation24_spill] sm:$0xff] }
 0x680   : > { %v6379_v22 = vpop.permute.xlu1 %6378  ;;  %v6363_v51 = vpop.permute.xlu0 %6362  ;;  %v16338_v3 = vmax.f32 %v16337_v33, 0.0 }
 0x681   : > { %10032 = vmatprep.mubr.msk.f32.mxu1 %vm6577_vm3, %v6550_v0  ;;  %v6521_v10 = vmax.f32 %v16317_v35, %v6379_v22  ;;  %v16340_v0 = vmax.f32 %v16339_v61, 0.0  ;;  %v16342_v22 = vmax.f32 %v16341_v25, 0.0 }
 0x682   : > { %10033 = vmatmul.mubr.msk.f32.gmra.mrb[142].mxu1 %vm6577_vm3, %v6551_v13  ;;  %v6510_v56 = vmax.f32 %v16338_v3, %v6357_v59  ;;  %v16347_v59 = vld [vmem:[#allocation74_spill] sm:$0xff] }
 0x683   : > { %v6553_v5 = vmax.f32 %v6505_v39, %v6521_v10  ;;  %v6511_v35 = vmax.f32 %v16342_v22, %v6359_v11 }
 0x684   : > { %v6377_v44 = vpop.permute.xlu1 %6376  ;;  %v6361_v52 = vpop.permute.xlu0 %6360 }
 0x685   : > { %v6520_v14 = vmax.f32 %v16319_v19, %v6377_v44  ;;  %v16343_v19 = vld [vmem:[#allocation69_spill] sm:$0xff] }
 0x687   : > { %v6552_v34 = vmax.f32 %v6504_v23, %v6520_v14  ;;  %v16344_v14 = vmax.f32 %v16343_v19, 0.0 }
 0x688   : > { %v6383_v40 = vpop.permute.xlu1 %6382  ;;  %v6367_v17 = vpop.permute.xlu0 %6366 }
 0x689   : > { %10051 = vmatprep.mubr.msk.f32.mxu1 %vm6577_vm3, %v6552_v34  ;;  %v6523_v20 = vmax.f32 %v16321_v46, %v6383_v40  ;;  %v16345_v34 = vld [vmem:[#allocation62_spill] sm:$0xff]  ;;  %v16348_v46 = vmax.f32 %v16347_v59, 0.0 }
 0x68a   : > { %10052 = vmatmul.mubr.msk.f32.vlgmr.msra.gmra.mrb[128].mxu1 %vm6577_vm3, %v6553_v5  ;;  %v16346_v5 = vmax.f32 %v16345_v34, 0.0 }
 0x68b   : > { %10218 = vmatpush3.bf16.msra.mxu1 %v15003_v49  ;;  %v6555_v55 = vmax.f32 %v6507_v47, %v6523_v20  ;;  %v16328_v49 = vmax.f32 %v16327_v54, 0.0 }
 0x68c   : > { %v6381_v50 = vpop.permute.xlu1 %6380  ;;  %v6365_v23 = vpop.permute.xlu0 %6364  ;;  %v6512_v40 = vmax.f32 %v16346_v5, %v6361_v52  ;;  %v7021_v5 = vand.u32 127, %v7011_v63 }
 0x68d   : > { %v6522_v29 = vmax.f32 %v16324_v15, %v6381_v50  ;;  %v16349_v50 = vld [vmem:[#allocation28_spill] sm:$0xff] }
 0x68e   : > { %v16350_v11 = vmax.f32 %v16349_v50, 0.0 }
 0x68f   : > { %v6554_v8 = vmax.f32 %v6506_v1, %v6522_v29 }
 0x690   : > { %v6387_v32 = vpop.permute.xlu1 %6386  ;;  %v6513_v30 = vmax.f32 %v16350_v11, %v6363_v51  ;;  %v6371_v42 = vpop.permute.xlu0 %6370  ;;  %v16358_v51 = vmax.f32 %v16357_v7, 0.0 }
 0x691   : > { %10054 = vmatprep.mubr.msk.f32.mxu1 %vm6577_vm3, %v6554_v8  ;;  %v6525_v12 = vmax.f32 %v16328_v49, %v6387_v32  ;;  %v16355_v49 = vld [vmem:[#allocation78_spill] sm:$0xff] }
 0x692   : > { %10055 = vmatmul.mubr.msk.f32.gmra.mrb[130].mxu1 %vm6577_vm3, %v6555_v55  ;;  %v16353_v55 = vld [vmem:[#allocation57_spill] sm:$0xff]  ;;  %v6515_v57 = vmax.f32 %v16358_v51, %v6367_v17  ;;  %v8353_v51 = vld [vmem:[%s15346_s7] ss:$0 sm:$0xff] }
 0x693   : > { %v6557_v28 = vmax.f32 %v6509_v2, %v6525_v12  ;;  %v16354_v32 = vmax.f32 %v16353_v55, 0.0  ;;  %v16356_v12 = vmax.f32 %v16355_v49, 0.0  ;;  %v16360_v2 = vmax.f32 %v16359_v4, 0.0  ;;  %v16364_v17 = vld [vmem:[#allocation61_spill] sm:$0xff] }
 0x694   : > { %v6385_v62 = vpop.permute.xlu1 %6384 }
 0x695   : > { %v6524_v31 = vmax.f32 %v16332_v45, %v6385_v62  ;;  %v6514_v54 = vmax.f32 %v16354_v32, %v6365_v23 }
 0x697   : > { %v6556_v21 = vmax.f32 %v6508_v26, %v6524_v31  ;;  %v6369_v26 = vpop.permute.xlu0 %6368 }
 0x698   : > { %v6391_v27 = vpop.permute.xlu1 %6390 }
 0x699   : > { %10057 = vmatprep.mubr.msk.f32.mxu1 %vm6577_vm3, %v6556_v21  ;;  %v6527_v41 = vmax.f32 %v16336_v60, %v6391_v27  ;;  %v16363_v60 = vmax.f32 %v14921_v53, 0.0 }
 0x69a   : > { %10058 = vmatmul.mubr.msk.f32.gmra.mrb[132].mxu1 %vm6577_vm3, %v6557_v28  ;;  %v16361_v28 = vld [vmem:[#allocation40_spill] sm:$0xff] }
 0x69b   : > { %v6559_v44 = vmax.f32 %v6511_v35, %v6527_v41  ;;  %v6373_v38 = vpop.permute.xlu0 %6372  ;;  %v16362_v27 = vmax.f32 %v16361_v28, 0.0 }
 0x69c   : > { %v6389_v43 = vpop.permute.xlu1 %6388 }
 0x69d   : > { %v6526_v13 = vmax.f32 %v16340_v0, %v6389_v43  ;;  %v6516_v9 = vmax.f32 %v16362_v27, %v6369_v26  ;;  %v16365_v43 = vmax.f32 %v16364_v17, 0.0  ;;  %v16366_v0 = vld [vmem:[#allocation32_spill] sm:$0xff] }
 0x69f   : > { %v6558_v10 = vmax.f32 %v6510_v56, %v6526_v13  ;;  %v6517_v33 = vmax.f32 %v16365_v43, %v6371_v42  ;;  %v16367_v13 = vmax.f32 %v16366_v0, 0.0  ;;  %v6375_v35 = vpop.permute.xlu0 %6374 }
 0x6a0   : > { %v6395_v58 = vpop.permute.xlu1 %6394 }
 0x6a1   : > { %10060 = vmatprep.mubr.msk.f32.mxu1 %vm6577_vm3, %v6558_v10  ;;  %v6529_v48 = vmax.f32 %v16344_v14, %v6395_v58  ;;  %v6518_v25 = vmax.f32 %v16367_v13, %v6373_v38 }
 0x6a2   : > { %10061 = vmatmul.mubr.msk.f32.gmra.mrb[134].mxu1 %vm6577_vm3, %v6559_v44  ;;  %v16368_v44 = vld [vmem:[#allocation65_spill] sm:$0xff] }
 0x6a3   : > { %v6561_v15 = vmax.f32 %v6513_v30, %v6529_v48  ;;  %v16369_v58 = vmax.f32 %v16368_v44, 0.0  ;;  %v7057_v48 = vld [vmem:[%s15345_s6 + $0x18] sm:$0xff] }
 0x6a4   : > { %v6393_v39 = vpop.permute.xlu1 %6392 }
 0x6a5   : > { %v6528_v20 = vmax.f32 %v16348_v46, %v6393_v39  ;;  %v6519_v23 = vmax.f32 %v16369_v58, %v6375_v35 }
 0x6a7   : > { %v6560_v1 = vmax.f32 %v6512_v40, %v6528_v20  ;;  %v10810_v20 = vmov 1.0  }
 0x6a8   : > { %v6399_v29 = vpop.permute.xlu1 %6398 }
 0x6a9   : > { %10063 = vmatprep.mubr.msk.f32.mxu1 %vm6577_vm3, %v6560_v1  ;;  %v6531_v47 = vmax.f32 %v16352_v16, %v6399_v29 }
 0x6aa   : > { %10064 = vmatmul.mubr.msk.f32.gmra.mrb[136].mxu1 %vm6577_vm3, %v6561_v15 }
 0x6ab   : > { %v6563_v45 = vmax.f32 %v6515_v57, %v6531_v47 }
 0x6ac   : > { %v6397_v8 = vpop.permute.xlu1 %6396 }
 0x6ad   : > { %v6530_v62 = vmax.f32 %v16356_v12, %v6397_v8 }
 0x6af   : > { %v6562_v37 = vmax.f32 %v6514_v54, %v6530_v62 }
 0x6b0   : > { %v6403_v31 = vpop.permute.xlu1 %6402 }
 0x6b1   : > { %10066 = vmatprep.mubr.msk.f32.mxu1 %vm6577_vm3, %v6562_v37  ;;  %v6533_v52 = vmax.f32 %v16360_v2, %v6403_v31 }
 0x6b2   : > { %10067 = vmatmul.mubr.msk.f32.gmra.mrb[138].mxu1 %vm6577_vm3, %v6563_v45 }
 0x6b3   : > { %v6565_v56 = vmax.f32 %v6517_v33, %v6533_v52 }
 0x6b4   : > { %v6401_v21 = vpop.permute.xlu1 %6400 }
 0x6b5   : > { %v6532_v41 = vmax.f32 %v16363_v60, %v6401_v21 }
 0x6b7   : > { %v6564_v3 = vmax.f32 %v6516_v9, %v6532_v41 }
 0x6b8   : > { %v6405_v61 = vpop.permute.xlu1 %6404 }
 0x6b9   : > { %v6534_v22 = vmax.f32 %v6214_v24, %v6405_v61  ;;  %10069 = vmatprep.mubr.msk.f32.mxu1 %vm6577_vm3, %v6564_v3  ;;  %v7056_v24 = vld [vmem:[%s15345_s6 + $0x10] sm:$0xff] }
 0x6ba   : > { %10070 = vmatmul.mubr.msk.f32.gmra.mrb[140].mxu1 %vm6577_vm3, %v6565_v56  ;;  %v10219_v39 = vpack.c.bf16 %v7057_v48, %v7056_v24 }
 0x6bb   : > { %v6566_v10 = vmax.f32 %v6518_v25, %v6534_v22 }
 0x6bc   : > { %v6407_v53 = vpop.permute.xlu1 %6406  ;;  %10220 = vmatprep.subr.bf16.mxu1 %v10219_v39 }
 0x6bd   : > { %v6535_v19 = vmax.f32 %v6215_v6, %v6407_v53  ;;  %10072 = vmatprep.mubr.msk.f32.mxu1 %vm6577_vm3, %v6566_v10  ;;  %10222 = vmatpush3.bf16.msra.mxu1 %v10219_v39  ;;  %v7012_v6 = vshrl.u32 %v7011_v63, 7 }
 0x6bf   : > { %v6567_v14 = vmax.f32 %v6519_v23, %v6535_v19  ;;  %v7013_v34 = vadd.s32 8, %v7012_v6  ;;  %v7022_v40 = vmul.u32 2, %v7012_v6  ;;  %v7014_v46 = vadd.s32 16, %v7012_v6 }
 0x6c0   : > { %v7015_v11 = vadd.s32 24, %v7012_v6  ;;  %v7016_v15 = vadd.s32 32, %v7012_v6  ;;  %v7017_v18 = vadd.s32 40, %v7012_v6  ;;  %v7018_v55 = vadd.s32 48, %v7012_v6 }
 0x6c1   : > { %10073 = vmatmul.mubr.msk.f32.gmra.mrb[142].mxu1 %vm6577_vm3, %v6567_v14  ;;  %v7023_v59 = vmul.u32 2, %v7013_v34  ;;  %vm7030_vm4 = vcmp.eq.s32.totalorder %v7021_v5, %v7022_v40  ;;  %v7024_v30 = vmul.u32 2, %v7014_v46  ;;  %v7019_v54 = vadd.s32 56, %v7012_v6 }
 0x6c2   : > { %10083 = vmatprep.mubr.f32.mxu1 %v16370_v36  ;;  %v7025_v1 = vmul.u32 2, %v7015_v11  ;;  %v7026_v16 = vmul.u32 2, %v7016_v15 }
 0x6c3   : > { %vm15169_vm5 = vcmp.eq.s32.totalorder %v7021_v5, %v7023_v59  ;;  %vm15173_vm6 = vcmp.eq.s32.totalorder %v7021_v5, %v7024_v30  ;;  %v7027_v47 = vmul.u32 2, %v7017_v18  ;;  %v7028_v49 = vmul.u32 2, %v7018_v55 }
 0x6c4   : > { %vm15177_vm7 = vcmp.eq.s32.totalorder %v7021_v5, %v7025_v1  ;;  %vm15181_vm8 = vcmp.eq.s32.totalorder %v7021_v5, %v7026_v16  ;;  %v7029_v12 = vmul.u32 2, %v7019_v54 }
 0x6c5   : > { %10084 = vmatmul.mubr.f32.vlgmr.msra.gmra.mrb[144].mxu1 %v16370_v36  ;;  %vm15185_vm9 = vcmp.eq.s32.totalorder %v7021_v5, %v7027_v47  ;;  %vm15189_vm10 = vcmp.eq.s32.totalorder %v7021_v5, %v7028_v49 }
 0x6c6   : > { %10086 = vmatprep.mubr.f32.mxu1 %v16370_v36  ;;  %vm15193_vm11 = vcmp.eq.s32.totalorder %v7021_v5, %v7029_v12 }
 0x6c9   : > { %10087 = vmatmul.mubr.f32.gmra.mrb[146].mxu1 %v16370_v36 }
 0x6ca   : > { %10089 = vmatprep.mubr.f32.mxu1 %v16370_v36 }
 0x6cd   : > { %10090 = vmatmul.mubr.f32.gmra.mrb[148].mxu1 %v16370_v36 }
 0x6ce   : > { %10092 = vmatprep.mubr.f32.mxu1 %v16370_v36 }
 0x6d1   : > { %10093 = vmatmul.mubr.f32.gmra.mrb[150].mxu1 %v16370_v36 }
 0x6d2   : > { %10127 = vmatprep.mubr.msk.f32.mxu1 %vm7030_vm4, %v10810_v20 }
 0x75d   : > { %v10053_v57 = vpop.f32.mrb[128].mxu1 }
 0x75e   : > { %v10329_v26 = vadd.f32 %v10053_v57, %v8353_v51  ;;  %v6916_v37 = vpop.f32.mrb[129].mxu1 }
 0x75f   : > { %v10330_v45 = vadd.f32 %v8353_v51, %v6916_v37 }
 0x761   : > { %v10223_v31 = vpack.c.bf16 %v10329_v26, %v10330_v45 }
 0x763   : > { %10224 = vmatprep.subr.bf16.mxu1 %v10223_v31 }
 0x764   : > { %10226 = vmatpush3.bf16.msra.mxu1 %v10223_v31 }
 0x765   : > { %v10056_v38 = vpop.f32.mrb[130].mxu1 }
 0x766   : > { %v10331_v4 = vadd.f32 %v10056_v38, %v8353_v51  ;;  %v6926_v2 = vpop.f32.mrb[131].mxu1 }
 0x767   : > { %v10332_v52 = vadd.f32 %v8353_v51, %v6926_v2 }
 0x769   : > { %v10227_v21 = vpack.c.bf16 %v10331_v4, %v10332_v52 }
 0x76b   : > { %10228 = vmatprep.subr.bf16.mxu1 %v10227_v21 }
 0x76c   : > { %10230 = vmatpush3.bf16.msra.mxu1 %v10227_v21 }
 0x76d   : > { %v10059_v28 = vpop.f32.mrb[132].mxu1 }
 0x76e   : > { %v10333_v27 = vadd.f32 %v10059_v28, %v8353_v51  ;;  %v6936_v9 = vpop.f32.mrb[133].mxu1 }
 0x76f   : > { %v10334_v60 = vadd.f32 %v8353_v51, %v6936_v9 }
 0x771   : > { %v10231_v41 = vpack.c.bf16 %v10333_v27, %v10334_v60 }
 0x773   : > { %10232 = vmatprep.subr.bf16.mxu1 %v10231_v41 }
 0x774   : > { %10234 = vmatpush3.bf16.msra.mxu1 %v10231_v41 }
 0x775   : > { %v10062_v17 = vpop.f32.mrb[134].mxu1 }
 0x776   : > { %v10335_v43 = vadd.f32 %v10062_v17, %v8353_v51  ;;  %v6946_v33 = vpop.f32.mrb[135].mxu1 }
 0x777   : > { %v10336_v3 = vadd.f32 %v8353_v51, %v6946_v33 }
 0x779   : > { %v10235_v56 = vpack.c.bf16 %v10335_v43, %v10336_v3 }
 0x77b   : > { %10236 = vmatprep.subr.bf16.mxu1 %v10235_v56 }
 0x77c   : > { %10238 = vmatpush3.bf16.msra.mxu1 %v10235_v56 }
 0x77d   : > { %v10065_v61 = vpop.f32.mrb[136].mxu1 }
 0x77e   : > { %v10337_v0 = vadd.f32 %v10065_v61, %v8353_v51  ;;  %v6956_v13 = vpop.f32.mrb[137].mxu1 }
 0x77f   : > { %v10338_v25 = vadd.f32 %v8353_v51, %v6956_v13 }
 0x781   : > { %v10239_v22 = vpack.c.bf16 %v10337_v0, %v10338_v25 }
 0x783   : > { %10240 = vmatprep.subr.bf16.mxu1 %v10239_v22 }
 0x784   : > { %10242 = vmatpush3.bf16.msra.mxu1 %v10239_v22 }
 0x785   : > { %v10068_v35 = vpop.f32.mrb[138].mxu1 }
 0x786   : > { %v10339_v10 = vadd.f32 %v10068_v35, %v8353_v51  ;;  %v6966_v53 = vpop.f32.mrb[139].mxu1 }
 0x787   : > { %v10340_v44 = vadd.f32 %v8353_v51, %v6966_v53 }
 0x789   : > { %v10243_v58 = vpack.c.bf16 %v10339_v10, %v10340_v44 }
 0x78b   : > { %10244 = vmatprep.subr.bf16.mxu1 %v10243_v58 }
 0x78c   : > { %10246 = vmatpush3.bf16.msra.mxu1 %v10243_v58 }
 0x78d   : > { %v10071_v23 = vpop.f32.mrb[140].mxu1 }
 0x78e   : > { %v10341_v19 = vadd.f32 %v10071_v23, %v8353_v51  ;;  %v6976_v14 = vpop.f32.mrb[141].mxu1 }
 0x78f   : > { %v10342_v36 = vadd.f32 %v8353_v51, %v6976_v14 }
 0x791   : > { %v10247_v24 = vpack.c.bf16 %v10341_v19, %v10342_v36 }
 0x793   : > { %10248 = vmatprep.subr.bf16.mxu1 %v10247_v24 }
 0x794   : > { %v10074_v48 = vpop.f32.mrb[142].mxu1  ;;  %10250 = vmatpush3.bf16.msra.mxu1 %v10247_v24 }
 0x795   : > { %v10343_v39 = vadd.f32 %v10074_v48, %v8353_v51  ;;  %v6986_v63 = vpop.f32.mrb[143].mxu1 }
 0x796   : > { %v10344_v6 = vadd.f32 %v8353_v51, %v6986_v63 }
 0x798   : > { %v10251_v34 = vpack.c.bf16 %v10343_v39, %v10344_v6 }
 0x79a   : > { %10252 = vmatprep.subr.bf16.mxu1 %v10251_v34 }
 0x79b   : > { %10254 = vmatpush3.bf16.msra.mxu1 %v10251_v34 }
 0x79e   : > { %10128 = vmatmul.mubr.msk.f32.vlgmr.msra.gmra.mrb[144].mxu1 %vm15169_vm5, %v10810_v20 }
 0x79f   : > { %10130 = vmatprep.mubr.msk.f32.mxu1 %vm15173_vm6, %v10810_v20 }
 0x7a2   : > { %10131 = vmatmul.mubr.msk.f32.gmra.mrb[146].mxu1 %vm15177_vm7, %v10810_v20 }
 0x7a3   : > { %10133 = vmatprep.mubr.msk.f32.mxu1 %vm15181_vm8, %v10810_v20 }
 0x7a6   : > { %10134 = vmatmul.mubr.msk.f32.gmra.mrb[148].mxu1 %vm15185_vm9, %v10810_v20 }
 0x7a7   : > { %10136 = vmatprep.mubr.msk.f32.mxu1 %vm15189_vm10, %v10810_v20 }
 0x7aa   : > { %10137 = vmatmul.mubr.msk.f32.gmra.mrb[150].mxu1 %vm15193_vm11, %v10810_v20 }
 0x871   : > { %v10129_v5 = vpop.f32.mrb[144].mxu1 }
 0x872   : > { %10718 = vtanh.f32 %v10129_v5  ;;  %v7229_v40 = vpop.f32.mrb[145].mxu1  ;;  %v8395_v55 = vmul.f32 -1.442695, %v10129_v5 }
 0x873   : > { %10720 = vtanh.f32 %v7229_v40  ;;  %v8394_v32 = vmul.f32 -1.442695, %v7229_v40 }
 0x875   : > { %v10132_v59 = vpop.f32.mrb[146].mxu1 }
 0x876   : > { %10722 = vtanh.f32 %v10132_v59  ;;  %v7239_v46 = vpop.f32.mrb[147].mxu1  ;;  %v8397_v54 = vmul.f32 -1.442695, %v10132_v59 }
 0x877   : > { %10724 = vtanh.f32 %v7239_v46  ;;  %v8396_v49 = vmul.f32 -1.442695, %v7239_v46 }
 0x879   : > { %v10135_v50 = vpop.f32.mrb[148].mxu1 }
 0x87a   : > { %10726 = vtanh.f32 %v10135_v50  ;;  %v7249_v11 = vpop.f32.mrb[149].mxu1  ;;  %v8399_v12 = vmul.f32 -1.442695, %v10135_v50 }
 0x87b   : > { %10728 = vtanh.f32 %v7249_v11  ;;  %v8398_v62 = vmul.f32 -1.442695, %v7249_v11 }
 0x87c   : > { %v10719_v30 = vpop.eup %10718 }
 0x87d   : > { %v10721_v1 = vpop.eup %10720  ;;  %7342 = vrot.lane.b32.xlu1 %v10719_v30, %s10809_s12  ;;  %v10138_v42 = vpop.f32.mrb[150].mxu1 }
 0x87e   : > { %10730 = vtanh.f32 %v10138_v42  ;;  %7340 = vrot.lane.b32.xlu0 %v10721_v1, %s10809_s12  ;;  %v7259_v20 = vpop.f32.mrb[151].mxu1  ;;  %v8401_v7 = vmul.f32 -1.442695, %v10138_v42 }
 0x87f   : > { %10732 = vtanh.f32 %v7259_v20  ;;  %v8400_v51 = vmul.f32 -1.442695, %v7259_v20 }
 0x880   : > { %v10723_v15 = vpop.eup %10722  ;;  %10734 = vpow2.f32 %v8395_v55 }
 0x881   : > { %v10725_v29 = vpop.eup %10724  ;;  %7346 = vrot.lane.b32.xlu1 %v10723_v15, %s10809_s12  ;;  %10736 = vpow2.f32 %v8394_v32 }
 0x882   : > { %7344 = vrot.lane.b32.xlu0 %v10725_v29, %s10809_s12  ;;  %10738 = vpow2.f32 %v8397_v54 }
 0x883   : > { %10740 = vpow2.f32 %v8396_v49 }
 0x884   : > { %v10727_v18 = vpop.eup %10726  ;;  %10742 = vpow2.f32 %v8399_v12 }
 0x885   : > { %v10729_v16 = vpop.eup %10728  ;;  %7350 = vrot.lane.b32.xlu1 %v10727_v18, %s10809_s12  ;;  %10744 = vpow2.f32 %v8398_v62 }
 0x886   : > { %7348 = vrot.lane.b32.xlu0 %v10729_v16, %s10809_s12  ;;  %10746 = vpow2.f32 %v8401_v7 }
 0x887   : > { %10748 = vpow2.f32 %v8400_v51 }
 0x888   : > { %v10731_v47 = vpop.eup %10730 }
 0x889   : > { %v10733_v8 = vpop.eup %10732  ;;  %7354 = vrot.lane.b32.xlu1 %v10731_v47, %s10809_s12 }
 0x88a   : > { %7352 = vrot.lane.b32.xlu0 %v10733_v8, %s10809_s12  ;;  %v10735_v57 = vpop.eup %10734 }
 0x88b   : > { %v10737_v26 = vpop.eup %10736  ;;  %v7293_v37 = vadd.f32 1.0, %v10735_v57 }
 0x88c   : > { %v10739_v45 = vpop.eup %10738  ;;  %v7292_v31 = vadd.f32 1.0, %v10737_v26 }
 0x88d   : > { %v10741_v38 = vpop.eup %10740  ;;  %10750 = vrcp.f32 %v7293_v37  ;;  %v7295_v4 = vadd.f32 1.0, %v10739_v45  ;;  %v7460_v37 = vld [vmem:[%s15347_s8] sm:$0xff]  ;;  %v7461_v45 = vld [vmem:[%s15347_s8 + $0x8] sm:$0xff] }
 0x88e   : > { %v10743_v2 = vpop.eup %10742  ;;  %10752 = vrcp.f32 %v7292_v31  ;;  %v7294_v52 = vadd.f32 1.0, %v10741_v38  ;;  %v7462_v31 = vld [vmem:[%s15347_s8 + $0x10] sm:$0xff] }
 0x88f   : > { %v10745_v21 = vpop.eup %10744  ;;  %10754 = vrcp.f32 %v7295_v4  ;;  %v7297_v28 = vadd.f32 1.0, %v10743_v2  ;;  %v10255_v4 = vpack.c.bf16 %v7461_v45, %v7460_v37  ;;  %v7463_v2 = vld [vmem:[%s15347_s8 + $0x18] sm:$0xff] }
 0x890   : > { %v10747_v27 = vpop.eup %10746  ;;  %10756 = vrcp.f32 %v7294_v52  ;;  %v7296_v9 = vadd.f32 1.0, %v10745_v21  ;;  %v10259_v21 = vpack.c.bf16 %v7463_v2, %v7462_v31 }
 0x891   : > { %v10749_v60 = vpop.eup %10748  ;;  %10758 = vrcp.f32 %v7297_v28  ;;  %v7299_v41 = vadd.f32 1.0, %v10747_v27  ;;  %10256 = vmatprep.subr.bf16.mxu1 %v10255_v4 }
 0x892   : > { %10760 = vrcp.f32 %v7296_v9  ;;  %v7298_v17 = vadd.f32 1.0, %v10749_v60  ;;  %10258 = vmatpush3.bf16.msra.mxu1 %v10255_v4 }
 0x893   : > { %10762 = vrcp.f32 %v7299_v41  ;;  %10260 = vmatprep.subr.bf16.mxu1 %v10259_v21 }
 0x894   : > { %10764 = vrcp.f32 %v7298_v17 }
 0x896   : > { %10262 = vmatpush3.bf16.msra.mxu1 %v10259_v21 }
 0x897   : > { %v15229_v43 = vpop.eup %10750 }
 0x898   : > { %v15231_v3 = vpop.eup %10752  ;;  %v7325_v5 = vmul.f32 0.0, %v15229_v43 }
 0x899   : > { %v15236_v13 = vpop.eup %10754  ;;  %v7324_v59 = vmul.f32 0.0, %v15231_v3 }
 0x89a   : > { %v15239_v22 = vpop.eup %10756  ;;  %v7327_v30 = vmul.f32 0.0, %v15236_v13 }
 0x89b   : > { %v15244_v44 = vpop.eup %10758  ;;  %v7326_v42 = vmul.f32 0.0, %v15239_v22 }
 0x89c   : > { %v15247_v23 = vpop.eup %10760  ;;  %v7329_v18 = vmul.f32 0.0, %v15244_v44 }
 0x89d   : > { %v15252_v24 = vpop.eup %10762  ;;  %v7328_v47 = vmul.f32 0.0, %v15247_v23 }
 0x89e   : > { %v15255_v39 = vpop.eup %10764  ;;  %v7331_v54 = vmul.f32 0.0, %v15252_v24 }
 0x89f   : > { %v7330_v12 = vmul.f32 0.0, %v15255_v39 }
 0x8ef   : > { %v7343_v33 = vpop.permute.xlu1 %7342 }
 0x8f0   : > { %v7365_v56 = vmul.f32 %v15229_v43, %v7343_v33  ;;  %v7341_v61 = vpop.permute.xlu0 %7340 }
 0x8f1   : > { %v7364_v0 = vmul.f32 %v15231_v3, %v7341_v61 }
 0x8f2   : > { %7382 = vrot.lane.b32.xlu1 %v7365_v56, %s10811_s23 }
 0x8f3   : > { %v7347_v25 = vpop.permute.xlu1 %7346  ;;  %7380 = vrot.lane.b32.xlu0 %v7364_v0, %s10811_s23 }
 0x8f4   : > { %v7367_v35 = vmul.f32 %v15236_v13, %v7347_v25  ;;  %v7345_v10 = vpop.permute.xlu0 %7344 }
 0x8f5   : > { %v7366_v53 = vmul.f32 %v15239_v22, %v7345_v10 }
 0x8f6   : > { %7386 = vrot.lane.b32.xlu1 %v7367_v35, %s10811_s23 }
 0x8f7   : > { %v7351_v58 = vpop.permute.xlu1 %7350  ;;  %7384 = vrot.lane.b32.xlu0 %v7366_v53, %s10811_s23 }
 0x8f8   : > { %v7369_v19 = vmul.f32 %v15244_v44, %v7351_v58  ;;  %v7349_v14 = vpop.permute.xlu0 %7348 }
 0x8f9   : > { %v7368_v36 = vmul.f32 %v15247_v23, %v7349_v14 }
 0x8fa   : > { %7390 = vrot.lane.b32.xlu1 %v7369_v19, %s10811_s23 }
 0x8fb   : > { %v7355_v48 = vpop.permute.xlu1 %7354  ;;  %7388 = vrot.lane.b32.xlu0 %v7368_v36, %s10811_s23 }
 0x8fc   : > { %v7371_v63 = vmul.f32 %v15252_v24, %v7355_v48  ;;  %v7353_v6 = vpop.permute.xlu0 %7352 }
 0x8fd   : > { %v7370_v34 = vmul.f32 %v15255_v39, %v7353_v6  ;;  %v8402_v6 = vld [vmem:[%s15348_s9] ss:$0 sm:$0xff] }
 0x8fe   : > { %7394 = vrot.lane.b32.xlu1 %v7371_v63, %s10811_s23 }
 0x8ff   : > { %7392 = vrot.lane.b32.xlu0 %v7370_v34, %s10811_s23 }
 0x964   : > { %v7383_v40 = vpop.permute.xlu1 %7382 }
 0x965   : > { %v7405_v46 = vadd.f32 %v7383_v40, %v7325_v5  ;;  %v7381_v50 = vpop.permute.xlu0 %7380 }
 0x966   : > { %v7404_v11 = vadd.f32 %v7381_v50, %v7324_v59 }
 0x967   : > { %10766 = vtanh.f32 %v7405_v46 }
 0x968   : > { %10768 = vtanh.f32 %v7404_v11  ;;  %v7387_v1 = vpop.permute.xlu1 %7386 }
 0x969   : > { %v7407_v20 = vadd.f32 %v7387_v1, %v7327_v30  ;;  %v7385_v15 = vpop.permute.xlu0 %7384 }
 0x96a   : > { %v7406_v29 = vadd.f32 %v7385_v15, %v7326_v42 }
 0x96b   : > { %10770 = vtanh.f32 %v7407_v20 }
 0x96c   : > { %10772 = vtanh.f32 %v7406_v29  ;;  %v7391_v16 = vpop.permute.xlu1 %7390 }
 0x96d   : > { %v7409_v8 = vadd.f32 %v7391_v16, %v7329_v18  ;;  %v7389_v55 = vpop.permute.xlu0 %7388 }
 0x96e   : > { %v7408_v32 = vadd.f32 %v7389_v55, %v7328_v47 }
 0x96f   : > { %10774 = vtanh.f32 %v7409_v8 }
 0x970   : > { %10776 = vtanh.f32 %v7408_v32  ;;  %v7395_v49 = vpop.permute.xlu1 %7394 }
 0x971   : > { %v10767_v62 = vpop.eup %10766  ;;  %v7411_v7 = vadd.f32 %v7395_v49, %v7331_v54  ;;  %v7393_v51 = vpop.permute.xlu0 %7392 }
 0x972   : > { %v10769_v57 = vpop.eup %10768  ;;  %v7410_v26 = vadd.f32 %v7393_v51, %v7330_v12  ;;  %7430 = vrot.lane.b32.xlu1 %v10767_v62, %s10809_s12 }
 0x973   : > { %10778 = vtanh.f32 %v7411_v7  ;;  %7428 = vrot.lane.b32.xlu0 %v10769_v57, %s10809_s12 }
 0x974   : > { %10780 = vtanh.f32 %v7410_v26 }
 0x975   : > { %v10771_v38 = vpop.eup %10770 }
 0x976   : > { %v10773_v52 = vpop.eup %10772  ;;  %7434 = vrot.lane.b32.xlu1 %v10771_v38, %s10809_s12 }
 0x977   : > { %7432 = vrot.lane.b32.xlu0 %v10773_v52, %s10809_s12 }
 0x979   : > { %v10775_v28 = vpop.eup %10774 }
 0x97a   : > { %v10777_v27 = vpop.eup %10776  ;;  %7438 = vrot.lane.b32.xlu1 %v10775_v28, %s10809_s12 }
 0x97b   : > { %7436 = vrot.lane.b32.xlu0 %v10777_v27, %s10809_s12 }
 0x97d   : > { %v10779_v9 = vpop.eup %10778 }
 0x97e   : > { %v10781_v60 = vpop.eup %10780  ;;  %7442 = vrot.lane.b32.xlu1 %v10779_v9, %s10809_s12 }
 0x97f   : > { %7440 = vrot.lane.b32.xlu0 %v10781_v60, %s10809_s12  ;;  %s7696_s12 = sshll.u32 %s7687_s16, 3 }
 0x980   : > { %p900_p8 = scmp.lt.s32.totalorder %s7696_s12, 15 }
 0x982   : > { %s16389_s12 = smov (!%p900_p8, %s7696_s12), 15 }
 0x983   : > { %s7697_s18 = sshll.u32 %s16389_s12, 3 }
 0x9e4   : > { %v7431_v41 = vpop.permute.xlu1 %7430 }
 0x9e5   : > { %v7453_v17 = vmul.f32 %v15229_v43, %v7431_v41  ;;  %v7429_v33 = vpop.permute.xlu0 %7428 }
 0x9e6   : > { %v7452_v56 = vmul.f32 %v15231_v3, %v7429_v33 }
 0x9e7   : > { %7481 = vrot.lane.b32.xlu1 %v7453_v17, %s10811_s23 }
 0x9e8   : > { %v7435_v61 = vpop.permute.xlu1 %7434  ;;  %7479 = vrot.lane.b32.xlu0 %v7452_v56, %s10811_s23 }
 0x9e9   : > { %v7455_v0 = vmul.f32 %v15236_v13, %v7435_v61  ;;  %v7433_v25 = vpop.permute.xlu0 %7432 }
 0x9ea   : > { %v7454_v35 = vmul.f32 %v15239_v22, %v7433_v25 }
 0x9eb   : > { %7485 = vrot.lane.b32.xlu1 %v7455_v0, %s10811_s23 }
 0x9ec   : > { %v7439_v10 = vpop.permute.xlu1 %7438  ;;  %7483 = vrot.lane.b32.xlu0 %v7454_v35, %s10811_s23 }
 0x9ed   : > { %v7457_v43 = vmul.f32 %v15244_v44, %v7439_v10  ;;  %v7437_v53 = vpop.permute.xlu0 %7436 }
 0x9ee   : > { %v7456_v3 = vmul.f32 %v15247_v23, %v7437_v53 }
 0x9ef   : > { %7489 = vrot.lane.b32.xlu1 %v7457_v43, %s10811_s23 }
 0x9f0   : > { %v7443_v58 = vpop.permute.xlu1 %7442  ;;  %7487 = vrot.lane.b32.xlu0 %v7456_v3, %s10811_s23 }
 0x9f1   : > { %v7459_v13 = vmul.f32 %v15252_v24, %v7443_v58  ;;  %v7441_v19 = vpop.permute.xlu0 %7440 }
 0x9f2   : > { %v7458_v22 = vmul.f32 %v15255_v39, %v7441_v19 }
 0x9f3   : > { %7493 = vrot.lane.b32.xlu1 %v7459_v13, %s10811_s23 }
 0x9f4   : > { %7491 = vrot.lane.b32.xlu0 %v7458_v22, %s10811_s23  ;;  %s903_s23 = scalar_lea.vmem %s15349_s10, %s7697_s18 }
 0xa59   : > { %v7482_v14 = vpop.permute.xlu1 %7481 }
 0xa5a   : > { %v7480_v44 = vpop.permute.xlu0 %7479 }
 0xa5b   : > { %10147 = vmatprep.mubr.msk.f32.mxu1 %vm4662_vm2, %v7480_v44 }
 0xa5c   : > { %10148 = vmatmul.mubr.msk.f32.vlgmr.msra.gmra.mrb[152].mxu1 %vm4662_vm2, %v7482_v14 }
 0xa5d   : > { %v7486_v23 = vpop.permute.xlu1 %7485 }
 0xa5e   : > { %v7484_v36 = vpop.permute.xlu0 %7483 }
 0xa5f   : > { %10150 = vmatprep.mubr.msk.f32.mxu1 %vm4662_vm2, %v7484_v36 }
 0xa60   : > { %10151 = vmatmul.mubr.msk.f32.gmra.mrb[154].mxu1 %vm4662_vm2, %v7486_v23 }
 0xa61   : > { %v7490_v24 = vpop.permute.xlu1 %7489 }
 0xa62   : > { %v7488_v48 = vpop.permute.xlu0 %7487 }
 0xa63   : > { %10153 = vmatprep.mubr.msk.f32.mxu1 %vm4662_vm2, %v7488_v48 }
 0xa64   : > { %10154 = vmatmul.mubr.msk.f32.gmra.mrb[156].mxu1 %vm4662_vm2, %v7490_v24 }
 0xa65   : > { %v7494_v63 = vpop.permute.xlu1 %7493 }
 0xa66   : > { %v7492_v39 = vpop.permute.xlu0 %7491 }
 0xa67   : > { %10156 = vmatprep.mubr.msk.f32.mxu1 %vm4662_vm2, %v7492_v39 }
 0xa68   : > { %10157 = vmatmul.mubr.msk.f32.gmra.mrb[158].mxu1 %vm4662_vm2, %v7494_v63 }
 0xb2f   : > { %v10149_v34 = vpop.f32.mrb[152].mxu1 }
 0xb30   : > { %v7583_v5 = vadd.f32 %v10149_v34, %v8402_v6  ;;  %v7577_v40 = vpop.f32.mrb[153].mxu1 }
 0xb31   : > { %v7578_v59 = vadd.f32 %v8402_v6, %v7577_v40 }
 0xb32   : > { %7618 = vst.msk [vmem:[%s903_s23 + $0x8] sm:$0xff] %vm7616_vm12, %v7583_v5 }
 0xb33   : > { %7617 = vst.msk [vmem:[%s903_s23] sm:$0xff] %vm7616_vm12, %v7578_v59  ;;  %v10152_v46 = vpop.f32.mrb[154].mxu1 }
 0xb34   : > { %v7593_v50 = vadd.f32 %v10152_v46, %v8402_v6  ;;  %v7587_v11 = vpop.f32.mrb[155].mxu1 }
 0xb35   : > { %v7588_v30 = vadd.f32 %v8402_v6, %v7587_v11 }
 0xb36   : > { %7620 = vst.msk [vmem:[%s903_s23 + $0x18] sm:$0xff] %vm7616_vm12, %v7593_v50 }
 0xb37   : > { %7619 = vst.msk [vmem:[%s903_s23 + $0x10] sm:$0xff] %vm7616_vm12, %v7588_v30  ;;  %v10155_v1 = vpop.f32.mrb[156].mxu1 }
 0xb38   : > { %v7603_v42 = vadd.f32 %v10155_v1, %v8402_v6  ;;  %v7597_v20 = vpop.f32.mrb[157].mxu1 }
 0xb39   : > { %v7598_v15 = vadd.f32 %v8402_v6, %v7597_v20 }
 0xb3a   : > { %7622 = vst.msk [vmem:[%s903_s23 + $0x28] sm:$0xff] %vm7616_vm12, %v7603_v42 }
 0xb3b   : > { %7621 = vst.msk [vmem:[%s903_s23 + $0x20] sm:$0xff] %vm7616_vm12, %v7598_v15  ;;  %v10158_v29 = vpop.f32.mrb[158].mxu1 }
 0xb3c   : > { %v7613_v18 = vadd.f32 %v10158_v29, %v8402_v6  ;;  %v7607_v16 = vpop.f32.mrb[159].mxu1 }
 0xb3d   : > { %v7608_v47 = vadd.f32 %v8402_v6, %v7607_v16 }
 0xb3e   : > { %7624 = vst.msk [vmem:[%s903_s23 + $0x38] sm:$0xff] %vm7616_vm12, %v7613_v18 }
 0xb3f   : > { %7623 = vst.msk [vmem:[%s903_s23 + $0x30] sm:$0xff] %vm7616_vm12, %v7608_v47 }
 0xb40 PF: > { %p17_p9 = scmp.ge.s32.totalorder %s10884_s17, 4   ;;  %s16385_s13 = smov %s10801_s14 }
 0xb41   : > { %s16386_s14 = smov %s10893_s20  ;;  %s16387_s15 = smov %s10884_s17 }
 0xb42   :  { %19 = sbr.rel (!%p17_p9) target bundleno = 2 (0x2), region = 145 }

</bundles_post_ra>
